<compile_context>
chip_gen: v7x
topology: tpu7x:2x2x1
jax: 0.10.0
libtpu: 0.0.40
codegen_flags: <defaults>
</compile_context>

<pallas_src>
import jax
import jax.numpy as jnp
from jax.experimental import pallas as pl
from jax.experimental.pallas import tpu as pltpu


def _round_up(x, m):
    return ((x + m - 1) // m) * m


def gat_kernel(node_ref,
               in_nbr_ref, in_eid_ref, in_mask_ref,
               out_nbr_ref, out_eid_ref, out_mask_ref,
               table_ref, wna_n_ref, wna_e_ref, ba_ref,
               wnb_n_ref, wnb_e_ref, nb_bias_ref,
               o_ref):
    node = node_ref[...]                                   # [TN, D] f32
    tn, k = in_mask_ref.shape
    v, d = table_ref.shape

    # Per-node projections of the fused (nodeW @ attenW) weights: the logit of
    # every neighbor reduces to a dot of its features against these vectors.
    proj_n = jnp.dot(node, wna_n_ref[...],
                     preferred_element_type=jnp.float32)   # [TN, D]
    proj_e = jnp.dot(node, wna_e_ref[...],
                     preferred_element_type=jnp.float32)   # [TN, D]
    bscal = jnp.sum(node * ba_ref[...], axis=-1, keepdims=True)   # [TN, 1]

    iota_v = jax.lax.broadcasted_iota(jnp.int32, (1, 1, v), 2)    # [1, 1, V]
    table = table_ref[...]                                        # [V, D]

    def direction(nbr_ref, eid_ref, mask_ref):
        nbr = nbr_ref[...]                                        # [TN, K, D]

        # In-kernel edge-embedding lookup: one-hot @ resident table (V small).
        onehot = jnp.where(eid_ref[...][:, :, None] == iota_v, 1.0, 0.0)
        edge = jnp.dot(onehot.reshape(tn * k, v), table,
                       preferred_element_type=jnp.float32).reshape(tn, k, d)

        # logits[n,k] = cat[n,k,:] @ (nodeW_w @ attenW) @ node[n] + b_a·node[n]
        logits = (jnp.sum(nbr * proj_n[:, None, :], axis=-1)
                  + jnp.sum(edge * proj_e[:, None, :], axis=-1)
                  + bscal)                                        # [TN, K]

        # Softmax over the K neighbors; mask applied AFTER normalization,
        # exactly as in the PyTorch module.
        m = jnp.max(logits, axis=1, keepdims=True)
        e = jnp.exp(logits - m)
        s = jnp.sum(e, axis=1, keepdims=True)
        # pl.reciprocal keeps the divide off the VALU; approx=True would use
        # the EUP fast path at ~1e-3 accuracy — kept exact to preserve the
        # module's f32 forward semantics.
        w = e * pl.reciprocal(s, approx=False) * mask_ref[...]    # [TN, K]

        agg_n = jnp.sum(nbr * w[:, :, None], axis=1)              # [TN, D]
        agg_e = jnp.sum(edge * w[:, :, None], axis=1)             # [TN, D]
        return agg_n, agg_e

    in_an, in_ae = direction(in_nbr_ref, in_eid_ref, in_mask_ref)
    out_an, out_ae = direction(out_nbr_ref, out_eid_ref, out_mask_ref)

    # The `neighbors` Linear is shared and linear -> apply it once to the
    # summed aggregates:  in_nodes + out_nodes = (in_agg + out_agg) @ W + 2b.
    agg_n = in_an + out_an
    agg_e = in_ae + out_ae
    out = (jnp.dot(agg_n, wnb_n_ref[...], preferred_element_type=jnp.float32)
           + jnp.dot(agg_e, wnb_e_ref[...], preferred_element_type=jnp.float32)
           + 2.0 * nb_bias_ref[...])
    o_ref[...] = node + out


def gat_pallas(node2d, in_nbr, in_eid, in_mask2d, out_nbr, out_eid, out_mask2d,
               edge_table, wna_n_t, wna_e_t, ba, wnb_n, wnb_e, nb_bias,
               tile_n=1024):
    n, d = node2d.shape
    k = in_mask2d.shape[-1]
    v = edge_table.shape[0]

    # Tile over nodes; each row is independent (the softmax is over K), so the
    # tiling is exact.  Sizing (K=8, D=32, f32): per grid step both directions
    # stream TN*K*(D*4 + 4 + 4) bytes -> TN=1024 keeps double-buffered VMEM
    # comfortably under the default scoped limit on v5e (16 MiB) and
    # v6e / v7x (32 MiB).  Re-derive TN if D grows in production.
    tn = min(tile_n, _round_up(n, 8))
    n_pad = _round_up(n, tn)

    def pad_n(x):
        if n_pad == n:
            return x
        pad = [(0, n_pad - n)] + [(0, 0)] * (x.ndim - 1)
        return jnp.pad(x, pad)

    node_p = pad_n(node2d)
    in_nbr_p, out_nbr_p = pad_n(in_nbr), pad_n(out_nbr)
    in_eid_p, out_eid_p = pad_n(in_eid), pad_n(out_eid)
    in_mask_p, out_mask_p = pad_n(in_mask2d), pad_n(out_mask2d)

    tiled2 = lambda c: pl.BlockSpec((tn, c), lambda i: (i, 0))
    tiled3 = lambda c1, c2: pl.BlockSpec((tn, c1, c2), lambda i: (i, 0, 0))
    resident = lambda r, c: pl.BlockSpec((r, c), lambda i: (0, 0))

    out_p = pl.pallas_call(
        gat_kernel,
        out_shape=jax.ShapeDtypeStruct((n_pad, d), jnp.float32),
        grid=(n_pad // tn,),
        in_specs=[
            tiled2(d),            # node reps
            tiled3(k, d),         # in neighbor node features
            tiled2(k),            # in edge ids (int32)
            tiled2(k),            # in mask
            tiled3(k, d),         # out neighbor node features
            tiled2(k),            # out edge ids (int32)
            tiled2(k),            # out mask
            resident(v, d),       # edge embedding table (stays in VMEM)
            resident(d, d),       # (nodeW_node_half @ attenW)^T
            resident(d, d),       # (nodeW_edge_half @ attenW)^T
            resident(1, d),       # nodeW bias @ attenW
            resident(d, d),       # neighbors W (node half)
            resident(d, d),       # neighbors W (edge half)
            resident(1, d),       # neighbors bias
        ],
        out_specs=tiled2(d),
        compiler_params=pltpu.CompilerParams(
            dimension_semantics=("parallel",)),
    )(node_p, in_nbr_p, in_eid_p, in_mask_p, out_nbr_p, out_eid_p, out_mask_p,
      edge_table, wna_n_t, wna_e_t, ba, wnb_n, wnb_e, nb_bias)
    return out_p[:n]


def gat_forward(node_reps, in_indices, in_edges, in_mask,
                out_indices, out_edges, out_mask,
                edge_emb_table, nodew_w, nodew_b, attenw, neighw_w, neighw_b):
    """Plain-JAX glue (neighbor-row gather, weight fusion) + Pallas hot path.

    node_reps:  [1, N, D] float32
    *_indices:  [1, N, K] int32 (neighbor node ids)
    *_edges:    [1, N, K] int32 (edge vocab ids)
    *_mask:     [1, N, K] float32
    """
    node2d = node_reps[0]                       # [N, D]
    d = node2d.shape[-1]

    # Neighbor-node gather stays in XLA glue (data-dependent rows of a
    # potentially large table).
    # TODO(synk): for very large N move this in-kernel via a manual DMA
    # row-gather (PrefetchScalarGridSpec + make_async_copy).
    in_nbr = node2d[in_indices[0]]              # [N, K, D]
    out_nbr = node2d[out_indices[0]]            # [N, K, D]

    # Pre-fuse nodeW∘attenW and split every [2D, ·] weight into its
    # node-feature / edge-feature halves so the [N,K,2D] concat is never
    # materialized in HBM.
    wna = nodew_w @ attenw                      # [2D, D]
    wna_n_t = wna[:d].T                         # [D, D]
    wna_e_t = wna[d:].T                         # [D, D]
    ba = nodew_b @ attenw                       # [1, D]
    wnb_n = neighw_w[:d]                        # [D, D]
    wnb_e = neighw_w[d:]                        # [D, D]

    out2d = gat_pallas(node2d, in_nbr, in_edges[0].astype(jnp.int32),
                       in_mask[0], out_nbr, out_edges[0].astype(jnp.int32),
                       out_mask[0], edge_emb_table,
                       wna_n_t, wna_e_t, ba, wnb_n, wnb_e, neighw_b)
    return out2d[None]                          # [1, N, D]


def gat_reference(node_reps, in_indices, in_edges, in_mask,
                  out_indices, out_edges, out_mask,
                  edge_emb_table, nodew_w, nodew_b, attenw, neighw_w, neighw_b):
    """Pure-JAX reference mirroring the PyTorch forward (eval mode, unfused)."""
    node2d = node_reps[0]

    def direction(indices, edges, mask):
        nbr = node2d[indices[0]]
        edg = edge_emb_table[edges[0]]
        cat = jnp.concatenate([nbr, edg], axis=-1)              # [N, K, 2D]
        h = cat @ nodew_w + nodew_b[0]                          # [N, K, D]
        att = h @ attenw                                        # [N, K, D]
        logits = jnp.einsum('nkd,nd->nk', att, node2d)          # [N, K]
        alpha = jax.nn.softmax(logits, axis=1)
        weighted = cat * alpha[:, :, None] * mask[0][:, :, None]
        agg = weighted.sum(axis=1)                              # [N, 2D]
        return agg @ neighw_w + neighw_b[0]

    in_nodes = direction(in_indices, in_edges, in_mask)
    out_nodes = direction(out_indices, out_edges, out_mask)
    return (node2d + out_nodes + in_nodes)[None]


if __name__ == "__main__":
    # Small synthetic config: embed_dim D=32, node_num N=16, neighbors K=8,
    # edge_vocab_size V=16, batch=1 (the module squeezes the batch dim).
    N, K, D, V = 16, 8, 32, 16

    key = jax.random.PRNGKey(0)
    ks = jax.random.split(key, 12)

    # Parameters (weights stored transposed so x @ W == PyTorch x @ weight.T).
    edge_emb_table = jax.random.normal(ks[0], (V, D), jnp.float32) * 0.1
    nodew_w = jax.random.normal(ks[1], (2 * D, D), jnp.float32) * 0.1
    nodew_b = jax.random.normal(ks[2], (1, D), jnp.float32) * 0.1
    attenw = jax.random.normal(ks[3], (D, D), jnp.float32) * 0.1
    neighw_w = jax.random.normal(ks[4], (2 * D, D), jnp.float32) * 0.1
    neighw_b = jax.random.normal(ks[5], (1, D), jnp.float32) * 0.1

    # Inputs
    node_reps = jax.random.normal(ks[6], (1, N, D), jnp.float32)
    in_indices = jax.random.randint(ks[7], (1, N, K), 0, N, jnp.int32)
    in_edges = jax.random.randint(ks[8], (1, N, K), 0, V, jnp.int32)
    in_mask = jax.random.bernoulli(ks[9], 0.8, (1, N, K)).astype(jnp.float32)
    out_indices = jax.random.randint(ks[10], (1, N, K), 0, N, jnp.int32)
    out_edges = jax.random.randint(ks[11], (1, N, K), 0, V, jnp.int32)
    out_mask = jax.random.bernoulli(jax.random.fold_in(key, 99), 0.8,
                                    (1, N, K)).astype(jnp.float32)

    # TODO(synk): nn.Dropout skipped (eval-mode identity semantics).

    result = gat_forward(node_reps, in_indices, in_edges, in_mask,
                         out_indices, out_edges, out_mask,
                         edge_emb_table, nodew_w, nodew_b, attenw,
                         neighw_w, neighw_b)
    result = jax.block_until_ready(result)

    ref = gat_reference(node_reps, in_indices, in_edges, in_mask,
                        out_indices, out_edges, out_mask,
                        edge_emb_table, nodew_w, nodew_b, attenw,
                        neighw_w, neighw_b)
    assert result.shape == (1, N, D)
    assert jnp.allclose(result, ref, rtol=1e-3, atol=1e-3)

    print("KERNEL_OK")
</pallas_src>

<mosaic_0001>
module attributes {stable_mosaic.version = 11 : i64} {
  func.func @gat_kernel(%arg0: i32, %arg1: memref<16x32xf32, #tpu.memory_space<vmem>>, %arg2: memref<16x8x32xf32, #tpu.memory_space<vmem>>, %arg3: memref<16x8xi32, #tpu.memory_space<vmem>>, %arg4: memref<16x8xf32, #tpu.memory_space<vmem>>, %arg5: memref<16x8x32xf32, #tpu.memory_space<vmem>>, %arg6: memref<16x8xi32, #tpu.memory_space<vmem>>, %arg7: memref<16x8xf32, #tpu.memory_space<vmem>>, %arg8: memref<16x32xf32, #tpu.memory_space<vmem>>, %arg9: memref<32x32xf32, #tpu.memory_space<vmem>>, %arg10: memref<32x32xf32, #tpu.memory_space<vmem>>, %arg11: memref<1x32xf32, #tpu.memory_space<vmem>>, %arg12: memref<32x32xf32, #tpu.memory_space<vmem>>, %arg13: memref<32x32xf32, #tpu.memory_space<vmem>>, %arg14: memref<1x32xf32, #tpu.memory_space<vmem>>, %arg15: memref<16x32xf32, #tpu.memory_space<vmem>>) attributes {dimension_semantics = [#tpu.dimension_semantics<parallel>], iteration_bounds = array<i64: 1>, scalar_prefetch = 0 : i64, scratch_operands = 0 : i64, tpu.core_type = #tpu.core_type<tc>, window_params = [{transform_indices = @transform_0, window_bounds = array<i64: 16, 32>}, {transform_indices = @transform_1, window_bounds = array<i64: 16, 8, 32>}, {transform_indices = @transform_2, window_bounds = array<i64: 16, 8>}, {transform_indices = @transform_3, window_bounds = array<i64: 16, 8>}, {transform_indices = @transform_4, window_bounds = array<i64: 16, 8, 32>}, {transform_indices = @transform_5, window_bounds = array<i64: 16, 8>}, {transform_indices = @transform_6, window_bounds = array<i64: 16, 8>}, {pipeline_mode = #tpu.pipeline_mode<synchronous>, transform_indices = @transform_7, window_bounds = array<i64: 16, 32>}, {pipeline_mode = #tpu.pipeline_mode<synchronous>, transform_indices = @transform_8, window_bounds = array<i64: 32, 32>}, {pipeline_mode = #tpu.pipeline_mode<synchronous>, transform_indices = @transform_9, window_bounds = array<i64: 32, 32>}, {pipeline_mode = #tpu.pipeline_mode<synchronous>, transform_indices = @transform_10, window_bounds = array<i64: 1, 32>}, {pipeline_mode = #tpu.pipeline_mode<synchronous>, transform_indices = @transform_11, window_bounds = array<i64: 32, 32>}, {pipeline_mode = #tpu.pipeline_mode<synchronous>, transform_indices = @transform_12, window_bounds = array<i64: 32, 32>}, {pipeline_mode = #tpu.pipeline_mode<synchronous>, transform_indices = @transform_13, window_bounds = array<i64: 1, 32>}, {transform_indices = @transform_14, window_bounds = array<i64: 16, 32>}]} {
    %c0 = arith.constant 0 : index
    %c0_0 = arith.constant 0 : index
    %0 = vector.load %arg1[%c0, %c0_0] : memref<16x32xf32, #tpu.memory_space<vmem>>, vector<16x32xf32>
    %c0_1 = arith.constant 0 : index
    %c0_2 = arith.constant 0 : index
    %1 = vector.load %arg9[%c0_1, %c0_2] : memref<32x32xf32, #tpu.memory_space<vmem>>, vector<32x32xf32>
    %cst = arith.constant dense<0.000000e+00> : vector<16x32xf32>
    %2 = tpu.matmul %0, %1, %cst {dimension_numbers = #tpu.dot_dimension_numbers<[1], [0], [0], [1], [0, 0, 1, 1], [], []>} : vector<16x32xf32>, vector<32x32xf32>, vector<16x32xf32> -> vector<16x32xf32>
    %c0_3 = arith.constant 0 : index
    %c0_4 = arith.constant 0 : index
    %3 = vector.load %arg10[%c0_3, %c0_4] : memref<32x32xf32, #tpu.memory_space<vmem>>, vector<32x32xf32>
    %cst_5 = arith.constant dense<0.000000e+00> : vector<16x32xf32>
    %4 = tpu.matmul %0, %3, %cst_5 {dimension_numbers = #tpu.dot_dimension_numbers<[1], [0], [0], [1], [0, 0, 1, 1], [], []>} : vector<16x32xf32>, vector<32x32xf32>, vector<16x32xf32> -> vector<16x32xf32>
    %c0_6 = arith.constant 0 : index
    %c0_7 = arith.constant 0 : index
    %5 = vector.load %arg11[%c0_6, %c0_7] : memref<1x32xf32, #tpu.memory_space<vmem>>, vector<1x32xf32>
    %6 = vector.broadcast %5 : vector<1x32xf32> to vector<16x32xf32>
    %7 = arith.mulf %0, %6 : vector<16x32xf32>
    %cst_8 = arith.constant dense<0.000000e+00> : vector<16xf32>
    %8 = vector.multi_reduction <add>, %7, %cst_8 [1] : vector<16x32xf32> to vector<16xf32>
    %9 = vector.shape_cast %8 : vector<16xf32> to vector<16x1xf32>
    %10 = tpu.iota {dimensions = array<i32: 2>} : vector<1x1x16xi32>
    %c0_9 = arith.constant 0 : index
    %c0_10 = arith.constant 0 : index
    %11 = vector.load %arg8[%c0_9, %c0_10] : memref<16x32xf32, #tpu.memory_space<vmem>>, vector<16x32xf32>
    %c0_11 = arith.constant 0 : index
    %c0_12 = arith.constant 0 : index
    %c0_13 = arith.constant 0 : index
    %12 = vector.load %arg2[%c0_11, %c0_12, %c0_13] : memref<16x8x32xf32, #tpu.memory_space<vmem>>, vector<16x8x32xf32>
    %c0_14 = arith.constant 0 : index
    %c0_15 = arith.constant 0 : index
    %13 = vector.load %arg3[%c0_14, %c0_15] : memref<16x8xi32, #tpu.memory_space<vmem>>, vector<16x8xi32>
    %14 = vector.shape_cast %13 : vector<16x8xi32> to vector<16x8x1xi32>
    %15 = vector.broadcast %14 : vector<16x8x1xi32> to vector<16x8x16xi32>
    %16 = vector.broadcast %10 : vector<1x1x16xi32> to vector<16x8x16xi32>
    %17 = arith.cmpi eq, %15, %16 : vector<16x8x16xi32>
    %cst_16 = arith.constant 1.000000e+00 : f32
    %cst_17 = arith.constant 0.000000e+00 : f32
    %18 = vector.broadcast %cst_16 : f32 to vector<16x8x16xf32>
    %19 = vector.broadcast %cst_17 : f32 to vector<16x8x16xf32>
    %20 = arith.select %17, %18, %19 : vector<16x8x16xi1>, vector<16x8x16xf32>
    %21 = vector.shape_cast %20 : vector<16x8x16xf32> to vector<128x16xf32>
    %cst_18 = arith.constant dense<0.000000e+00> : vector<128x32xf32>
    %22 = tpu.matmul %21, %11, %cst_18 {dimension_numbers = #tpu.dot_dimension_numbers<[1], [0], [0], [1], [0, 0, 1, 1], [], []>} : vector<128x16xf32>, vector<16x32xf32>, vector<128x32xf32> -> vector<128x32xf32>
    %23 = vector.shape_cast %22 : vector<128x32xf32> to vector<16x8x32xf32>
    %24 = vector.shape_cast %2 : vector<16x32xf32> to vector<16x1x32xf32>
    %25 = vector.broadcast %24 : vector<16x1x32xf32> to vector<16x8x32xf32>
    %26 = arith.mulf %12, %25 : vector<16x8x32xf32>
    %cst_19 = arith.constant dense<0.000000e+00> : vector<16x8xf32>
    %27 = vector.multi_reduction <add>, %26, %cst_19 [2] : vector<16x8x32xf32> to vector<16x8xf32>
    %28 = vector.shape_cast %4 : vector<16x32xf32> to vector<16x1x32xf32>
    %29 = vector.broadcast %28 : vector<16x1x32xf32> to vector<16x8x32xf32>
    %30 = arith.mulf %23, %29 : vector<16x8x32xf32>
    %cst_20 = arith.constant dense<0.000000e+00> : vector<16x8xf32>
    %31 = vector.multi_reduction <add>, %30, %cst_20 [2] : vector<16x8x32xf32> to vector<16x8xf32>
    %32 = arith.addf %27, %31 : vector<16x8xf32>
    %33 = vector.broadcast %9 : vector<16x1xf32> to vector<16x8xf32>
    %34 = arith.addf %32, %33 : vector<16x8xf32>
    %cst_21 = arith.constant dense<0xFF800000> : vector<16xf32>
    %35 = vector.multi_reduction <maximumf>, %34, %cst_21 [1] : vector<16x8xf32> to vector<16xf32>
    %36 = vector.shape_cast %35 : vector<16xf32> to vector<16x1xf32>
    %37 = vector.broadcast %36 : vector<16x1xf32> to vector<16x8xf32>
    %38 = arith.subf %34, %37 : vector<16x8xf32>
    %39 = math.exp %38 : vector<16x8xf32>
    %cst_22 = arith.constant dense<0.000000e+00> : vector<16xf32>
    %40 = vector.multi_reduction <add>, %39, %cst_22 [1] : vector<16x8xf32> to vector<16xf32>
    %41 = vector.shape_cast %40 : vector<16xf32> to vector<16x1xf32>
    %42 = tpu.reciprocal %41 : vector<16x1xf32> -> vector<16x1xf32>
    %43 = vector.broadcast %42 : vector<16x1xf32> to vector<16x8xf32>
    %44 = arith.mulf %39, %43 : vector<16x8xf32>
    %c0_23 = arith.constant 0 : index
    %c0_24 = arith.constant 0 : index
    %45 = vector.load %arg4[%c0_23, %c0_24] : memref<16x8xf32, #tpu.memory_space<vmem>>, vector<16x8xf32>
    %46 = arith.mulf %44, %45 : vector<16x8xf32>
    %47 = vector.shape_cast %46 : vector<16x8xf32> to vector<16x8x1xf32>
    %48 = vector.broadcast %47 : vector<16x8x1xf32> to vector<16x8x32xf32>
    %49 = arith.mulf %12, %48 : vector<16x8x32xf32>
    %cst_25 = arith.constant dense<0.000000e+00> : vector<16x32xf32>
    %50 = vector.multi_reduction <add>, %49, %cst_25 [1] : vector<16x8x32xf32> to vector<16x32xf32>
    %51 = vector.shape_cast %46 : vector<16x8xf32> to vector<16x8x1xf32>
    %52 = vector.broadcast %51 : vector<16x8x1xf32> to vector<16x8x32xf32>
    %53 = arith.mulf %23, %52 : vector<16x8x32xf32>
    %cst_26 = arith.constant dense<0.000000e+00> : vector<16x32xf32>
    %54 = vector.multi_reduction <add>, %53, %cst_26 [1] : vector<16x8x32xf32> to vector<16x32xf32>
    %c0_27 = arith.constant 0 : index
    %c0_28 = arith.constant 0 : index
    %c0_29 = arith.constant 0 : index
    %55 = vector.load %arg5[%c0_27, %c0_28, %c0_29] : memref<16x8x32xf32, #tpu.memory_space<vmem>>, vector<16x8x32xf32>
    %c0_30 = arith.constant 0 : index
    %c0_31 = arith.constant 0 : index
    %56 = vector.load %arg6[%c0_30, %c0_31] : memref<16x8xi32, #tpu.memory_space<vmem>>, vector<16x8xi32>
    %57 = vector.shape_cast %56 : vector<16x8xi32> to vector<16x8x1xi32>
    %58 = vector.broadcast %57 : vector<16x8x1xi32> to vector<16x8x16xi32>
    %59 = vector.broadcast %10 : vector<1x1x16xi32> to vector<16x8x16xi32>
    %60 = arith.cmpi eq, %58, %59 : vector<16x8x16xi32>
    %cst_32 = arith.constant 1.000000e+00 : f32
    %cst_33 = arith.constant 0.000000e+00 : f32
    %61 = vector.broadcast %cst_32 : f32 to vector<16x8x16xf32>
    %62 = vector.broadcast %cst_33 : f32 to vector<16x8x16xf32>
    %63 = arith.select %60, %61, %62 : vector<16x8x16xi1>, vector<16x8x16xf32>
    %64 = vector.shape_cast %63 : vector<16x8x16xf32> to vector<128x16xf32>
    %cst_34 = arith.constant dense<0.000000e+00> : vector<128x32xf32>
    %65 = tpu.matmul %64, %11, %cst_34 {dimension_numbers = #tpu.dot_dimension_numbers<[1], [0], [0], [1], [0, 0, 1, 1], [], []>} : vector<128x16xf32>, vector<16x32xf32>, vector<128x32xf32> -> vector<128x32xf32>
    %66 = vector.shape_cast %65 : vector<128x32xf32> to vector<16x8x32xf32>
    %67 = vector.shape_cast %2 : vector<16x32xf32> to vector<16x1x32xf32>
    %68 = vector.broadcast %67 : vector<16x1x32xf32> to vector<16x8x32xf32>
    %69 = arith.mulf %55, %68 : vector<16x8x32xf32>
    %cst_35 = arith.constant dense<0.000000e+00> : vector<16x8xf32>
    %70 = vector.multi_reduction <add>, %69, %cst_35 [2] : vector<16x8x32xf32> to vector<16x8xf32>
    %71 = vector.shape_cast %4 : vector<16x32xf32> to vector<16x1x32xf32>
    %72 = vector.broadcast %71 : vector<16x1x32xf32> to vector<16x8x32xf32>
    %73 = arith.mulf %66, %72 : vector<16x8x32xf32>
    %cst_36 = arith.constant dense<0.000000e+00> : vector<16x8xf32>
    %74 = vector.multi_reduction <add>, %73, %cst_36 [2] : vector<16x8x32xf32> to vector<16x8xf32>
    %75 = arith.addf %70, %74 : vector<16x8xf32>
    %76 = vector.broadcast %9 : vector<16x1xf32> to vector<16x8xf32>
    %77 = arith.addf %75, %76 : vector<16x8xf32>
    %cst_37 = arith.constant dense<0xFF800000> : vector<16xf32>
    %78 = vector.multi_reduction <maximumf>, %77, %cst_37 [1] : vector<16x8xf32> to vector<16xf32>
    %79 = vector.shape_cast %78 : vector<16xf32> to vector<16x1xf32>
    %80 = vector.broadcast %79 : vector<16x1xf32> to vector<16x8xf32>
    %81 = arith.subf %77, %80 : vector<16x8xf32>
    %82 = math.exp %81 : vector<16x8xf32>
    %cst_38 = arith.constant dense<0.000000e+00> : vector<16xf32>
    %83 = vector.multi_reduction <add>, %82, %cst_38 [1] : vector<16x8xf32> to vector<16xf32>
    %84 = vector.shape_cast %83 : vector<16xf32> to vector<16x1xf32>
    %85 = tpu.reciprocal %84 : vector<16x1xf32> -> vector<16x1xf32>
    %86 = vector.broadcast %85 : vector<16x1xf32> to vector<16x8xf32>
    %87 = arith.mulf %82, %86 : vector<16x8xf32>
    %c0_39 = arith.constant 0 : index
    %c0_40 = arith.constant 0 : index
    %88 = vector.load %arg7[%c0_39, %c0_40] : memref<16x8xf32, #tpu.memory_space<vmem>>, vector<16x8xf32>
    %89 = arith.mulf %87, %88 : vector<16x8xf32>
    %90 = vector.shape_cast %89 : vector<16x8xf32> to vector<16x8x1xf32>
    %91 = vector.broadcast %90 : vector<16x8x1xf32> to vector<16x8x32xf32>
    %92 = arith.mulf %55, %91 : vector<16x8x32xf32>
    %cst_41 = arith.constant dense<0.000000e+00> : vector<16x32xf32>
    %93 = vector.multi_reduction <add>, %92, %cst_41 [1] : vector<16x8x32xf32> to vector<16x32xf32>
    %94 = vector.shape_cast %89 : vector<16x8xf32> to vector<16x8x1xf32>
    %95 = vector.broadcast %94 : vector<16x8x1xf32> to vector<16x8x32xf32>
    %96 = arith.mulf %66, %95 : vector<16x8x32xf32>
    %cst_42 = arith.constant dense<0.000000e+00> : vector<16x32xf32>
    %97 = vector.multi_reduction <add>, %96, %cst_42 [1] : vector<16x8x32xf32> to vector<16x32xf32>
    %98 = arith.addf %50, %93 : vector<16x32xf32>
    %99 = arith.addf %54, %97 : vector<16x32xf32>
    %c0_43 = arith.constant 0 : index
    %c0_44 = arith.constant 0 : index
    %100 = vector.load %arg12[%c0_43, %c0_44] : memref<32x32xf32, #tpu.memory_space<vmem>>, vector<32x32xf32>
    %cst_45 = arith.constant dense<0.000000e+00> : vector<16x32xf32>
    %101 = tpu.matmul %98, %100, %cst_45 {dimension_numbers = #tpu.dot_dimension_numbers<[1], [0], [0], [1], [0, 0, 1, 1], [], []>} : vector<16x32xf32>, vector<32x32xf32>, vector<16x32xf32> -> vector<16x32xf32>
    %c0_46 = arith.constant 0 : index
    %c0_47 = arith.constant 0 : index
    %102 = vector.load %arg13[%c0_46, %c0_47] : memref<32x32xf32, #tpu.memory_space<vmem>>, vector<32x32xf32>
    %cst_48 = arith.constant dense<0.000000e+00> : vector<16x32xf32>
    %103 = tpu.matmul %99, %102, %cst_48 {dimension_numbers = #tpu.dot_dimension_numbers<[1], [0], [0], [1], [0, 0, 1, 1], [], []>} : vector<16x32xf32>, vector<32x32xf32>, vector<16x32xf32> -> vector<16x32xf32>
    %104 = arith.addf %101, %103 : vector<16x32xf32>
    %c0_49 = arith.constant 0 : index
    %c0_50 = arith.constant 0 : index
    %105 = vector.load %arg14[%c0_49, %c0_50] : memref<1x32xf32, #tpu.memory_space<vmem>>, vector<1x32xf32>
    %cst_51 = arith.constant 2.000000e+00 : f32
    %106 = vector.broadcast %cst_51 : f32 to vector<1x32xf32>
    %107 = arith.mulf %106, %105 : vector<1x32xf32>
    %108 = vector.broadcast %107 : vector<1x32xf32> to vector<16x32xf32>
    %109 = arith.addf %104, %108 : vector<16x32xf32>
    %110 = arith.addf %0, %109 : vector<16x32xf32>
    %c0_52 = arith.constant 0 : index
    %c0_53 = arith.constant 0 : index
    %111 = vector.load %arg15[%c0_52, %c0_53] : memref<16x32xf32, #tpu.memory_space<vmem>>, vector<16x32xf32>
    tpu.vector_store %arg15[%c0_52, %c0_53], %110 {strides = array<i32>} : memref<16x32xf32, #tpu.memory_space<vmem>>, vector<16x32xf32>,
    return
  }
  func.func @transform_0(%arg0: i32) -> (i32, i32) {
    %c0_i32 = arith.constant 0 : i32
    %c0_i32_0 = arith.constant 0 : i32
    return %arg0, %c0_i32 : i32, i32
  }
  func.func @transform_1(%arg0: i32) -> (i32, i32, i32) {
    %c0_i32 = arith.constant 0 : i32
    %c0_i32_0 = arith.constant 0 : i32
    %c0_i32_1 = arith.constant 0 : i32
    return %arg0, %c0_i32, %c0_i32_0 : i32, i32, i32
  }
  func.func @transform_2(%arg0: i32) -> (i32, i32) {
    %c0_i32 = arith.constant 0 : i32
    %c0_i32_0 = arith.constant 0 : i32
    return %arg0, %c0_i32 : i32, i32
  }
  func.func @transform_3(%arg0: i32) -> (i32, i32) {
    %c0_i32 = arith.constant 0 : i32
    %c0_i32_0 = arith.constant 0 : i32
    return %arg0, %c0_i32 : i32, i32
  }
  func.func @transform_4(%arg0: i32) -> (i32, i32, i32) {
    %c0_i32 = arith.constant 0 : i32
    %c0_i32_0 = arith.constant 0 : i32
    %c0_i32_1 = arith.constant 0 : i32
    return %arg0, %c0_i32, %c0_i32_0 : i32, i32, i32
  }
  func.func @transform_5(%arg0: i32) -> (i32, i32) {
    %c0_i32 = arith.constant 0 : i32
    %c0_i32_0 = arith.constant 0 : i32
    return %arg0, %c0_i32 : i32, i32
  }
  func.func @transform_6(%arg0: i32) -> (i32, i32) {
    %c0_i32 = arith.constant 0 : i32
    %c0_i32_0 = arith.constant 0 : i32
    return %arg0, %c0_i32 : i32, i32
  }
  func.func @transform_7(%arg0: i32) -> (i32, i32) {
    %c0_i32 = arith.constant 0 : i32
    %c0_i32_0 = arith.constant 0 : i32
    %c0_i32_1 = arith.constant 0 : i32
    return %c0_i32, %c0_i32_0 : i32, i32
  }
  func.func @transform_8(%arg0: i32) -> (i32, i32) {
    %c0_i32 = arith.constant 0 : i32
    %c0_i32_0 = arith.constant 0 : i32
    %c0_i32_1 = arith.constant 0 : i32
    return %c0_i32, %c0_i32_0 : i32, i32
  }
  func.func @transform_9(%arg0: i32) -> (i32, i32) {
    %c0_i32 = arith.constant 0 : i32
    %c0_i32_0 = arith.constant 0 : i32
    %c0_i32_1 = arith.constant 0 : i32
    return %c0_i32, %c0_i32_0 : i32, i32
  }
  func.func @transform_10(%arg0: i32) -> (i32, i32) {
    %c0_i32 = arith.constant 0 : i32
    %c0_i32_0 = arith.constant 0 : i32
    %c0_i32_1 = arith.constant 0 : i32
    return %c0_i32, %c0_i32_0 : i32, i32
  }
  func.func @transform_11(%arg0: i32) -> (i32, i32) {
    %c0_i32 = arith.constant 0 : i32
    %c0_i32_0 = arith.constant 0 : i32
    %c0_i32_1 = arith.constant 0 : i32
    return %c0_i32, %c0_i32_0 : i32, i32
  }
  func.func @transform_12(%arg0: i32) -> (i32, i32) {
    %c0_i32 = arith.constant 0 : i32
    %c0_i32_0 = arith.constant 0 : i32
    %c0_i32_1 = arith.constant 0 : i32
    return %c0_i32, %c0_i32_0 : i32, i32
  }
  func.func @transform_13(%arg0: i32) -> (i32, i32) {
    %c0_i32 = arith.constant 0 : i32
    %c0_i32_0 = arith.constant 0 : i32
    %c0_i32_1 = arith.constant 0 : i32
    return %c0_i32, %c0_i32_0 : i32, i32
  }
  func.func @transform_14(%arg0: i32) -> (i32, i32) {
    %c0_i32 = arith.constant 0 : i32
    %c0_i32_0 = arith.constant 0 : i32
    return %arg0, %c0_i32 : i32, i32
  }
}

</mosaic_0001>

<bundles_post_ra>
// kernel: tpu_custom_call.1
= control target key start
LH: loop header
LB: loop body
LE: loop exit
PB: predicated region body
PF: predicated region fallthrough
CT: control target
= control target key end

     0   :  { %19 = vsyncpa [#allocation3], 0  ;;  %s6321_s0 = inlined_call_operand.hbm [shape: f32[16,32], index: 0, kind: input, shape index: {}]   ;;  %s6322_s1 = inlined_call_operand.hbm [shape: f32[16,8,32], index: 1, kind: input, shape index: {}]   ;;  %s6323_s2 = inlined_call_operand.vmem [shape: s32[16,8], index: 2, kind: input, shape index: {}]   ;;  %s6324_s3 = inlined_call_operand.vmem [shape: f32[16,8], index: 3, kind: input, shape index: {}]   ;;  %s6325_s4 = inlined_call_operand.hbm [shape: f32[16,8,32], index: 4, kind: input, shape index: {}]   ;;  %s6326_s5 = inlined_call_operand.vmem [shape: s32[16,8], index: 5, kind: input, shape index: {}]   ;;  %s6327_s6 = inlined_call_operand.vmem [shape: f32[16,8], index: 6, kind: input, shape index: {}]   ;;  %s6328_s7 = inlined_call_operand.hbm [shape: f32[16,32], index: 7, kind: input, shape index: {}]   ;;  %s6329_s8 = inlined_call_operand.vmem [shape: f32[32,32], index: 8, kind: input, shape index: {}]   ;;  %s6330_s9 = inlined_call_operand.vmem [shape: f32[32,32], index: 9, kind: input, shape index: {}]   ;;  %s6331_s10 = inlined_call_operand.vmem [shape: f32[1,32], index: 10, kind: input, shape index: {}]   ;;  %s6332_s11 = inlined_call_operand.vmem [shape: f32[32,32], index: 11, kind: input, shape index: {}]   ;;  %s6333_s12 = inlined_call_operand.vmem [shape: f32[32,32], index: 12, kind: input, shape index: {}]   ;;  %s6334_s13 = inlined_call_operand.vmem [shape: f32[1,32], index: 13, kind: input, shape index: {}]   ;;  %s6335_s14 = inlined_call_operand.hbm [shape: f32[16,32], index: 14, kind: output, shape index: {}]  }
   0x1   :  { %20 = vsyncpa [#allocation6], 0 }
   0x2   :  { %21 = vsyncpa [#allocation9], 0 }
   0x3   :  { %22 = vsyncpa [#allocation4], 0  ;;  %s4568_s29 = smov [#allocation5]   ;;  %s4569_s15 = smov [#allocation2]  }
   0x4   :  { %s40_s30 = sshll.u32 %s4568_s29, 4  ;;  %s28_s16 = sshll.u32 %s4569_s15, 4  ;;  %s41_s30 = int_to_ptr.vmem [resolvable:$true] %s40_s30  ;;  %s4653_s16 = int_to_ptr.vmem [resolvable:$true] %s28_s16 }
   0x5   :  { %s4450_s19 = scalar_lea.hbm %s6322_s1, 2048 }
   0x6   :  { %p4451_p0 = scmp.ne.s32.totalorder %s6322_s1, %s4450_s19  ;;  %p4454_p1 = scmp.lt.u32.totalorder %s4450_s19, %s6322_s1 }
   0x8   :  { %p4456_p2 = pnand %p4454_p1, %p4451_p0 }
   0xa   :  { %4459 = shalt.err (!%p4456_p2)
}
   0xb   :  { %s4460_s24 = scalar_lea.vmem %s41_s30, 2048  ;;  %p4465_p4 = scmp.lt.s32.totalorder %s41_s30, %s41_s30 }
   0xc   :  { %p4461_p3 = scmp.ne.s32.totalorder %s41_s30, %s4460_s24  ;;  %p4466_p5 = scmp.lt.s32.totalorder %s4460_s24, %s4460_s24 }
   0xe   :  { %p4467_p6 = por %p4466_p5, %p4465_p4 }
  0x10   :  { %p4468_p7 = pnand %p4467_p6, %p4461_p3 }
  0x12   :  { %4471 = shalt.err (!%p4468_p7)
}
  0x13   :  { %s4570_s25 = smov 128   ;;  %s4571_s26 = smov 8  }
  0x14   :  { %46 = dma.hbm_to_vmem [thread:$0]  %s6322_s1, 2048, %s41_s30, [#allocation6], %s4570_s25, %s4570_s25, %s4571_s26  }
  0x15   :  { %s4472_s17 = scalar_lea.hbm %s6321_s0, 256 }
  0x16   :  { %p4473_p8 = scmp.ne.s32.totalorder %s6321_s0, %s4472_s17  ;;  %p4476_p9 = scmp.lt.u32.totalorder %s4472_s17, %s6321_s0 }
  0x18   :  { %p4478_p10 = pnand %p4476_p9, %p4473_p8 }
  0x1a   :  { %4481 = shalt.err (!%p4478_p10)
}
  0x1b   :  { %s4482_s22 = scalar_lea.vmem %s4653_s16, 256  ;;  %p4487_p12 = scmp.lt.s32.totalorder %s4653_s16, %s4653_s16 }
  0x1c   :  { %p4483_p11 = scmp.ne.s32.totalorder %s4653_s16, %s4482_s22  ;;  %p4488_p13 = scmp.lt.s32.totalorder %s4482_s22, %s4482_s22 }
  0x1e   :  { %p4489_p0 = por %p4488_p13, %p4487_p12 }
  0x20   :  { %p4490_p1 = pnand %p4489_p0, %p4483_p11 }
  0x22   :  { %4493 = shalt.err (!%p4490_p1)
}
  0x23   :  { %34 = dma.hbm_to_vmem [thread:$0]  %s6321_s0, 256, %s4653_s16, [#allocation3], %s4570_s25, %s4570_s25, %s4571_s26  }
  0x24   :  { %s4572_s23 = smov [#allocation7]   ;;  %s4573_s27 = smov [#allocation8]  }
  0x25   :  { %s56_s24 = sshll.u32 %s4572_s23, 4  ;;  %s72_s28 = sshll.u32 %s4573_s27, 4  ;;  %s57_s24 = int_to_ptr.vmem [resolvable:$true] %s56_s24  ;;  %s4690_s28 = int_to_ptr.vmem [resolvable:$true] %s72_s28 }
  0x26   :  { %s4494_s17 = scalar_lea.hbm %s6325_s4, 2048 }
  0x27   :  { %p4495_p2 = scmp.ne.s32.totalorder %s6325_s4, %s4494_s17  ;;  %p4498_p3 = scmp.lt.u32.totalorder %s4494_s17, %s6325_s4 }
  0x29   :  { %p4500_p4 = pnand %p4498_p3, %p4495_p2 }
  0x2b   :  { %4503 = shalt.err (!%p4500_p4)
}
  0x2c   :  { %s4504_s0 = scalar_lea.vmem %s57_s24, 2048  ;;  %p4509_p6 = scmp.lt.s32.totalorder %s57_s24, %s57_s24 }
  0x2d   :  { %p4505_p5 = scmp.ne.s32.totalorder %s57_s24, %s4504_s0  ;;  %p4510_p7 = scmp.lt.s32.totalorder %s4504_s0, %s4504_s0 }
  0x2f   :  { %p4511_p8 = por %p4510_p7, %p4509_p6 }
  0x31   :  { %p4512_p9 = pnand %p4511_p8, %p4505_p5 }
  0x33   :  { %4515 = shalt.err (!%p4512_p9)
}
  0x34   :  { %62 = dma.hbm_to_vmem [thread:$0]  %s6325_s4, 2048, %s57_s24, [#allocation6], %s4570_s25, %s4570_s25, %s4571_s26  }
  0x35   :  { %s4516_s23 = scalar_lea.hbm %s6328_s7, 256 }
  0x36   :  { %p4517_p10 = scmp.ne.s32.totalorder %s6328_s7, %s4516_s23  ;;  %p4520_p11 = scmp.lt.u32.totalorder %s4516_s23, %s6328_s7 }
  0x38   :  { %p4522_p12 = pnand %p4520_p11, %p4517_p10 }
  0x3a   :  { %4525 = shalt.err (!%p4522_p12)
}
  0x3b   :  { %s4526_s18 = scalar_lea.vmem %s4690_s28, 256  ;;  %p4531_p0 = scmp.lt.s32.totalorder %s4690_s28, %s4690_s28 }
  0x3c   :  { %p4527_p13 = scmp.ne.s32.totalorder %s4690_s28, %s4526_s18  ;;  %p4532_p1 = scmp.lt.s32.totalorder %s4526_s18, %s4526_s18 }
  0x3e   :  { %p4533_p2 = por %p4532_p1, %p4531_p0 }
  0x40   :  { %p4534_p3 = pnand %p4533_p2, %p4527_p13 }
  0x42   :  { %4537 = shalt.err (!%p4534_p3)
}
  0x43   :  { %78 = dma.hbm_to_vmem [thread:$0]  %s6328_s7, 256, %s4690_s28, [#allocation9], %s4570_s25, %s4570_s25, %s4571_s26  }
  0x44   :  { %4560 = dma.done.wait [#allocation3], 256  }
  0x45   :  { %4561 = vsyncadd [#allocation3], 4294967040 }
  0x46   :  { %4562 = dma.done.wait [#allocation6], 4096  }
  0x47   :  { %4563 = vsyncadd [#allocation6], 4294963200 }
  0x48   :  { %4564 = dma.done.wait [#allocation9], 256  }
  0x49   :  { %4565 = vsyncadd [#allocation9], 4294967040  ;;  %v285_v0 = vlaneseq  ;;  %v4739_v4 = vld [vmem:[%s6323_s2] sm:$0xff]  ;;  %v106_v6 = vld [vmem:[%s6329_s8 + $0x8] sm:$0xff]  ;;  %vm109_vm0 = vcmask 261120   ;;  %vm451_vm1 = vcmask 130048  }
  0x4a   :  { %v105_v5 = vld [vmem:[%s6329_s8] sm:$0xff]  ;;  %v107_v11 = vld [vmem:[%s6329_s8 + $0x10] sm:$0xff]  ;;  %v108_v12 = vld [vmem:[%s6329_s8 + $0x18] sm:$0xff] }
  0x4b   :  { %v4728_v1 = vshrl.u32 %v285_v0, 7  ;;  %v4290_v9 = vpack.c.bf16 %v106_v6, %v105_v5  ;;  %v4754_v10 = vld [vmem:[%s6326_s5] sm:$0xff]  ;;  %v4294_v13 = vpack.c.bf16 %v108_v12, %v107_v11  ;;  %v192_v19 = vld [vmem:[%s6330_s9 + $0x8] sm:$0xff]  ;;  %v193_v20 = vld [vmem:[%s6330_s9 + $0x10] sm:$0xff]  ;;  %v4574_v11 = vmov 0.0  }
  0x4c   :  { %v4762_v14 = vld [vmem:[#allocation2] sm:$0xff]  ;;  %v194_v24 = vld [vmem:[%s6330_s9 + $0x18] sm:$0xff]  ;;  %v287_v25 = vld [vmem:[#allocation8] sm:$0xff] }
  0x4d   :  { %v4731_v2 = vsub.s32 0, %v4728_v1  ;;  %v4734_v3 = vsub.s32 1, %v4728_v1  ;;  %v4769_v17 = vsub.s32 2, %v4728_v1  ;;  %4291 = vmatprep.subr.bf16.mxu0 %v4290_v9  ;;  %4198 = vmatprep.mubr.msk.f32.mxu0 %vm109_vm0, %v4762_v14  ;;  %v191_v18 = vld [vmem:[%s6330_s9] sm:$0xff]  ;;  %v4787_v23 = vsub.s32 3, %v4728_v1  ;;  %v288_v26 = vld [vmem:[#allocation8 + $0x8] sm:$0xff] }
  0x4e   :  { %4293 = vmatpush3.bf16.msra.mxu0 %v4290_v9  ;;  %4209 = vmatprep.mubr.msk.f32.mxu1 %vm109_vm0, %v4762_v14  ;;  %v4794_v27 = vld [vmem:[#allocation2 + $0x8] sm:$0xff]  ;;  %v4298_v28 = vpack.c.bf16 %v192_v19, %v191_v18  ;;  %v4302_v29 = vpack.c.bf16 %v194_v24, %v193_v20  ;;  %v4306_v30 = vpack.c.bf16 %v288_v26, %v287_v25  ;;  %v4801_v33 = vsub.s32 4, %v4728_v1  ;;  %v4093_v63 = vld [vmem:[%s6331_s10] ss:$0 sm:$0xff] }
  0x4f   :  { %v317_v7 = vrot.slane %v4739_v4, %v4734_v3  ;;  %v310_v8 = vrot.slane %v4739_v4, %v4731_v2  ;;  %v2297_v15 = vrot.slane %v4754_v10, %v4734_v3  ;;  %v2290_v16 = vrot.slane %v4754_v10, %v4731_v2  ;;  %4295 = vmatprep.subr.bf16.mxu0 %v4294_v13  ;;  %v2286_v45 = vld [vmem:[%s6326_s5 + $0x8] sm:$0xff]  ;;  %s4577_s5 = smov [#allocation10]  }
  0x50   :  { %v2304_v21 = vrot.slane %v4754_v10, %v4769_v17  ;;  %v324_v22 = vrot.slane %v4739_v4, %v4769_v17  ;;  %v2311_v31 = vrot.slane %v4754_v10, %v4787_v23  ;;  %v331_v32 = vrot.slane %v4739_v4, %v4787_v23  ;;  %4299 = vmatprep.subr.bf16.mxu1 %v4298_v28  ;;  %v306_v46 = vld [vmem:[%s6323_s2 + $0x8] sm:$0xff]  ;;  %s4075_s10 = sshll.u32 %s4577_s5, 4  ;;  %s4076_s10 = int_to_ptr.vmem [resolvable:$true] %s4075_s10 }
  0x51   :  { %319 = vbcast.lane.b32.xlu1 %v317_v7, 256  ;;  %312 = vbcast.lane.b32.xlu0 %v310_v8, 256  ;;  %v2318_v34 = vrot.slane %v4754_v10, %v4801_v33  ;;  %v338_v35 = vrot.slane %v4739_v4, %v4801_v33  ;;  %v4810_v36 = vsub.s32 5, %v4728_v1  ;;  %v4817_v39 = vsub.s32 6, %v4728_v1  ;;  %p4543_p5 = scmp.lt.s32.totalorder %s4076_s10, %s4076_s10 }
  0x52   :  { %4297 = vmatpush3.bf16.msra.mxu0 %v4294_v13  ;;  %4301 = vmatpush3.bf16.msra.mxu1 %v4298_v28  ;;  %v4826_v42 = vsub.s32 7, %v4728_v1  ;;  %v2346_v47 = vrot.slane %v2286_v45, %v4731_v2  ;;  %v366_v48 = vrot.slane %v306_v46, %v4731_v2  ;;  %v2353_v49 = vrot.slane %v2286_v45, %v4734_v3 }
  0x53   :  { %4307 = vmatprep.subr.bf16.mxu0 %v4306_v30  ;;  %4303 = vmatprep.subr.bf16.mxu1 %v4302_v29  ;;  %v2325_v37 = vrot.slane %v4754_v10, %v4810_v36  ;;  %v345_v38 = vrot.slane %v4739_v4, %v4810_v36  ;;  %v2332_v40 = vrot.slane %v4754_v10, %v4817_v39  ;;  %v4862_v8 = vand.u32 127, %v285_v0 }
  0x54   :  { %v352_v41 = vrot.slane %v4739_v4, %v4817_v39  ;;  %v2339_v43 = vrot.slane %v4754_v10, %v4826_v42  ;;  %v359_v44 = vrot.slane %v4739_v4, %v4826_v42  ;;  %v373_v50 = vrot.slane %v306_v46, %v4734_v3 }
  0x55   :  { %2299 = vbcast.lane.b32.xlu1 %v2297_v15, 256  ;;  %2292 = vbcast.lane.b32.xlu0 %v2290_v16, 256  ;;  %v2360_v51 = vrot.slane %v2286_v45, %v4769_v17  ;;  %v380_v52 = vrot.slane %v306_v46, %v4769_v17  ;;  %v2367_v53 = vrot.slane %v2286_v45, %v4787_v23 }
  0x56   :  { %4199 = vmatmul.mubr.msk.f32.vlgmr.msra.gmra.mrb[0].mxu0 %vm109_vm0, %v4794_v27  ;;  %4305 = vmatpush3.bf16.msra.mxu1 %v4302_v29  ;;  %v387_v54 = vrot.slane %v306_v46, %v4787_v23  ;;  %v2374_v55 = vrot.slane %v2286_v45, %v4801_v33  ;;  %v394_v56 = vrot.slane %v306_v46, %v4801_v33 }
  0x57   :  { %4309 = vmatpush3.bf16.msra.mxu0 %v4306_v30  ;;  %4311 = vmatprep.subr.bf16.mxu1 %v4306_v30  ;;  %v2381_v57 = vrot.slane %v2286_v45, %v4810_v36  ;;  %v401_v58 = vrot.slane %v306_v46, %v4810_v36  ;;  %v2388_v59 = vrot.slane %v2286_v45, %v4817_v39 }
  0x58   :  { %v408_v60 = vrot.slane %v306_v46, %v4817_v39  ;;  %v2395_v61 = vrot.slane %v2286_v45, %v4826_v42  ;;  %v415_v62 = vrot.slane %v306_v46, %v4826_v42  ;;  %v278_v4 = vmul.f32 %v4093_v63, %v4794_v27 }
  0x59   :  { %2306 = vbcast.lane.b32.xlu1 %v2304_v21, 256  ;;  %326 = vbcast.lane.b32.xlu0 %v324_v22, 256  ;;  %v277_v5 = vmul.f32 %v4093_v63, %v4762_v14 }
  0x5a   :  { %4210 = vmatmul.mubr.msk.f32.vlgmr.msra.gmra.mrb[0].mxu1 %vm109_vm0, %v4794_v27  ;;  %v282_v6 = vsel %vm109_vm0, %v278_v4, 0.0 }
  0x5b   :  { %4313 = vmatpush3.bf16.msra.mxu1 %v4306_v30  ;;  %v279_v7 = vsel %vm109_vm0, %v277_v5, 0.0 }
  0x5d   :  { %2313 = vbcast.lane.b32.xlu1 %v2311_v31, 256  ;;  %333 = vbcast.lane.b32.xlu0 %v331_v32, 256 }
  0x61   :  { %2320 = vbcast.lane.b32.xlu1 %v2318_v34, 256  ;;  %340 = vbcast.lane.b32.xlu0 %v338_v35, 256 }
  0x65   :  { %2327 = vbcast.lane.b32.xlu1 %v2325_v37, 256  ;;  %347 = vbcast.lane.b32.xlu0 %v345_v38, 256 }
  0x69   :  { %2334 = vbcast.lane.b32.xlu1 %v2332_v40, 256  ;;  %354 = vbcast.lane.b32.xlu0 %v352_v41, 256 }
  0x6d   :  { %2341 = vbcast.lane.b32.xlu1 %v2339_v43, 256  ;;  %361 = vbcast.lane.b32.xlu0 %v359_v44, 256 }
  0x71   :  { %2348 = vbcast.lane.b32.xlu1 %v2346_v47, 256  ;;  %368 = vbcast.lane.b32.xlu0 %v366_v48, 256 }
  0x75   :  { %2355 = vbcast.lane.b32.xlu1 %v2353_v49, 256  ;;  %375 = vbcast.lane.b32.xlu0 %v373_v50, 256 }
  0x79   :  { %2362 = vbcast.lane.b32.xlu1 %v2360_v51, 256  ;;  %382 = vbcast.lane.b32.xlu0 %v380_v52, 256 }
  0x7d   :  { %2369 = vbcast.lane.b32.xlu1 %v2367_v53, 256  ;;  %389 = vbcast.lane.b32.xlu0 %v387_v54, 256 }
  0x81   :  { %2376 = vbcast.lane.b32.xlu1 %v2374_v55, 256  ;;  %396 = vbcast.lane.b32.xlu0 %v394_v56, 256 }
  0x85   :  { %2383 = vbcast.lane.b32.xlu1 %v2381_v57, 256  ;;  %403 = vbcast.lane.b32.xlu0 %v401_v58, 256 }
  0x89   :  { %2390 = vbcast.lane.b32.xlu1 %v2388_v59, 256  ;;  %410 = vbcast.lane.b32.xlu0 %v408_v60, 256 }
  0x8d   :  { %2397 = vbcast.lane.b32.xlu1 %v2395_v61, 256  ;;  %417 = vbcast.lane.b32.xlu0 %v415_v62, 256 }
  0xac   :  { %280 = vadd.xlane.f32.xlu0 %v279_v7 }
  0xb1   :  { %283 = vadd.xlane.f32.xlu1 %v282_v6 }
  0xc3   :  { %v320_v9 = vpop.permute.xlu1 %319  ;;  %v313_v10 = vpop.permute.xlu0 %312 }
  0xc4   :  { %vm420_vm2 = vcmp.eq.s32.totalorder %v320_v9, %v4862_v8  ;;  %vm419_vm3 = vcmp.eq.s32.totalorder %v313_v10, %v4862_v8 }
  0xc5   :  { %v436_v12 = vsel %vm420_vm2, 1.0, %v4574_v11  ;;  %v435_v13 = vsel %vm419_vm3, 1.0, %v4574_v11 }
  0xc6   :  { %4216 = vmatprep.mubr.msk.f32.mxu0 %vm451_vm1, %v435_v13 }
  0xc7   :  { %v2300_v14 = vpop.permute.xlu1 %2299  ;;  %v2293_v15 = vpop.permute.xlu0 %2292  ;;  %4217 = vmatmul.mubr.msk.f32.vlgmr.msra.gmra.mrb[2].mxu0 %vm451_vm1, %v436_v12 }
  0xc8   :  { %vm2400_vm4 = vcmp.eq.s32.totalorder %v2300_v14, %v4862_v8  ;;  %vm2399_vm5 = vcmp.eq.s32.totalorder %v2293_v15, %v4862_v8 }
  0xc9   :  { %v2416_v0 = vsel %vm2400_vm4, 1.0, %v4574_v11  ;;  %v2415_v16 = vsel %vm2399_vm5, 1.0, %v4574_v11 }
  0xca   :  { %4244 = vmatprep.mubr.msk.f32.mxu1 %vm451_vm1, %v2415_v16 }
  0xcb   :  { %v2307_v18 = vpop.permute.xlu1 %2306  ;;  %v327_v19 = vpop.permute.xlu0 %326  ;;  %4245 = vmatmul.mubr.msk.f32.vlgmr.msra.gmra.mrb[2].mxu1 %vm451_vm1, %v2416_v0 }
  0xcc   :  { %vm2401_vm6 = vcmp.eq.s32.totalorder %v2307_v18, %v4862_v8  ;;  %vm421_vm7 = vcmp.eq.s32.totalorder %v327_v19, %v4862_v8 }
  0xcd   :  { %v2417_v20 = vsel %vm2401_vm6, 1.0, %v4574_v11  ;;  %v437_v21 = vsel %vm421_vm7, 1.0, %v4574_v11 }
  0xce   :  { %4219 = vmatprep.mubr.msk.f32.mxu0 %vm451_vm1, %v437_v21  ;;  %4247 = vmatprep.mubr.msk.f32.mxu1 %vm451_vm1, %v2417_v20  ;;  %v4575_v21 = vmov 1966171168  }
  0xcf   :  { %v2314_v22 = vpop.permute.xlu1 %2313  ;;  %v334_v24 = vpop.permute.xlu0 %333 }
  0xd0   :  { %vm2402_vm8 = vcmp.eq.s32.totalorder %v2314_v22, %v4862_v8  ;;  %vm422_vm9 = vcmp.eq.s32.totalorder %v334_v24, %v4862_v8  ;;  %v649_v22 = vunpack.c.l.s4 %v4575_v21 }
  0xd1   :  { %v2418_v25 = vsel %vm2402_vm8, 1.0, %v4574_v11  ;;  %v438_v26 = vsel %vm422_vm9, 1.0, %v4574_v11 }
  0xd2   :  { %4220 = vmatmul.mubr.msk.f32.gmra.mrb[4].mxu0 %vm451_vm1, %v438_v26  ;;  %4248 = vmatmul.mubr.msk.f32.gmra.mrb[4].mxu1 %vm451_vm1, %v2418_v25  ;;  %v650_v24 = vunpack.c.0.s8 %v649_v22  ;;  %v2278_v22 = vld [vmem:[#allocation7 + $0x48] sm:$0xff] }
  0xd3   :  { %v2321_v27 = vpop.permute.xlu1 %2320  ;;  %v341_v28 = vpop.permute.xlu0 %340 }
  0xd4   :  { %vm2403_vm10 = vcmp.eq.s32.totalorder %v2321_v27, %v4862_v8  ;;  %vm423_vm11 = vcmp.eq.s32.totalorder %v341_v28, %v4862_v8  ;;  %v4961_v25 = vsub.s32 %v650_v24, %v4728_v1  ;;  %v2270_v24 = vld [vmem:[#allocation7 + $0x8] sm:$0xff] }
  0xd5   :  { %v2419_v29 = vsel %vm2403_vm10, 1.0, %v4574_v11  ;;  %v439_v30 = vsel %vm423_vm11, 1.0, %v4574_v11 }
  0xd6   :  { %4222 = vmatprep.mubr.msk.f32.mxu0 %vm451_vm1, %v439_v30  ;;  %4250 = vmatprep.mubr.msk.f32.mxu1 %vm451_vm1, %v2419_v29 }
  0xd7   :  { %v2328_v31 = vpop.permute.xlu1 %2327  ;;  %v348_v32 = vpop.permute.xlu0 %347 }
  0xd8   :  { %vm2404_vm12 = vcmp.eq.s32.totalorder %v2328_v31, %v4862_v8  ;;  %vm424_vm13 = vcmp.eq.s32.totalorder %v348_v32, %v4862_v8 }
  0xd9   :  { %v2420_v34 = vsel %vm2404_vm12, 1.0, %v4574_v11  ;;  %v440_v35 = vsel %vm424_vm13, 1.0, %v4574_v11 }
  0xda   :  { %4223 = vmatmul.mubr.msk.f32.gmra.mrb[6].mxu0 %vm451_vm1, %v440_v35  ;;  %4251 = vmatmul.mubr.msk.f32.gmra.mrb[6].mxu1 %vm451_vm1, %v2420_v34 }
  0xdb   :  { %v2335_v37 = vpop.permute.xlu1 %2334  ;;  %v355_v38 = vpop.permute.xlu0 %354 }
  0xdc   :  { %vm2405_vm14 = vcmp.eq.s32.totalorder %v2335_v37, %v4862_v8  ;;  %vm425_vm15 = vcmp.eq.s32.totalorder %v355_v38, %v4862_v8 }
  0xdd   :  { %v2421_v40 = vsel %vm2405_vm14, 1.0, %v4574_v11  ;;  %v441_v41 = vsel %vm425_vm15, 1.0, %v4574_v11 }
  0xde   :  { %4225 = vmatprep.mubr.msk.f32.mxu0 %vm451_vm1, %v441_v41  ;;  %4253 = vmatprep.mubr.msk.f32.mxu1 %vm451_vm1, %v2421_v40 }
  0xdf   :  { %v2342_v43 = vpop.permute.xlu1 %2341  ;;  %v362_v44 = vpop.permute.xlu0 %361 }
  0xe0   :  { %vm2406_vm2 = vcmp.eq.s32.totalorder %v2342_v43, %v4862_v8  ;;  %vm426_vm3 = vcmp.eq.s32.totalorder %v362_v44, %v4862_v8 }
  0xe1   :  { %v2422_v45 = vsel %vm2406_vm2, 1.0, %v4574_v11  ;;  %v442_v46 = vsel %vm426_vm3, 1.0, %v4574_v11 }
  0xe2   :  { %4226 = vmatmul.mubr.msk.f32.gmra.mrb[8].mxu0 %vm451_vm1, %v442_v46  ;;  %4254 = vmatmul.mubr.msk.f32.gmra.mrb[8].mxu1 %vm451_vm1, %v2422_v45  ;;  %v2277_v45 = vld [vmem:[#allocation7 + $0x40] sm:$0xff] }
  0xe3   :  { %v2349_v47 = vpop.permute.xlu1 %2348  ;;  %v369_v48 = vpop.permute.xlu0 %368 }
  0xe4   :  { %vm2407_vm4 = vcmp.eq.s32.totalorder %v2349_v47, %v4862_v8  ;;  %vm427_vm5 = vcmp.eq.s32.totalorder %v369_v48, %v4862_v8  ;;  %v297_v48 = vld [vmem:[#allocation5 + $0x40] sm:$0xff] }
  0xe5   :  { %v2423_v49 = vsel %vm2407_vm4, 1.0, %v4574_v11  ;;  %v443_v50 = vsel %vm427_vm5, 1.0, %v4574_v11 }
  0xe6   :  { %4228 = vmatprep.mubr.msk.f32.mxu0 %vm451_vm1, %v443_v50  ;;  %4256 = vmatprep.mubr.msk.f32.mxu1 %vm451_vm1, %v2423_v49  ;;  %v2269_v49 = vld [vmem:[#allocation7] sm:$0xff] }
  0xe7   :  { %v2356_v51 = vpop.permute.xlu1 %2355  ;;  %v376_v52 = vpop.permute.xlu0 %375  ;;  %v289_v50 = vld [vmem:[#allocation5] sm:$0xff] }
  0xe8   :  { %vm2408_vm6 = vcmp.eq.s32.totalorder %v2356_v51, %v4862_v8  ;;  %vm428_vm7 = vcmp.eq.s32.totalorder %v376_v52, %v4862_v8 }
  0xe9   :  { %v2424_v53 = vsel %vm2408_vm6, 1.0, %v4574_v11  ;;  %v444_v54 = vsel %vm428_vm7, 1.0, %v4574_v11  ;;  %vm1377_vm6 = vcmask 1042434   ;;  %vm1379_vm7 = vcmask 1043459  }
  0xea   :  { %4229 = vmatmul.mubr.msk.f32.gmra.mrb[10].mxu0 %vm451_vm1, %v444_v54  ;;  %4257 = vmatmul.mubr.msk.f32.gmra.mrb[10].mxu1 %vm451_vm1, %v2424_v53 }
  0xeb   :  { %v2363_v55 = vpop.permute.xlu1 %2362  ;;  %v383_v56 = vpop.permute.xlu0 %382 }
  0xec   :  { %vm2409_vm8 = vcmp.eq.s32.totalorder %v2363_v55, %v4862_v8  ;;  %vm429_vm9 = vcmp.eq.s32.totalorder %v383_v56, %v4862_v8 }
  0xed   :  { %v2425_v57 = vsel %vm2409_vm8, 1.0, %v4574_v11  ;;  %v445_v58 = vsel %vm429_vm9, 1.0, %v4574_v11  ;;  %vm1381_vm8 = vcmask 1044484   ;;  %vm1383_vm9 = vcmask 1045509  }
  0xee   :  { %4231 = vmatprep.mubr.msk.f32.mxu0 %vm451_vm1, %v445_v58  ;;  %4259 = vmatprep.mubr.msk.f32.mxu1 %vm451_vm1, %v2425_v57 }
  0xef   :  { %v2370_v59 = vpop.permute.xlu1 %2369  ;;  %v390_v60 = vpop.permute.xlu0 %389 }
  0xf0   :  { %vm2410_vm10 = vcmp.eq.s32.totalorder %v2370_v59, %v4862_v8  ;;  %vm430_vm11 = vcmp.eq.s32.totalorder %v390_v60, %v4862_v8 }
  0xf1   :  { %v2426_v61 = vsel %vm2410_vm10, 1.0, %v4574_v11  ;;  %v446_v62 = vsel %vm430_vm11, 1.0, %v4574_v11  ;;  %vm1385_vm10 = vcmask 1046534   ;;  %vm1387_vm11 = vcmask 1047559  }
  0xf2   :  { %4232 = vmatmul.mubr.msk.f32.gmra.mrb[12].mxu0 %vm451_vm1, %v446_v62  ;;  %4260 = vmatmul.mubr.msk.f32.gmra.mrb[12].mxu1 %vm451_vm1, %v2426_v61  ;;  %v299_v62 = vld [vmem:[#allocation5 + $0x50] sm:$0xff] }
  0xf3   :  { %v2377_v63 = vpop.permute.xlu1 %2376  ;;  %v397_v4 = vpop.permute.xlu0 %396 }
  0xf4   :  { %vm2411_vm12 = vcmp.eq.s32.totalorder %v2377_v63, %v4862_v8  ;;  %vm431_vm13 = vcmp.eq.s32.totalorder %v397_v4, %v4862_v8  ;;  %v298_v63 = vld [vmem:[#allocation5 + $0x48] sm:$0xff] }
  0xf5   :  { %v2427_v5 = vsel %vm2411_vm12, 1.0, %v4574_v11  ;;  %v447_v6 = vsel %vm431_vm13, 1.0, %v4574_v11  ;;  %vm1398_vm12 = vcmask 64512  }
  0xf6   :  { %4234 = vmatprep.mubr.msk.f32.mxu0 %vm451_vm1, %v447_v6  ;;  %4262 = vmatprep.mubr.msk.f32.mxu1 %vm451_vm1, %v2427_v5 }
  0xf7   :  { %v2384_v7 = vpop.permute.xlu1 %2383  ;;  %v404_v9 = vpop.permute.xlu0 %403 }
  0xf8   :  { %vm2412_vm14 = vcmp.eq.s32.totalorder %v2384_v7, %v4862_v8  ;;  %vm432_vm15 = vcmp.eq.s32.totalorder %v404_v9, %v4862_v8 }
  0xf9   :  { %v2428_v10 = vsel %vm2412_vm14, 1.0, %v4574_v11  ;;  %v448_v12 = vsel %vm432_vm15, 1.0, %v4574_v11 }
  0xfa   :  { %4235 = vmatmul.mubr.msk.f32.gmra.mrb[14].mxu0 %vm451_vm1, %v448_v12  ;;  %4263 = vmatmul.mubr.msk.f32.gmra.mrb[14].mxu1 %vm451_vm1, %v2428_v10 }
  0xfb   :  { %v2391_v13 = vpop.permute.xlu1 %2390  ;;  %v411_v14 = vpop.permute.xlu0 %410 }
  0xfc   :  { %vm2413_vm2 = vcmp.eq.s32.totalorder %v2391_v13, %v4862_v8  ;;  %vm433_vm3 = vcmp.eq.s32.totalorder %v411_v14, %v4862_v8  ;;  %v301_v14 = vld [vmem:[#allocation5 + $0x60] sm:$0xff] }
  0xfd   :  { %v2429_v15 = vsel %vm2413_vm2, 1.0, %v4574_v11  ;;  %v449_v0 = vsel %vm433_vm3, 1.0, %v4574_v11 }
  0xfe   :  { %4237 = vmatprep.mubr.msk.f32.mxu0 %vm451_vm1, %v449_v0  ;;  %4265 = vmatprep.mubr.msk.f32.mxu1 %vm451_vm1, %v2429_v15  ;;  %v290_v15 = vld [vmem:[#allocation5 + $0x8] sm:$0xff] }
  0xff   :  { %v2398_v16 = vpop.permute.xlu1 %2397  ;;  %v418_v18 = vpop.permute.xlu0 %417 }
 0x100   :  { %vm2414_vm4 = vcmp.eq.s32.totalorder %v2398_v16, %v4862_v8  ;;  %vm434_vm5 = vcmp.eq.s32.totalorder %v418_v18, %v4862_v8 }
 0x101   :  { %v2430_v19 = vsel %vm2414_vm4, 1.0, %v4574_v11  ;;  %v450_v20 = vsel %vm434_vm5, 1.0, %v4574_v11 }
 0x102   :  { %4238 = vmatmul.mubr.msk.f32.gmra.mrb[16].mxu0 %vm451_vm1, %v450_v20  ;;  %4266 = vmatmul.mubr.msk.f32.gmra.mrb[16].mxu1 %vm451_vm1, %v2430_v19  ;;  %vm1375_vm1 = vcmask 1041409  }
 0x129   :  { %v4200_v26 = vpop.f32.mrb[0].mxu0 }
 0x12a   :  { %v696_v27 = vcombine.high %v4200_v26, %v4200_v26  ;;  %v703_v28 = vrot.slane %v4200_v26, %v4961_v25  ;;  %v182_v29 = vpop.f32.mrb[1].mxu0 }
 0x12b   :  { %v647_v30 = vcombine.high %v182_v29, %v182_v29  ;;  %v654_v31 = vrot.slane %v182_v29, %v4961_v25 }
 0x12c   :  { %v710_v11 = vrot.slane %v696_v27, %v4961_v25  ;;  %v711_v32 = vcombine.high %v703_v28, %v703_v28  ;;  %v719_v34 = vrot.slane %v703_v28, %v4961_v25 }
 0x12d   :  { %v661_v35 = vrot.slane %v647_v30, %v4961_v25  ;;  %v662_v37 = vcombine.high %v654_v31, %v654_v31  ;;  %v4969_v38 = vrot.slane %v654_v31, %v4961_v25  ;;  %v4211_v56 = vpop.f32.mrb[0].mxu1 }
 0x12e   :  { %v712_v40 = vcombine.high %v710_v11, %v710_v11  ;;  %v4972_v41 = vrot.slane %v710_v11, %v4961_v25  ;;  %v733_v43 = vrot.slane %v711_v32, %v4961_v25  ;;  %v741_v44 = vcombine.high %v719_v34, %v719_v34  ;;  %v4989_v61 = vpop.f32.mrb[1].mxu1  ;;  %v2279_v11 = vld [vmem:[#allocation7 + $0x50] sm:$0xff]  ;;  %v300_v32 = vld [vmem:[#allocation5 + $0x58] sm:$0xff] }
 0x12f   :  { %v4976_v46 = vrot.slane %v661_v35, %v4961_v25  ;;  %v4979_v47 = vrot.slane %v662_v37, %v4961_v25  ;;  %v780_v51 = vrot.slane %v719_v34, %v4731_v2  ;;  %v748_v52 = vrot.slane %v4969_v38, %v4731_v2 }
 0x130   :  { %v788_v53 = vrot.slane %v741_v44, %v4731_v2  ;;  %v784_v54 = vrot.slane %v733_v43, %v4731_v2  ;;  %v4987_v55 = vrot.slane %v712_v40, %v4961_v25  ;;  %v796_v6 = vrot.slane %v4972_v41, %v4731_v2 }
 0x131   :  { %v2632_v57 = vmul.f32 %v2277_v45, %v780_v51  ;;  %v833_v58 = vmul.f32 %v780_v51, %v297_v48  ;;  %v2624_v59 = vmul.f32 %v2269_v49, %v748_v52  ;;  %v825_v60 = vmul.f32 %v748_v52, %v289_v50  ;;  %v2281_v45 = vld [vmem:[#allocation7 + $0x60] sm:$0xff]  ;;  %v302_v48 = vld [vmem:[#allocation5 + $0x68] sm:$0xff]  ;;  %v291_v51 = vld [vmem:[#allocation5 + $0x10] sm:$0xff] }
 0x132   :  { %v752_v7 = vrot.slane %v4979_v47, %v4731_v2  ;;  %v835_v12 = vmul.f32 %v788_v53, %v299_v62  ;;  %v834_v13 = vmul.f32 %v784_v54, %v298_v63  ;;  %v663_v0 = vcombine.high %v661_v35, %v661_v35  ;;  %v2280_v52 = vld [vmem:[#allocation7 + $0x58] sm:$0xff] }
 0x133   :  { %v2664_v4 = vsel %vm109_vm0, %v2632_v57, 0.0  ;;  %v865_v5 = vsel %vm109_vm0, %v833_v58, 0.0  ;;  %v2640_v9 = vsel %vm109_vm0, %v2624_v59, 0.0  ;;  %v841_v10 = vsel %vm109_vm0, %v825_v60, 0.0 }
 0x134   :  { %2665 = vadd.xlane.f32.xlu0 %v2664_v4  ;;  %866 = vadd.xlane.f32.xlu1 %v865_v5  ;;  %v743_v16 = vcombine.high %v733_v43, %v733_v43  ;;  %v871_v18 = vsel %vm109_vm0, %v835_v12, 0.0  ;;  %v868_v19 = vsel %vm109_vm0, %v834_v13, 0.0  ;;  %v837_v20 = vmul.f32 %v796_v6, %v301_v14 }
 0x135   :  { %v826_v21 = vmul.f32 %v752_v7, %v290_v15  ;;  %v5003_v27 = vrot.slane %v663_v0, %v4961_v25  ;;  %v2633_v30 = vmul.f32 %v2278_v22, %v784_v54  ;;  %v2625_v31 = vmul.f32 %v2270_v24, %v752_v7 }
 0x136   :  { %v792_v26 = vrot.slane %v743_v16, %v4731_v2  ;;  %v877_v28 = vsel %vm109_vm0, %v837_v20, 0.0  ;;  %v692_v34 = vcombine.high %v4969_v38, %v4969_v38  ;;  %v2634_v35 = vmul.f32 %v2279_v11, %v788_v53 }
 0x137   :  { %v844_v29 = vsel %vm109_vm0, %v826_v21, 0.0  ;;  %v800_v40 = vrot.slane %v4987_v55, %v4731_v2  ;;  %v2667_v43 = vsel %vm109_vm0, %v2633_v30, 0.0  ;;  %v2643_v44 = vsel %vm109_vm0, %v2625_v31, 0.0  ;;  %v2271_v30 = vld [vmem:[#allocation7 + $0x10] sm:$0xff]  ;;  %v292_v31 = vld [vmem:[#allocation5 + $0x18] sm:$0xff] }
 0x138   :  { %2641 = vadd.xlane.f32.xlu1 %v2640_v9  ;;  %842 = vadd.xlane.f32.xlu0 %v841_v10  ;;  %v836_v37 = vmul.f32 %v792_v26, %v300_v32  ;;  %v940_v49 = vcombine.high %v4211_v56, %v4211_v56  ;;  %v756_v50 = vrot.slane %v692_v34, %v4731_v2  ;;  %v2670_v38 = vsel %vm109_vm0, %v2634_v35, 0.0 }
 0x139   :  { %v2636_v54 = vmul.f32 %v2281_v45, %v796_v6  ;;  %v838_v57 = vmul.f32 %v800_v40, %v302_v48  ;;  %v947_v58 = vrot.slane %v4211_v56, %v4961_v25  ;;  %v891_v60 = vcombine.high %v4989_v61, %v4989_v61  ;;  %v294_v45 = vld [vmem:[#allocation5 + $0x28] sm:$0xff] }
 0x13a   :  { %v874_v53 = vsel %vm109_vm0, %v836_v37, 0.0  ;;  %v954_v59 = vrot.slane %v940_v49, %v4961_v25  ;;  %v898_v62 = vrot.slane %v4989_v61, %v4961_v25  ;;  %v827_v63 = vmul.f32 %v756_v50, %v291_v51 }
 0x13b   :  { %v2635_v4 = vmul.f32 %v2280_v52, %v792_v26  ;;  %v764_v5 = vrot.slane %v4976_v46, %v4731_v2  ;;  %v694_v7 = vcombine.high %v4979_v47, %v4979_v47  ;;  %v955_v6 = vcombine.high %v947_v58, %v947_v58  ;;  %v2282_v47 = vld [vmem:[#allocation7 + $0x68] sm:$0xff]  ;;  %v303_v52 = vld [vmem:[#allocation5 + $0x70] sm:$0xff] }
 0x13c   :  { %872 = vadd.xlane.f32.xlu1 %v871_v18  ;;  %869 = vadd.xlane.f32.xlu0 %v868_v19  ;;  %v5027_v9 = vrot.slane %v947_v58, %v4961_v25  ;;  %v905_v56 = vrot.slane %v891_v60, %v4961_v25  ;;  %v2676_v10 = vsel %vm109_vm0, %v2636_v54, 0.0  ;;  %v906_v12 = vcombine.high %v898_v62, %v898_v62  ;;  %v293_v18 = vld [vmem:[#allocation5 + $0x20] sm:$0xff]  ;;  %v2283_v58 = vld [vmem:[#allocation7 + $0x70] sm:$0xff] }
 0x13d   :  { %v5032_v61 = vrot.slane %v898_v62, %v4961_v25  ;;  %v5035_v13 = vrot.slane %v954_v59, %v4961_v25  ;;  %v880_v14 = vsel %vm109_vm0, %v838_v57, 0.0  ;;  %v5042_v16 = vrot.slane %v955_v6, %v4961_v25 }
 0x13e   :  { %v907_v15 = vcombine.high %v905_v56, %v905_v56  ;;  %v5039_v0 = vrot.slane %v905_v56, %v4961_v25  ;;  %v956_v19 = vcombine.high %v954_v59, %v954_v59  ;;  %v5045_v20 = vrot.slane %v906_v12, %v4961_v25  ;;  %v2274_v59 = vld [vmem:[#allocation7 + $0x28] sm:$0xff]  ;;  %v304_v12 = vld [vmem:[#allocation5 + $0x78] sm:$0xff] }
 0x13f   :  { %v2637_v22 = vmul.f32 %v2282_v47, %v800_v40  ;;  %v847_v24 = vsel %vm109_vm0, %v827_v63, 0.0  ;;  %v2673_v26 = vsel %vm109_vm0, %v2635_v4, 0.0  ;;  %v2626_v34 = vmul.f32 %v2271_v30, %v756_v50  ;;  %v2273_v40 = vld [vmem:[#allocation7 + $0x20] sm:$0xff]  ;;  %v2276_v30 = vld [vmem:[#allocation7 + $0x38] sm:$0xff] }
 0x140   :  { %878 = vadd.xlane.f32.xlu1 %v877_v28  ;;  %845 = vadd.xlane.f32.xlu0 %v844_v29  ;;  %v5048_v21 = vrot.slane %v907_v15, %v4961_v25  ;;  %v829_v28 = vmul.f32 %v764_v5, %v293_v18  ;;  %v760_v29 = vrot.slane %v694_v7, %v4731_v2 }
 0x141   :  { %v5054_v11 = vrot.slane %v956_v19, %v4961_v25  ;;  %v2679_v32 = vsel %vm109_vm0, %v2637_v22, 0.0  ;;  %v2628_v25 = vmul.f32 %v2273_v40, %v764_v5  ;;  %v2646_v49 = vsel %vm109_vm0, %v2626_v34, 0.0  ;;  %v2275_v19 = vld [vmem:[#allocation7 + $0x30] sm:$0xff]  ;;  %v296_v22 = vld [vmem:[#allocation5 + $0x38] sm:$0xff] }
 0x142   :  { %v853_v35 = vsel %vm109_vm0, %v829_v28, 0.0  ;;  %v828_v37 = vmul.f32 %v760_v29, %v292_v31  ;;  %v693_v60 = vcombine.high %v4976_v46, %v4976_v46  ;;  %v744_v62 = vcombine.high %v4987_v55, %v4987_v55  ;;  %v295_v46 = vld [vmem:[#allocation5 + $0x30] sm:$0xff] }
 0x144   :  { %2668 = vadd.xlane.f32.xlu1 %v2667_v43  ;;  %2644 = vadd.xlane.f32.xlu0 %v2643_v44  ;;  %v768_v43 = vrot.slane %v5003_v27, %v4731_v2  ;;  %v742_v44 = vcombine.high %v4972_v41, %v4972_v41  ;;  %v850_v48 = vsel %vm109_vm0, %v828_v37, 0.0  ;;  %v772_v6 = vrot.slane %v693_v60, %v4731_v2 }
 0x145   :  { %v808_v56 = vrot.slane %v744_v62, %v4731_v2 }
 0x146   :  { %v830_v51 = vmul.f32 %v768_v43, %v294_v45  ;;  %v804_v50 = vrot.slane %v742_v44, %v4731_v2  ;;  %v2629_v7 = vmul.f32 %v2274_v59, %v768_v43  ;;  %v831_v47 = vmul.f32 %v772_v6, %v295_v46 }
 0x147   :  { %v840_v15 = vmul.f32 %v808_v56, %v304_v12  ;;  %v996_v43 = vrot.slane %v5045_v20, %v4731_v2  ;;  %v992_v44 = vrot.slane %v5032_v61, %v4731_v2  ;;  %v1012_v12 = vrot.slane %v5048_v21, %v4731_v2 }
 0x148   :  { %2671 = vadd.xlane.f32.xlu1 %v2670_v38  ;;  %875 = vadd.xlane.f32.xlu0 %v874_v53  ;;  %v2272_v38 = vld [vmem:[#allocation7 + $0x18] sm:$0xff]  ;;  %v2652_v53 = vsel %vm109_vm0, %v2628_v25, 0.0  ;;  %v856_v54 = vsel %vm109_vm0, %v830_v51, 0.0  ;;  %v839_v41 = vmul.f32 %v804_v50, %v303_v52  ;;  %v2638_v5 = vmul.f32 %v2283_v58, %v804_v50 }
 0x149   :  { %v2627_v57 = vmul.f32 %v2272_v38, %v760_v29  ;;  %v2284_v29 = vld [vmem:[#allocation7 + $0x78] sm:$0xff]  ;;  %v936_v58 = vcombine.high %v5032_v61, %v5032_v61 }
 0x14a   :  { %v883_v63 = vsel %vm109_vm0, %v839_v41, 0.0  ;;  %v2682_v55 = vsel %vm109_vm0, %v2638_v5, 0.0  ;;  %v2639_v34 = vmul.f32 %v2284_v29, %v808_v56  ;;  %v938_v41 = vcombine.high %v5045_v20, %v5045_v20 }
 0x14b   :  { %v2649_v4 = vsel %vm109_vm0, %v2627_v57, 0.0  ;;  %v939_v29 = vcombine.high %v5048_v21, %v5048_v21 }
 0x14c   :  { %2677 = vadd.xlane.f32.xlu1 %v2676_v10  ;;  %881 = vadd.xlane.f32.xlu0 %v880_v14  ;;  %v695_v10 = vcombine.high %v5003_v27, %v5003_v27  ;;  %v2655_v14 = vsel %vm109_vm0, %v2629_v7, 0.0  ;;  %v886_v27 = vsel %vm109_vm0, %v840_v15, 0.0  ;;  %v2685_v37 = vsel %vm109_vm0, %v2639_v34, 0.0 }
 0x14d   :  { %v1004_v60 = vrot.slane %v938_v41, %v4731_v2  ;;  %v1008_v15 = vrot.slane %v5039_v0, %v4731_v2  ;;  %v1020_v34 = vrot.slane %v939_v29, %v4731_v2  ;;  %v1028_v41 = vrot.slane %v5042_v16, %v4731_v2 }
 0x14e   :  { %v776_v18 = vrot.slane %v695_v10, %v4731_v2 }
 0x150   :  { %848 = vadd.xlane.f32.xlu1 %v847_v24  ;;  %2674 = vadd.xlane.f32.xlu0 %v2673_v26  ;;  %v859_v24 = vsel %vm109_vm0, %v831_v47, 0.0  ;;  %v2630_v26 = vmul.f32 %v2275_v19, %v772_v6  ;;  %v832_v28 = vmul.f32 %v776_v18, %v296_v22 }
 0x152   :  { %v2658_v31 = vsel %vm109_vm0, %v2630_v26, 0.0 }
 0x154   :  { %2680 = vadd.xlane.f32.xlu0 %v2679_v32  ;;  %854 = vadd.xlane.f32.xlu1 %v853_v35  ;;  %v862_v32 = vsel %vm109_vm0, %v832_v28, 0.0  ;;  %v2631_v35 = vmul.f32 %v2276_v30, %v776_v18  ;;  %v4576_v30 = vmov 0  }
 0x155   :  { %4342 = vset.pattern.permute.xlu0 %v4576_v30  ;;  %4343 = vset.pattern.permute.xlu1 %v4576_v30  ;;  %v5198_v30 = vpop.xlane.xlu0 %280 }
 0x156   :  { %v2661_v40 = vsel %vm109_vm0, %v2631_v35, 0.0 }
 0x158   :  { %851 = vadd.xlane.f32.xlu0 %v850_v48  ;;  %2647 = vadd.xlane.f32.xlu1 %v2646_v49 }
 0x15c   :  { %2653 = vadd.xlane.f32.xlu1 %v2652_v53  ;;  %857 = vadd.xlane.f32.xlu0 %v856_v54 }
 0x160   :  { %884 = vadd.xlane.f32.xlu1 %v883_v63  ;;  %2650 = vadd.xlane.f32.xlu0 %v2649_v4  ;;  %v1000_v4 = vrot.slane %v936_v58, %v4731_v2 }
 0x164   :  { %2683 = vadd.xlane.f32.xlu1 %v2682_v55  ;;  %2656 = vadd.xlane.f32.xlu0 %v2655_v14 }
 0x168   :  { %860 = vadd.xlane.f32.xlu1 %v859_v24  ;;  %887 = vadd.xlane.f32.xlu0 %v886_v27 }
 0x16c   :  { %2659 = vadd.xlane.f32.xlu1 %v2658_v31  ;;  %863 = vadd.xlane.f32.xlu0 %v862_v32  ;;  %v937_v32 = vcombine.high %v5039_v0, %v5039_v0 }
 0x16e   :  { %v1016_v21 = vrot.slane %v937_v32, %v4731_v2 }
 0x170   :  { %2686 = vadd.xlane.f32.xlu1 %v2685_v37  ;;  %2662 = vadd.xlane.f32.xlu0 %v2661_v40 }
 0x19a   :  { %v5090_v45 = vpop.f32.mrb[2].mxu0 }
 0x19b   :  { %6383 = vst [vmem:[#allocation15_spill] sm:$0xff] %v5090_v45  ;;  %v1070_v25 = vmul.f32 %v5090_v45, %v996_v43  ;;  %v5093_v48 = vpop.f32.mrb[3].mxu0 }
 0x19c   :  { %6384 = vst [vmem:[#allocation16_spill] sm:$0xff] %v5093_v48  ;;  %v1069_v49 = vmul.f32 %v992_v44, %v5093_v48 }
 0x19d   :  { %v1088_v51 = vsel %vm109_vm0, %v1070_v25, 0.0 }
 0x19e   :  { %v5097_v50 = vpop.f32.mrb[2].mxu1  ;;  %1089 = vadd.xlane.f32.xlu0 %v1088_v51  ;;  %v1085_v52 = vsel %vm109_vm0, %v1069_v49, 0.0 }
 0x19f   :  { %6385 = vst [vmem:[#allocation17_spill] sm:$0xff] %v5097_v50  ;;  %v2689_v38 = vmul.f32 %v5097_v50, %v996_v43  ;;  %v5101_v53 = vpop.f32.mrb[3].mxu1  ;;  %1086 = vadd.xlane.f32.xlu1 %v1085_v52 }
 0x1a0   :  { %6386 = vst [vmem:[#allocation18_spill] sm:$0xff] %v5101_v53  ;;  %v2688_v54 = vmul.f32 %v5101_v53, %v992_v44 }
 0x1a1   :  { %v2707_v57 = vsel %vm109_vm0, %v2689_v38, 0.0 }
 0x1a2   :  { %2708 = vadd.xlane.f32.xlu0 %v2707_v57  ;;  %v2704_v59 = vsel %vm109_vm0, %v2688_v54, 0.0 }
 0x1a3   :  { %2705 = vadd.xlane.f32.xlu1 %v2704_v59 }
 0x1a5   :  { %v5111_v62 = vpop.f32.mrb[4].mxu0  ;;  %v5113_v63 = vpop.f32.mrb[4].mxu1 }
 0x1a6   :  { %6387 = vst [vmem:[#allocation19_spill] sm:$0xff] %v5111_v62  ;;  %6388 = vst [vmem:[#allocation20_spill] sm:$0xff] %v5113_v63  ;;  %v1072_v5 = vmul.f32 %v5111_v62, %v1004_v60  ;;  %v2691_v20 = vmul.f32 %v5113_v63, %v1004_v60  ;;  %v5118_v7 = vpop.f32.mrb[5].mxu0  ;;  %v5120_v6 = vpop.f32.mrb[5].mxu1  ;;  %v1024_v60 = vrot.slane %v5027_v9, %v4731_v2 }
 0x1a7   :  { %6389 = vst [vmem:[#allocation21_spill] sm:$0xff] %v5118_v7  ;;  %6390 = vst [vmem:[#allocation22_spill] sm:$0xff] %v5120_v6  ;;  %v1071_v61 = vmul.f32 %v1000_v4, %v5118_v7  ;;  %v2690_v56 = vmul.f32 %v5120_v6, %v1000_v4 }
 0x1a8   :  { %v1094_v10 = vsel %vm109_vm0, %v1072_v5, 0.0  ;;  %v2713_v55 = vsel %vm109_vm0, %v2691_v20, 0.0 }
 0x1a9   :  { %1095 = vadd.xlane.f32.xlu0 %v1094_v10  ;;  %v1091_v46 = vsel %vm109_vm0, %v1071_v61, 0.0  ;;  %v2710_v28 = vsel %vm109_vm0, %v2690_v56, 0.0 }
 0x1aa   :  { %1092 = vadd.xlane.f32.xlu1 %v1091_v46 }
 0x1ad   :  { %v5129_v14 = vpop.f32.mrb[6].mxu1  ;;  %2714 = vadd.xlane.f32.xlu0 %v2713_v55  ;;  %v5131_v47 = vpop.f32.mrb[6].mxu0  ;;  %v987_v55 = vcombine.high %v5042_v16, %v5042_v16 }
 0x1ae   :  { %6391 = vst [vmem:[#allocation23_spill] sm:$0xff] %v5129_v14  ;;  %6392 = vst [vmem:[#allocation24_spill] sm:$0xff] %v5131_v47  ;;  %v2693_v18 = vmul.f32 %v5129_v14, %v1012_v12  ;;  %v1074_v19 = vmul.f32 %v5131_v47, %v1012_v12  ;;  %v5137_v22 = vpop.f32.mrb[7].mxu0  ;;  %v5139_v24 = vpop.f32.mrb[7].mxu1 }
 0x1af   :  { %6393 = vst [vmem:[#allocation25_spill] sm:$0xff] %v5137_v22  ;;  %6394 = vst [vmem:[#allocation26_spill] sm:$0xff] %v5139_v24  ;;  %v1073_v27 = vmul.f32 %v1008_v15, %v5137_v22  ;;  %v2692_v26 = vmul.f32 %v5139_v24, %v1008_v15  ;;  %v1154_v24 = vrot.slane %v5198_v30, %v4731_v2 }
 0x1b0   :  { %v1100_v35 = vsel %vm109_vm0, %v1074_v19, 0.0  ;;  %v2719_v38 = vsel %vm109_vm0, %v2693_v18, 0.0  ;;  %v985_v18 = vcombine.high %v5027_v9, %v5027_v9  ;;  %v1036_v19 = vrot.slane %v987_v55, %v4731_v2 }
 0x1b1   :  { %2711 = vadd.xlane.f32.xlu0 %v2710_v28  ;;  %v1097_v31 = vsel %vm109_vm0, %v1073_v27, 0.0  ;;  %v2716_v43 = vsel %vm109_vm0, %v2692_v26, 0.0 }
 0x1b2   :  { %1098 = vadd.xlane.f32.xlu1 %v1097_v31  ;;  %v1032_v32 = vrot.slane %v985_v18, %v4731_v2  ;;  %v988_v18 = vcombine.high %v5054_v11, %v5054_v11 }
 0x1b5   :  { %v5151_v37 = vpop.f32.mrb[8].mxu1  ;;  %1101 = vadd.xlane.f32.xlu0 %v1100_v35  ;;  %v5153_v40 = vpop.f32.mrb[8].mxu0 }
 0x1b6   :  { %6395 = vst [vmem:[#allocation27_spill] sm:$0xff] %v5151_v37  ;;  %6396 = vst [vmem:[#allocation28_spill] sm:$0xff] %v5153_v40  ;;  %v2695_v44 = vmul.f32 %v5151_v37, %v1020_v34  ;;  %v1076_v25 = vmul.f32 %v5153_v40, %v1020_v34  ;;  %v5159_v49 = vpop.f32.mrb[9].mxu1  ;;  %2717 = vadd.xlane.f32.xlu1 %v2716_v43  ;;  %v5161_v0 = vpop.f32.mrb[9].mxu0 }
 0x1b7   :  { %6397 = vst [vmem:[#allocation29_spill] sm:$0xff] %v5159_v49  ;;  %6398 = vst [vmem:[#allocation30_spill] sm:$0xff] %v5161_v0  ;;  %v2694_v51 = vmul.f32 %v5159_v49, %v1016_v21  ;;  %v1075_v52 = vmul.f32 %v1016_v21, %v5161_v0  ;;  %v5207_v35 = vpop.xlane.xlu1 %283 }
 0x1b8   :  { %v1106_v57 = vsel %vm109_vm0, %v1076_v25, 0.0  ;;  %v2725_v12 = vsel %vm109_vm0, %v2695_v44, 0.0 }
 0x1b9   :  { %2720 = vadd.xlane.f32.xlu0 %v2719_v38  ;;  %v1103_v54 = vsel %vm109_vm0, %v1075_v52, 0.0  ;;  %v2722_v4 = vsel %vm109_vm0, %v2694_v51, 0.0  ;;  %v1044_v52 = vrot.slane %v5054_v11, %v4731_v2 }
 0x1ba   :  { %1104 = vadd.xlane.f32.xlu1 %v1103_v54 }
 0x1bd   :  { %v5170_v58 = vpop.f32.mrb[10].mxu1  ;;  %1107 = vadd.xlane.f32.xlu0 %v1106_v57  ;;  %v5172_v59 = vpop.f32.mrb[10].mxu0 }
 0x1be   :  { %6399 = vst [vmem:[#allocation31_spill] sm:$0xff] %v5170_v58  ;;  %6400 = vst [vmem:[#allocation32_spill] sm:$0xff] %v5172_v59  ;;  %v2697_v5 = vmul.f32 %v5170_v58, %v1028_v41  ;;  %v1078_v20 = vmul.f32 %v5172_v59, %v1028_v41  ;;  %v5179_v61 = vpop.f32.mrb[11].mxu1  ;;  %2723 = vadd.xlane.f32.xlu1 %v2722_v4  ;;  %v5181_v56 = vpop.f32.mrb[11].mxu0 }
 0x1bf   :  { %6401 = vst [vmem:[#allocation33_spill] sm:$0xff] %v5179_v61  ;;  %6402 = vst [vmem:[#allocation34_spill] sm:$0xff] %v5181_v56  ;;  %v2696_v10 = vmul.f32 %v5179_v61, %v1024_v60  ;;  %v1077_v46 = vmul.f32 %v1024_v60, %v5181_v56  ;;  %v1158_v61 = vrot.slane %v5198_v30, %v4734_v3 }
 0x1c0   :  { %v1112_v27 = vsel %vm109_vm0, %v1078_v20, 0.0  ;;  %v2731_v44 = vsel %vm109_vm0, %v2697_v5, 0.0  ;;  %v1040_v5 = vrot.slane %v5035_v13, %v4731_v2 }
 0x1c1   :  { %2726 = vadd.xlane.f32.xlu0 %v2725_v12  ;;  %v1109_v15 = vsel %vm109_vm0, %v1077_v46, 0.0  ;;  %v2728_v29 = vsel %vm109_vm0, %v2696_v10, 0.0  ;;  %v5213_v51 = vpop.xlane.xlu0 %2665  ;;  %v5222_v57 = vpop.xlane.xlu1 %866 }
 0x1c2   :  { %1110 = vadd.xlane.f32.xlu1 %v1109_v15 }
 0x1c5   :  { %v5193_v26 = vpop.f32.mrb[12].mxu1  ;;  %1113 = vadd.xlane.f32.xlu0 %v1112_v27  ;;  %v5195_v28 = vpop.f32.mrb[12].mxu0  ;;  %v986_v27 = vcombine.high %v5035_v13, %v5035_v13 }
 0x1c6   :  { %6403 = vst [vmem:[#allocation35_spill] sm:$0xff] %v5193_v26  ;;  %6404 = vst [vmem:[#allocation36_spill] sm:$0xff] %v5195_v28  ;;  %v2699_v16 = vmul.f32 %v5193_v26, %v1036_v19  ;;  %v1080_v31 = vmul.f32 %v5195_v28, %v1036_v19  ;;  %2729 = vadd.xlane.f32.xlu1 %v2728_v29  ;;  %v5203_v9 = vpop.f32.mrb[13].mxu1  ;;  %v5205_v34 = vpop.f32.mrb[13].mxu0 }
 0x1c7   :  { %6405 = vst [vmem:[#allocation37_spill] sm:$0xff] %v5203_v9  ;;  %6406 = vst [vmem:[#allocation38_spill] sm:$0xff] %v5205_v34  ;;  %v2698_v21 = vmul.f32 %v5203_v9, %v1032_v32  ;;  %v1079_v43 = vmul.f32 %v1032_v32, %v5205_v34  ;;  %v5241_v29 = vpop.xlane.xlu0 %842  ;;  %v1052_v32 = vrot.slane %v988_v18, %v4731_v2 }
 0x1c8   :  { %v1118_v38 = vsel %vm109_vm0, %v1080_v31, 0.0  ;;  %v2737_v15 = vsel %vm109_vm0, %v2699_v16, 0.0  ;;  %v5243_v31 = vpop.xlane.xlu1 %2641  ;;  %v1048_v13 = vrot.slane %v986_v27, %v4731_v2 }
 0x1c9   :  { %2732 = vadd.xlane.f32.xlu0 %v2731_v44  ;;  %v1115_v25 = vsel %vm109_vm0, %v1079_v43, 0.0  ;;  %v2734_v20 = vsel %vm109_vm0, %v2698_v21, 0.0 }
 0x1ca   :  { %1116 = vadd.xlane.f32.xlu1 %v1115_v25 }
 0x1cc   :  { %v5265_v18 = vpop.xlane.xlu1 %872 }
 0x1cd   :  { %v5218_v54 = vpop.f32.mrb[14].mxu1  ;;  %1119 = vadd.xlane.f32.xlu0 %v1118_v38  ;;  %v5220_v41 = vpop.f32.mrb[14].mxu0 }
 0x1ce   :  { %6407 = vst [vmem:[#allocation39_spill] sm:$0xff] %v5218_v54  ;;  %6408 = vst [vmem:[#allocation40_spill] sm:$0xff] %v5220_v41  ;;  %v2701_v60 = vmul.f32 %v5218_v54, %v1044_v52  ;;  %v1082_v4 = vmul.f32 %v5220_v41, %v1044_v52  ;;  %v5229_v10 = vpop.f32.mrb[15].mxu1  ;;  %2735 = vadd.xlane.f32.xlu1 %v2734_v20  ;;  %v5231_v46 = vpop.f32.mrb[15].mxu0 }
 0x1cf   :  { %6409 = vst [vmem:[#allocation41_spill] sm:$0xff] %v5229_v10  ;;  %6410 = vst [vmem:[#allocation42_spill] sm:$0xff] %v5231_v46  ;;  %v2700_v12 = vmul.f32 %v5229_v10, %v1040_v5  ;;  %v1081_v55 = vmul.f32 %v1040_v5, %v5231_v46 }
 0x1d0   :  { %v1124_v21 = vsel %vm109_vm0, %v1082_v4, 0.0  ;;  %v2743_v20 = vsel %vm109_vm0, %v2701_v60, 0.0 }
 0x1d1   :  { %2738 = vadd.xlane.f32.xlu0 %v2737_v15  ;;  %v1121_v19 = vsel %vm109_vm0, %v1081_v55, 0.0  ;;  %v2740_v25 = vsel %vm109_vm0, %v2700_v12, 0.0  ;;  %v5262_v55 = vpop.xlane.xlu0 %869 }
 0x1d2   :  { %1122 = vadd.xlane.f32.xlu1 %v1121_v19 }
 0x1d5   :  { %v5247_v43 = vpop.f32.mrb[16].mxu1  ;;  %1125 = vadd.xlane.f32.xlu0 %v1124_v21  ;;  %v5249_v16 = vpop.f32.mrb[16].mxu0 }
 0x1d6   :  { %6411 = vst [vmem:[#allocation43_spill] sm:$0xff] %v5247_v43  ;;  %6412 = vst [vmem:[#allocation44_spill] sm:$0xff] %v5249_v16  ;;  %v2703_v11 = vmul.f32 %v5247_v43, %v1052_v32  ;;  %v1084_v44 = vmul.f32 %v5249_v16, %v1052_v32  ;;  %v5255_v52 = vpop.f32.mrb[17].mxu1  ;;  %2741 = vadd.xlane.f32.xlu1 %v2740_v25  ;;  %v5257_v38 = vpop.f32.mrb[17].mxu0 }
 0x1d7   :  { %6413 = vst [vmem:[#allocation45_spill] sm:$0xff] %v5255_v52  ;;  %6414 = vst [vmem:[#allocation46_spill] sm:$0xff] %v5257_v38  ;;  %v2702_v4 = vmul.f32 %v5255_v52, %v1048_v13  ;;  %v1083_v5 = vmul.f32 %v1048_v13, %v5257_v38  ;;  %v846_v27 = vpop.xlane.xlu0 %845  ;;  %v5270_v21 = vpop.xlane.xlu1 %878 }
 0x1d8   :  { %v1130_v12 = vsel %vm109_vm0, %v1084_v44, 0.0  ;;  %v2749_v32 = vsel %vm109_vm0, %v2703_v11, 0.0 }
 0x1d9   :  { %2744 = vadd.xlane.f32.xlu0 %v2743_v20  ;;  %v1127_v15 = vsel %vm109_vm0, %v1083_v5, 0.0  ;;  %v2746_v19 = vsel %vm109_vm0, %v2702_v4, 0.0 }
 0x1da   :  { %1128 = vadd.xlane.f32.xlu1 %v1127_v15 }
 0x1db   :  { %v2645_v60 = vpop.xlane.xlu0 %2644  ;;  %v5272_v13 = vpop.xlane.xlu1 %2668 }
 0x1dd   :  { %1131 = vadd.xlane.f32.xlu0 %v1130_v12 }
 0x1de   :  { %2747 = vadd.xlane.f32.xlu1 %v2746_v19 }
 0x1df   :  { %v5274_v25 = vpop.xlane.xlu0 %875  ;;  %v5276_v5 = vpop.xlane.xlu1 %2671 }
 0x1e1   :  { %2750 = vadd.xlane.f32.xlu0 %v2749_v32 }
 0x1e3   :  { %v5278_v20 = vpop.xlane.xlu0 %881  ;;  %v5280_v44 = vpop.xlane.xlu1 %2677 }
 0x1e7   :  { %v5282_v15 = vpop.xlane.xlu0 %2674  ;;  %v849_v4 = vpop.xlane.xlu1 %848 }
 0x1eb   :  { %v5284_v12 = vpop.xlane.xlu0 %2680  ;;  %v855_v11 = vpop.xlane.xlu1 %854 }
 0x1ef   :  { %v852_v19 = vpop.xlane.xlu0 %851  ;;  %v2648_v43 = vpop.xlane.xlu1 %2647 }
 0x1f3   :  { %v858_v32 = vpop.xlane.xlu0 %857  ;;  %v5286_v52 = vpop.xlane.xlu1 %2653 }
 0x1f7   :  { %v2651_v38 = vpop.xlane.xlu0 %2650  ;;  %v5288_v54 = vpop.xlane.xlu1 %884 }
 0x1fb   :  { %v2657_v41 = vpop.xlane.xlu0 %2656  ;;  %v5290_v10 = vpop.xlane.xlu1 %2683 }
 0x1ff   :  { %v5292_v46 = vpop.xlane.xlu0 %887  ;;  %v5294_v26 = vpop.xlane.xlu1 %860 }
 0x203   :  { %v864_v28 = vpop.xlane.xlu0 %863  ;;  %v5296_v16 = vpop.xlane.xlu1 %2659 }
 0x207   :  { %v5298_v9 = vpop.xlane.xlu0 %2662  ;;  %v5300_v37 = vpop.xlane.xlu1 %2686 }
 0x22b   :  { %v1090_v34 = vpop.xlane.xlu0 %1089 }
 0x22c   :  { %v1134_v58 = vadd.f32 %v1090_v34, %v846_v27  ;;  %v1087_v59 = vpop.xlane.xlu1 %1086 }
 0x22d   :  { %v1133_v0 = vadd.f32 %v1087_v59, %v5241_v29 }
 0x22e   :  { %v5304_v56 = vadd.f32 %v1158_v61, %v1134_v58 }
 0x22f   :  { %v2709_v40 = vpop.xlane.xlu0 %2708  ;;  %v5313_v22 = vadd.f32 %v1154_v24, %v1133_v0 }
 0x230   :  { %v2753_v49 = vadd.f32 %v2709_v40, %v2645_v60  ;;  %1267 = vperm.xlu0 %4342, %v5304_v56   ;;  %v2706_v47 = vpop.xlane.xlu1 %2705  ;;  %v1166_v40 = vrot.slane %v5198_v30, %v4787_v23 }
 0x231   :  { %v2752_v34 = vadd.f32 %v2706_v47, %v5243_v31  ;;  %v1162_v47 = vrot.slane %v5198_v30, %v4769_v17 }
 0x232   :  { %v5308_v14 = vadd.f32 %v2753_v49, %v1158_v61 }
 0x233   :  { %v5321_v59 = vadd.f32 %v2752_v34, %v1154_v24 }
 0x234   :  { %2804 = vperm.xlu1 %4343, %v5308_v14  }
 0x236   :  { %v1096_v58 = vpop.xlane.xlu0 %1095 }
 0x237   :  { %v1136_v27 = vadd.f32 %v1096_v58, %v852_v19  ;;  %v1093_v60 = vpop.xlane.xlu1 %1092 }
 0x238   :  { %1264 = vperm.xlu1 %4343, %v5313_v22   ;;  %v1135_v61 = vadd.f32 %v1093_v60, %v849_v4  ;;  %v1174_v4 = vrot.slane %v5198_v30, %v4810_v36 }
 0x239   :  { %v5319_v49 = vadd.f32 %v1166_v40, %v1136_v27 }
 0x23a   :  { %v2715_v29 = vpop.xlane.xlu0 %2714  ;;  %v5329_v31 = vadd.f32 %v1162_v47, %v1135_v61 }
 0x23b   :  { %v2755_v63 = vadd.f32 %v2715_v29, %v2651_v38  ;;  %1273 = vperm.xlu0 %4342, %v5319_v49  }
 0x23c   :  { %2801 = vperm.xlu1 %4343, %v5321_v59  }
 0x23d   :  { %v5327_v0 = vadd.f32 %v2755_v63, %v1166_v40 }
 0x23e   :  { %v2712_v19 = vpop.xlane.xlu0 %2711 }
 0x23f   :  { %v2754_v58 = vadd.f32 %v2712_v19, %v2648_v43  ;;  %v1099_v27 = vpop.xlane.xlu1 %1098  ;;  %2810 = vperm.xlu0 %4342, %v5327_v0  }
 0x240   :  { %1270 = vperm.xlu1 %4343, %v5329_v31   ;;  %v1137_v29 = vadd.f32 %v1099_v27, %v855_v11  ;;  %v1182_v27 = vrot.slane %v5198_v30, %v4826_v42 }
 0x241   :  { %v5333_v24 = vadd.f32 %v2754_v58, %v1162_v47  ;;  %v1170_v58 = vrot.slane %v5198_v30, %v4801_v33 }
 0x242   :  { %v1102_v38 = vpop.xlane.xlu0 %1101 }
 0x243   :  { %v1138_v34 = vadd.f32 %v1102_v38, %v858_v32  ;;  %v2718_v60 = vpop.xlane.xlu1 %2717  ;;  %v5346_v32 = vadd.f32 %v1170_v58, %v1137_v29 }
 0x244   :  { %2807 = vperm.xlu1 %4343, %v5333_v24   ;;  %v2756_v38 = vadd.f32 %v2718_v60, %v5286_v52 }
 0x245   :  { %v5338_v63 = vadd.f32 %v1174_v4, %v1138_v34 }
 0x246   :  { %v2721_v40 = vpop.xlane.xlu0 %2720 }
 0x247   :  { %v2757_v61 = vadd.f32 %v2721_v40, %v2657_v41  ;;  %1279 = vperm.xlu0 %4342, %v5338_v63   ;;  %v1105_v43 = vpop.xlane.xlu1 %1104  ;;  %v5350_v41 = vadd.f32 %v2756_v38, %v1170_v58 }
 0x249   :  { %v5341_v19 = vadd.f32 %v2757_v61, %v1174_v4  ;;  %v1190_v4 = vrot.slane %v5207_v35, %v4734_v3 }
 0x24a   :  { %v1108_v47 = vpop.xlane.xlu0 %1107 }
 0x24b   :  { %2816 = vperm.xlu0 %4342, %v5341_v19   ;;  %v2724_v34 = vpop.xlane.xlu1 %2723  ;;  %v1140_v40 = vadd.f32 %v1108_v47, %v864_v28  ;;  %v1139_v47 = vadd.f32 %v1105_v43, %v5294_v26 }
 0x24c   :  { %v2758_v26 = vadd.f32 %v2724_v34, %v5296_v16 }
 0x24d   :  { %v5358_v52 = vadd.f32 %v1182_v27, %v1140_v40 }
 0x24e   :  { %v2727_v62 = vpop.xlane.xlu0 %2726 }
 0x24f   :  { %1276 = vperm.xlu0 %4342, %v5346_v32   ;;  %v1111_v29 = vpop.xlane.xlu1 %1110  ;;  %v2759_v60 = vadd.f32 %v2727_v62, %v5298_v9  ;;  %v1178_v62 = vrot.slane %v5198_v30, %v4817_v39  ;;  %v1186_v9 = vrot.slane %v5207_v35, %v4731_v2 }
 0x251   :  { %v5367_v38 = vadd.f32 %v2759_v60, %v1182_v27  ;;  %v5386_v30 = vadd.f32 %v2758_v26, %v1178_v62  ;;  %v1198_v60 = vrot.slane %v5207_v35, %v4787_v23 }
 0x252   :  { %v1114_v11 = vpop.xlane.xlu0 %1113 }
 0x253   :  { %v1142_v61 = vadd.f32 %v1114_v11, %v5262_v55  ;;  %2813 = vperm.xlu0 %4342, %v5350_v41   ;;  %v1141_v55 = vadd.f32 %v1111_v29, %v5222_v57  ;;  %v2730_v40 = vpop.xlane.xlu1 %2729 }
 0x254   :  { %v2760_v57 = vadd.f32 %v2730_v40, %v5213_v51  ;;  %v1214_v40 = vrot.slane %v5207_v35, %v4826_v42 }
 0x255   :  { %v5361_v6 = vadd.f32 %v1190_v4, %v1142_v61  ;;  %v5381_v43 = vadd.f32 %v1186_v9, %v1141_v55  ;;  %v1194_v55 = vrot.slane %v5207_v35, %v4769_v17 }
 0x256   :  { %v2733_v58 = vpop.xlane.xlu0 %2732 }
 0x257   :  { %v2761_v28 = vadd.f32 %v2733_v58, %v5272_v13  ;;  %1285 = vperm.xlu0 %4342, %v5358_v52   ;;  %1291 = vperm.xlu1 %4343, %v5361_v6   ;;  %v5378_v13 = vadd.f32 %v1178_v62, %v1139_v47  ;;  %v1117_v51 = vpop.xlane.xlu1 %1116 }
 0x259   :  { %v5370_v11 = vadd.f32 %v2761_v28, %v1190_v4  ;;  %v5388_v4 = vadd.f32 %v2760_v57, %v1186_v9  ;;  %v1143_v28 = vadd.f32 %v1117_v51, %v5265_v18  ;;  %v5416_v18 = vld [vmem:[%s6324_s3] sm:$0xff] }
 0x25a   :  { %v1120_v7 = vpop.xlane.xlu0 %1119 }
 0x25b   :  { %2822 = vperm.xlu0 %4342, %v5367_v38   ;;  %2828 = vperm.xlu1 %4343, %v5370_v11   ;;  %v1144_v61 = vadd.f32 %v1120_v7, %v5274_v25  ;;  %v2736_v7 = vpop.xlane.xlu1 %2735 }
 0x25c   :  { %v2762_v9 = vadd.f32 %v2736_v7, %v5276_v5  ;;  %v1206_v5 = vrot.slane %v5207_v35, %v4810_v36 }
 0x25d   :  { %v5395_v16 = vadd.f32 %v1198_v60, %v1144_v61 }
 0x25e   :  { %v2739_v27 = vpop.xlane.xlu0 %2738 }
 0x25f   :  { %1282 = vperm.xlu0 %4342, %v5378_v13   ;;  %1288 = vperm.xlu1 %4343, %v5381_v43   ;;  %v2763_v34 = vadd.f32 %v2739_v27, %v5282_v15  ;;  %v5408_v15 = vadd.f32 %v1194_v55, %v1143_v28  ;;  %v1123_v57 = vpop.xlane.xlu1 %1122  ;;  %v5422_v27 = vadd.f32 %v2762_v9, %v1194_v55 }
 0x260   :  { %v1145_v7 = vadd.f32 %v1123_v57, %v5270_v21  ;;  %v1210_v21 = vrot.slane %v5207_v35, %v4817_v39 }
 0x261   :  { %v5400_v47 = vadd.f32 %v2763_v34, %v1198_v60  ;;  %v1806_v60 = vrot.slane %v5416_v18, %v4769_v17 }
 0x262   :  { %v1126_v29 = vpop.xlane.xlu0 %1125 }
 0x263   :  { %2819 = vperm.xlu0 %4342, %v5386_v30   ;;  %2825 = vperm.xlu1 %4343, %v5388_v4   ;;  %v1146_v61 = vadd.f32 %v1126_v29, %v5278_v20  ;;  %v2742_v28 = vpop.xlane.xlu1 %2741  ;;  %v1202_v29 = vrot.slane %v5207_v35, %v4801_v33  ;;  %v1792_v35 = vrot.slane %v5416_v18, %v4731_v2 }
 0x265   :  { %v5430_v51 = vadd.f32 %v1206_v5, %v1146_v61  ;;  %v5440_v55 = vadd.f32 %v1202_v29, %v1145_v7 }
 0x266   :  { %v2745_v58 = vpop.xlane.xlu0 %2744 }
 0x267   :  { %1297 = vperm.xlu1 %4343, %v5395_v16   ;;  %v2765_v34 = vadd.f32 %v2745_v58, %v5284_v12 }
 0x269   :  { %v5435_v20 = vadd.f32 %v2765_v34, %v1206_v5 }
 0x26a   :  { %v1132_v25 = vpop.xlane.xlu0 %1131 }
 0x26b   :  { %v1148_v62 = vadd.f32 %v1132_v25, %v5292_v46  ;;  %2834 = vperm.xlu1 %4343, %v5400_v47   ;;  %v1799_v46 = vrot.slane %v5416_v18, %v4734_v3  ;;  %v1129_v25 = vpop.xlane.xlu1 %1128 }
 0x26c   :  { %v1147_v58 = vadd.f32 %v1129_v25, %v5288_v54 }
 0x26d   :  { %v5411_v26 = vadd.f32 %v1214_v40, %v1148_v62  ;;  %v2764_v62 = vadd.f32 %v2742_v28, %v5280_v44 }
 0x26e   :  { %v2751_v61 = vpop.xlane.xlu0 %2750 }
 0x26f   :  { %1309 = vperm.xlu0 %4342, %v5411_v26   ;;  %1294 = vperm.xlu1 %4343, %v5408_v15   ;;  %v5444_v12 = vadd.f32 %v2764_v62, %v1202_v29  ;;  %v2748_v9 = vpop.xlane.xlu1 %2747  ;;  %v2767_v5 = vadd.f32 %v2751_v61, %v5300_v37 }
 0x270   :  { %v2766_v57 = vadd.f32 %v2748_v9, %v5290_v10  ;;  %v5466_v10 = vld [vmem:[%s6327_s6] sm:$0xff] }
 0x271   :  { %v5458_v54 = vadd.f32 %v2767_v5, %v1214_v40  ;;  %6418 = vst [vmem:[#allocation50_spill] sm:$0xff] %v5466_v10  ;;  %v3328_v37 = vrot.slane %v5466_v10, %v4734_v3  ;;  %v5475_v40 = vld [vmem:[%s6324_s3 + $0x8] sm:$0xff]  ;;  %v5481_v5 = vsub.s32 %v4862_v8, %v4728_v1 }
 0x272   :  { %v5454_v44 = vadd.f32 %v2766_v57, %v1210_v21  ;;  %v1848_v34 = vrot.slane %v5475_v40, %v4731_v2 }
 0x273   :  { %2831 = vperm.xlu1 %4343, %v5422_v27   ;;  %1801 = vbcast.lane.b32.xlu0 %v1799_v46, 256  ;;  %v5450_v46 = vadd.f32 %v1210_v21, %v1147_v58  ;;  %6417 = vst [vmem:[#allocation49_spill] sm:$0xff] %v5458_v54 }
 0x274   :  { %6416 = vst [vmem:[#allocation48_spill] sm:$0xff] %v5454_v44 }
 0x275   :  { %6415 = vst [vmem:[#allocation47_spill] sm:$0xff] %v5450_v46 }
 0x277   :  { %1303 = vperm.xlu1 %4343, %v5430_v51   ;;  %1808 = vbcast.lane.b32.xlu0 %v1806_v60, 256  ;;  %v3321_v60 = vrot.slane %v5466_v10, %v4731_v2 }
 0x27b   :  { %2840 = vperm.xlu1 %4343, %v5435_v20  }
 0x27f   :  { %1300 = vperm.xlu1 %4343, %v5440_v55  }
 0x283   :  { %2837 = vperm.xlu1 %4343, %v5444_v12  }
 0x287   :  { %1306 = vperm.xlu1 %4343, %v5450_v46  }
 0x28b   :  { %2843 = vperm.xlu1 %4343, %v5454_v44  }
 0x28f   :  { %2846 = vperm.xlu1 %4343, %v5458_v54  }
 0x293   :  { %1794 = vbcast.lane.b32.xlu1 %v1792_v35, 256 }
 0x297   :  { %3323 = vbcast.lane.b32.xlu1 %v3321_v60, 256 }
 0x29b   :  { %3330 = vbcast.lane.b32.xlu1 %v3328_v37, 256 }
 0x29f   :  { %1850 = vbcast.lane.b32.xlu1 %v1848_v34, 256 }
 0x2af   :  { %v1268_v28 = vpop.permute.xlu0 %1267 }
 0x2b0   :  { %v1318_v50 = vrot.slane %v1268_v28, %v5481_v5 }
 0x2b3   :  { %v2805_v7 = vpop.permute.xlu1 %2804 }
 0x2b7   :  { %v1265_v25 = vpop.permute.xlu1 %1264 }
 0x2b8   :  { %v1314_v37 = vrot.slane %v1265_v25, %v5481_v5  ;;  %v2855_v25 = vrot.slane %v2805_v7, %v5481_v5 }
 0x2ba   :  { %v1274_v29 = vpop.permute.xlu0 %1273  ;;  %v1376_v48 = vsel %vm1375_vm1, %v1318_v50, %v1314_v37 }
 0x2bb   :  { %v2802_v58 = vpop.permute.xlu1 %2801 }
 0x2bc   :  { %v2851_v54 = vrot.slane %v2802_v58, %v5481_v5 }
 0x2be   :  { %v2811_v62 = vpop.permute.xlu0 %2810  ;;  %v2912_v10 = vsel %vm1375_vm1, %v2855_v25, %v2851_v54 }
 0x2bf   :  { %v1271_v57 = vpop.permute.xlu1 %1270 }
 0x2c0   :  { %v1322_v34 = vrot.slane %v1271_v57, %v5481_v5  ;;  %v1326_v57 = vrot.slane %v1274_v29, %v5481_v5 }
 0x2c2   :  { %v1378_v44 = vsel %vm1377_vm6, %v1322_v34, %v1376_v48 }
 0x2c3   :  { %v2808_v35 = vpop.permute.xlu1 %2807  ;;  %v1380_v50 = vsel %vm1379_vm7, %v1326_v57, %v1378_v44 }
 0x2c4   :  { %v2859_v1 = vrot.slane %v2808_v35, %v5481_v5 }
 0x2c6   :  { %v1280_v9 = vpop.permute.xlu0 %1279  ;;  %v2913_v58 = vsel %vm1377_vm6, %v2859_v1, %v2912_v10 }
 0x2c7   :  { %v1334_v7 = vrot.slane %v1280_v9, %v5481_v5 }
 0x2ca   :  { %v2817_v21 = vpop.permute.xlu0 %2816 }
 0x2ce   :  { %v1277_v61 = vpop.permute.xlu0 %1276 }
 0x2cf   :  { %v1330_v8 = vrot.slane %v1277_v61, %v5481_v5  ;;  %v2863_v61 = vrot.slane %v2811_v62, %v5481_v5  ;;  %v2871_v62 = vrot.slane %v2817_v21, %v5481_v5 }
 0x2d1   :  { %v1382_v48 = vsel %vm1381_vm8, %v1330_v8, %v1380_v50  ;;  %v2914_v54 = vsel %vm1379_vm7, %v2863_v61, %v2913_v58 }
 0x2d2   :  { %v2814_v60 = vpop.permute.xlu0 %2813  ;;  %v1384_v10 = vsel %vm1383_vm9, %v1334_v7, %v1382_v48 }
 0x2d3   :  { %v2867_v35 = vrot.slane %v2814_v60, %v5481_v5 }
 0x2d5   :  { %v2915_v60 = vsel %vm1381_vm8, %v2867_v35, %v2914_v54 }
 0x2d6   :  { %v1286_v53 = vpop.permute.xlu0 %1285  ;;  %v1292_v45 = vpop.permute.xlu1 %1291 }
 0x2d7   :  { %v1342_v44 = vrot.slane %v1286_v53, %v5481_v5  ;;  %v2916_v53 = vsel %vm1383_vm9, %v2871_v62, %v2915_v60 }
 0x2da   :  { %v2823_v28 = vpop.permute.xlu0 %2822  ;;  %v2829_v46 = vpop.permute.xlu1 %2828 }
 0x2db   :  { %v2879_v58 = vrot.slane %v2823_v28, %v5481_v5 }
 0x2de   :  { %v1283_v37 = vpop.permute.xlu0 %1282  ;;  %v1289_v29 = vpop.permute.xlu1 %1288 }
 0x2df   :  { %v1338_v34 = vrot.slane %v1283_v37, %v5481_v5 }
 0x2e1   :  { %v1386_v1 = vsel %vm1385_vm10, %v1338_v34, %v1384_v10  ;;  %v1346_v10 = vrot.slane %v1289_v29, %v5481_v5 }
 0x2e2   :  { %v2820_v9 = vpop.permute.xlu0 %2819  ;;  %v2826_v8 = vpop.permute.xlu1 %2825  ;;  %v1388_v25 = vsel %vm1387_vm11, %v1342_v44, %v1386_v1  ;;  %v1350_v1 = vrot.slane %v1292_v45, %v5481_v5 }
 0x2e3   :  { %v2875_v57 = vrot.slane %v2820_v9, %v5481_v5  ;;  %v1399_v50 = vsel %vm1398_vm12, %v1388_v25, -inf }
 0x2e4   :  { %1400 = vmax.xlane.f32.xlu0 %v1399_v50  ;;  %v1389_v62 = vsel %vm1375_vm1, %v1350_v1, %v1346_v10 }
 0x2e5   :  { %v2917_v48 = vsel %vm1385_vm10, %v2875_v57, %v2916_v53 }
 0x2e6   :  { %v1298_v35 = vpop.permute.xlu1 %1297  ;;  %v2918_v61 = vsel %vm1387_vm11, %v2879_v58, %v2917_v48  ;;  %v2883_v58 = vrot.slane %v2826_v8, %v5481_v5  ;;  %v2887_v48 = vrot.slane %v2829_v46, %v5481_v5 }
 0x2e7   :  { %v2928_v21 = vsel %vm1398_vm12, %v2918_v61, -inf  ;;  %v1358_v57 = vrot.slane %v1298_v35, %v5481_v5 }
 0x2e8   :  { %2929 = vmax.xlane.f32.xlu1 %v2928_v21  ;;  %v2919_v10 = vsel %vm1375_vm1, %v2887_v48, %v2883_v58 }
 0x2ea   :  { %v2835_v7 = vpop.permute.xlu1 %2834 }
 0x2eb   :  { %v2895_v46 = vrot.slane %v2835_v7, %v5481_v5 }
 0x2ee   :  { %v1295_v37 = vpop.permute.xlu1 %1294  ;;  %v1310_v61 = vpop.permute.xlu0 %1309 }
 0x2ef   :  { %v1354_v28 = vrot.slane %v1295_v37, %v5481_v5  ;;  %v1374_v35 = vrot.slane %v1310_v61, %v5481_v5 }
 0x2f1   :  { %v1390_v9 = vsel %vm1377_vm6, %v1354_v28, %v1389_v62 }
 0x2f2   :  { %v2832_v34 = vpop.permute.xlu1 %2831  ;;  %v1391_v29 = vsel %vm1379_vm7, %v1358_v57, %v1390_v9 }
 0x2f3   :  { %v2891_v53 = vrot.slane %v2832_v34, %v5481_v5 }
 0x2f5   :  { %v2920_v8 = vsel %vm1377_vm6, %v2891_v53, %v2919_v10 }
 0x2f6   :  { %v1304_v54 = vpop.permute.xlu1 %1303  ;;  %v2921_v9 = vsel %vm1379_vm7, %v2895_v46, %v2920_v8 }
 0x2f7   :  { %v1366_v21 = vrot.slane %v1304_v54, %v5481_v5 }
 0x2fa   :  { %v2841_v44 = vpop.permute.xlu1 %2840 }
 0x2fe   :  { %v1301_v60 = vpop.permute.xlu1 %1300 }
 0x2ff   :  { %v1362_v25 = vrot.slane %v1301_v60, %v5481_v5 }
 0x301   :  { %v1392_v45 = vsel %vm1381_vm8, %v1362_v25, %v1391_v29 }
 0x302   :  { %v2838_v50 = vpop.permute.xlu1 %2837  ;;  %v1393_v1 = vsel %vm1383_vm9, %v1366_v21, %v1392_v45  ;;  %v1855_v21 = vrot.slane %v5475_v40, %v4734_v3 }
 0x303   :  { %v2899_v34 = vrot.slane %v2838_v50, %v5481_v5  ;;  %v2903_v50 = vrot.slane %v2841_v44, %v5481_v5  ;;  %v5553_v44 = vpop.permute.xlu0 %1801 }
 0x305   :  { %v2922_v57 = vsel %vm1381_vm8, %v2899_v34, %v2921_v9 }
 0x306   :  { %v1307_v37 = vpop.permute.xlu1 %1306  ;;  %v2923_v7 = vsel %vm1383_vm9, %v2903_v50, %v2922_v57 }
 0x307   :  { %v1370_v28 = vrot.slane %v1307_v37, %v5481_v5 }
 0x309   :  { %v1394_v60 = vsel %vm1385_vm10, %v1370_v28, %v1393_v1 }
 0x30a   :  { %v2844_v62 = vpop.permute.xlu1 %2843  ;;  %v1395_v54 = vsel %vm1387_vm11, %v1374_v35, %v1394_v60  ;;  %v5557_v35 = vpop.permute.xlu0 %1808 }
 0x30b   :  { %v1402_v25 = vsel %vm1398_vm12, %v1395_v54, -inf  ;;  %v2907_v58 = vrot.slane %v2844_v62, %v5481_v5 }
 0x30c   :  { %1403 = vmax.xlane.f32.xlu0 %v1402_v25 }
 0x30d   :  { %v2924_v48 = vsel %vm1385_vm10, %v2907_v58, %v2923_v7 }
 0x30e   :  { %v2847_v53 = vpop.permute.xlu1 %2846 }
 0x30f   :  { %v2911_v29 = vrot.slane %v2847_v53, %v5481_v5 }
 0x311   :  { %v2925_v61 = vsel %vm1387_vm11, %v2911_v29, %v2924_v48 }
 0x312   :  { %v2931_v45 = vsel %vm1398_vm12, %v2925_v61, -inf  ;;  %v5549_v37 = vpop.permute.xlu1 %1794 }
 0x313   :  { %2932 = vmax.xlane.f32.xlu0 %v2931_v45 }
 0x316   :  { %v5551_v10 = vpop.permute.xlu1 %3323 }
 0x31a   :  { %v5555_v28 = vpop.permute.xlu1 %3330 }
 0x31e   :  { %v5559_v8 = vpop.permute.xlu1 %1850 }
 0x329   :  { %1857 = vbcast.lane.b32.xlu0 %v1855_v21, 256 }
 0x371   :  { %v5561_v34 = vpop.xlane.xlu0 %1400 }
 0x372   :  { %v1410_v1 = vrot.slane %v5561_v34, %v4731_v2  ;;  %v1414_v46 = vrot.slane %v5561_v34, %v4734_v3  ;;  %v1418_v60 = vrot.slane %v5561_v34, %v4769_v17  ;;  %v1422_v9 = vrot.slane %v5561_v34, %v4787_v23 }
 0x373   :  { %v1426_v48 = vrot.slane %v5561_v34, %v4801_v33 }
 0x374   :  { %v1487_v62 = vsub.f32 %v5313_v22, %v1410_v1  ;;  %v1488_v54 = vsub.f32 %v5304_v56, %v1414_v46  ;;  %v1489_v25 = vsub.f32 %v5329_v31, %v1418_v60  ;;  %v1490_v22 = vsub.f32 %v5319_v49, %v1422_v9 }
 0x375   :  { %v5574_v57 = vpop.xlane.xlu1 %2929 }
 0x376   :  { %v1503_v58 = vmul.f32 1.442695, %v1487_v62  ;;  %v1505_v50 = vmul.f32 1.442695, %v1488_v54  ;;  %v2939_v53 = vrot.slane %v5574_v57, %v4731_v2  ;;  %v2943_v29 = vrot.slane %v5574_v57, %v4734_v3 }
 0x377   :  { %v1507_v56 = vmul.f32 1.442695, %v1489_v25  ;;  %v2951_v7 = vrot.slane %v5574_v57, %v4787_v23  ;;  %v2947_v61 = vrot.slane %v5574_v57, %v4769_v17  ;;  %v1509_v21 = vmul.f32 1.442695, %v1490_v22 }
 0x378   :  { %4344 = vpow2.f32 %v1503_v58  ;;  %v3016_v31 = vsub.f32 %v5321_v59, %v2939_v53  ;;  %v3017_v45 = vsub.f32 %v5308_v14, %v2943_v29  ;;  %v1491_v62 = vsub.f32 %v5346_v32, %v1426_v48 }
 0x379   :  { %4346 = vpow2.f32 %v1505_v50  ;;  %v3019_v1 = vsub.f32 %v5327_v0, %v2951_v7  ;;  %v3018_v46 = vsub.f32 %v5333_v24, %v2947_v61  ;;  %v2955_v59 = vrot.slane %v5574_v57, %v4801_v33 }
 0x37a   :  { %4348 = vpow2.f32 %v1507_v56  ;;  %v3032_v49 = vmul.f32 1.442695, %v3016_v31  ;;  %v3034_v60 = vmul.f32 1.442695, %v3017_v45  ;;  %v1430_v0 = vrot.slane %v5561_v34, %v4810_v36 }
 0x37b   :  { %v3038_v54 = vmul.f32 1.442695, %v3019_v1  ;;  %v3036_v14 = vmul.f32 1.442695, %v3018_v46  ;;  %v1511_v24 = vmul.f32 1.442695, %v1491_v62  ;;  %v3020_v32 = vsub.f32 %v5350_v41, %v2955_v59 }
 0x37c   :  { %4350 = vpow2.f32 %v3032_v49  ;;  %v1492_v50 = vsub.f32 %v5338_v63, %v1430_v0  ;;  %v2959_v53 = vrot.slane %v5574_v57, %v4810_v36  ;;  %v1434_v41 = vrot.slane %v5561_v34, %v4817_v39 }
 0x37d   :  { %4352 = vpow2.f32 %v1509_v21  ;;  %v3040_v29 = vmul.f32 1.442695, %v3020_v32  ;;  %v2963_v45 = vrot.slane %v5574_v57, %v4817_v39  ;;  %v2967_v59 = vrot.slane %v5574_v57, %v4826_v42 }
 0x37e   :  { %4354 = vpow2.f32 %v3034_v60  ;;  %v1513_v7 = vmul.f32 1.442695, %v1492_v50  ;;  %v3021_v31 = vsub.f32 %v5341_v19, %v2959_v53  ;;  %v1493_v61 = vsub.f32 %v5378_v13, %v1434_v41 }
 0x37f   :  { %4356 = vpow2.f32 %v3038_v54  ;;  %v1438_v19 = vrot.slane %v5561_v34, %v4826_v42  ;;  %v3022_v60 = vsub.f32 %v5386_v30, %v2963_v45  ;;  %v3023_v32 = vsub.f32 %v5367_v38, %v2967_v59 }
 0x380   :  { %4358 = vpow2.f32 %v3036_v14  ;;  %v3042_v21 = vmul.f32 1.442695, %v3021_v31  ;;  %v1515_v46 = vmul.f32 1.442695, %v1493_v61 }
 0x381   :  { %4360 = vpow2.f32 %v1511_v24  ;;  %v1494_v62 = vsub.f32 %v5358_v52, %v1438_v19  ;;  %v3044_v54 = vmul.f32 1.442695, %v3022_v60 }
 0x382   :  { %v5594_v9 = vpop.eup %4344  ;;  %4362 = vpow2.f32 %v3040_v29 }
 0x383   :  { %v5596_v25 = vpop.eup %4346  ;;  %1552 = vperm.xlu1 %4343, %v5594_v9   ;;  %4364 = vpow2.f32 %v1513_v7  ;;  %v1517_v52 = vmul.f32 1.442695, %v1494_v62 }
 0x384   :  { %1555 = vperm.xlu0 %4342, %v5596_v25   ;;  %v5603_v58 = vpop.eup %4348  ;;  %4366 = vpow2.f32 %v3042_v21 }
 0x385   :  { %4368 = vpow2.f32 %v1515_v46 }
 0x386   :  { %v5609_v22 = vpop.eup %4350  ;;  %4370 = vpow2.f32 %v3044_v54 }
 0x387   :  { %v5611_v56 = vpop.eup %4352  ;;  %3081 = vperm.xlu1 %4343, %v5609_v22  }
 0x388   :  { %1558 = vperm.xlu0 %4342, %v5603_v58   ;;  %v5618_v63 = vpop.eup %4354 }
 0x389   :  { %v5620_v48 = vpop.eup %4356 }
 0x38a   :  { %v5627_v1 = vpop.eup %4358 }
 0x38b   :  { %3084 = vperm.xlu1 %4343, %v5618_v63   ;;  %v5629_v49 = vpop.eup %4360 }
 0x38c   :  { %1561 = vperm.xlu0 %4342, %v5611_v56   ;;  %v5636_v13 = vpop.eup %4362 }
 0x38d   :  { %v5646_v0 = vpop.eup %4364 }
 0x38e   :  { %v5653_v50 = vpop.eup %4366 }
 0x38f   :  { %3087 = vperm.xlu1 %4343, %v5627_v1   ;;  %v5665_v31 = vpop.eup %4368 }
 0x390   :  { %3090 = vperm.xlu0 %4342, %v5620_v48   ;;  %v5675_v62 = vpop.eup %4370 }
 0x394   :  { %1564 = vperm.xlu0 %4342, %v5629_v49  }
 0x398   :  { %3093 = vperm.xlu0 %4342, %v5636_v13  }
 0x399   :  { %v5642_v14 = vpop.xlane.xlu0 %1403 }
 0x39a   :  { %v1442_v34 = vrot.slane %v5642_v14, %v4731_v2  ;;  %v1446_v30 = vrot.slane %v5642_v14, %v4734_v3  ;;  %v1450_v53 = vrot.slane %v5642_v14, %v4769_v17  ;;  %v1470_v61 = vrot.slane %v5642_v14, %v4826_v42 }
 0x39c   :  { %v1495_v24 = vsub.f32 %v5381_v43, %v1442_v34  ;;  %1567 = vperm.xlu0 %4342, %v5646_v0   ;;  %v1496_v29 = vsub.f32 %v5361_v6, %v1446_v30  ;;  %v3046_v43 = vmul.f32 1.442695, %v3023_v32  ;;  %v1497_v6 = vsub.f32 %v5408_v15, %v1450_v53 }
 0x39d   :  { %v1502_v59 = vsub.f32 %v5411_v26, %v1470_v61 }
 0x39e   :  { %v1519_v57 = vmul.f32 1.442695, %v1495_v24  ;;  %v1521_v45 = vmul.f32 1.442695, %v1496_v29  ;;  %v1523_v54 = vmul.f32 1.442695, %v1497_v6 }
 0x3a0   :  { %4372 = vpow2.f32 %v1519_v57  ;;  %3096 = vperm.xlu0 %4342, %v5653_v50   ;;  %v5659_v41 = vpop.xlane.xlu0 %2932  ;;  %v1458_v57 = vrot.slane %v5642_v14, %v4801_v33 }
 0x3a1   :  { %4374 = vpow2.f32 %v1517_v52  ;;  %v2971_v7 = vrot.slane %v5659_v41, %v4731_v2  ;;  %v2975_v38 = vrot.slane %v5659_v41, %v4734_v3  ;;  %v2979_v19 = vrot.slane %v5659_v41, %v4769_v17 }
 0x3a2   :  { %4376 = vpow2.f32 %v3046_v43  ;;  %v2983_v52 = vrot.slane %v5659_v41, %v4787_v23 }
 0x3a3   :  { %v3025_v21 = vsub.f32 %v5370_v11, %v2975_v38  ;;  %v3024_v46 = vsub.f32 %v5388_v4, %v2971_v7  ;;  %4378 = vpow2.f32 %v1521_v45  ;;  %v1454_v11 = vrot.slane %v5642_v14, %v4787_v23 }
 0x3a4   :  { %1570 = vperm.xlu0 %4342, %v5665_v31   ;;  %v3026_v15 = vsub.f32 %v5422_v27, %v2979_v19  ;;  %v1533_v4 = vmul.f32 1.442695, %v1502_v59  ;;  %v3027_v29 = vsub.f32 %v5400_v47, %v2983_v52  ;;  %v1499_v7 = vsub.f32 %v5440_v55, %v1458_v57  ;;  %v5718_v55 = vld [vmem:[%s6327_s6 + $0x8] sm:$0xff] }
 0x3a5   :  { %v3050_v60 = vmul.f32 1.442695, %v3025_v21  ;;  %v3048_v34 = vmul.f32 1.442695, %v3024_v46  ;;  %v1498_v26 = vsub.f32 %v5395_v16, %v1454_v11  ;;  %v2987_v38 = vrot.slane %v5659_v41, %v4801_v33 }
 0x3a6   :  { %v3052_v32 = vmul.f32 1.442695, %v3026_v15  ;;  %v3054_v61 = vmul.f32 1.442695, %v3027_v29  ;;  %v1462_v47 = vrot.slane %v5642_v14, %v4810_v36  ;;  %v1527_v21 = vmul.f32 1.442695, %v1499_v7 }
 0x3a7   :  { %4380 = vpow2.f32 %v3050_v60  ;;  %v1525_v53 = vmul.f32 1.442695, %v1498_v26  ;;  %v3028_v19 = vsub.f32 %v5444_v12, %v2987_v38  ;;  %v3377_v59 = vrot.slane %v5718_v55, %v4731_v2 }
 0x3a8   :  { %3099 = vperm.xlu0 %4342, %v5675_v62   ;;  %4382 = vpow2.f32 %v1523_v54  ;;  %v1500_v54 = vsub.f32 %v5430_v51, %v1462_v47  ;;  %v2991_v12 = vrot.slane %v5659_v41, %v4810_v36  ;;  %v2995_v7 = vrot.slane %v5659_v41, %v4817_v39 }
 0x3a9   :  { %4384 = vpow2.f32 %v3048_v34  ;;  %v3056_v11 = vmul.f32 1.442695, %v3028_v19  ;;  %v1813_v34 = vrot.slane %v5416_v18, %v4787_v23  ;;  %v2999_v47 = vrot.slane %v5659_v41, %v4826_v42 }
 0x3aa   :  { %v5682_v30 = vpop.eup %4372  ;;  %4386 = vpow2.f32 %v1533_v4  ;;  %v1466_v4 = vrot.slane %v5642_v14, %v4817_v39  ;;  %v1529_v26 = vmul.f32 1.442695, %v1500_v54  ;;  %v3029_v52 = vsub.f32 %v5435_v20, %v2991_v12  ;;  %v6427_v12 = vld [vmem:[#allocation49_spill] sm:$0xff] }
 0x3ab   :  { %v5684_v24 = vpop.eup %4374  ;;  %1576 = vperm.xlu1 %4343, %v5682_v30   ;;  %4388 = vpow2.f32 %v3052_v32  ;;  %v6422_v32 = vld [vmem:[#allocation50_spill] sm:$0xff]  ;;  %v1820_v20 = vrot.slane %v5416_v18, %v4801_v33  ;;  %v1827_v41 = vrot.slane %v5416_v18, %v4810_v36 }
 0x3ac   :  { %1573 = vperm.xlu0 %4342, %v5684_v24   ;;  %v5691_v27 = vpop.eup %4376  ;;  %4390 = vpow2.f32 %v1525_v53  ;;  %v3342_v57 = vrot.slane %v6422_v32, %v4787_v23  ;;  %v6423_v53 = vld [vmem:[#allocation47_spill] sm:$0xff]  ;;  %v3058_v38 = vmul.f32 1.442695, %v3029_v52  ;;  %v3349_v54 = vrot.slane %v6422_v32, %v4801_v33 }
 0x3ad   :  { %v5697_v43 = vpop.eup %4378  ;;  %4392 = vpow2.f32 %v3054_v61  ;;  %v1501_v29 = vsub.f32 %v6423_v53, %v1466_v4 }
 0x3ae   :  { %4394 = vpow2.f32 %v1527_v21  ;;  %v6425_v21 = vld [vmem:[#allocation48_spill] sm:$0xff] }
 0x3af   :  { %4396 = vpow2.f32 %v3056_v11  ;;  %v1531_v61 = vmul.f32 1.442695, %v1501_v29  ;;  %v3030_v19 = vsub.f32 %v6425_v21, %v2995_v7  ;;  %v3031_v11 = vsub.f32 %v6427_v12, %v2999_v47 }
 0x3b0   :  { %3102 = vperm.xlu0 %4342, %v5691_v27   ;;  %4398 = vpow2.f32 %v1529_v26  ;;  %v1834_v29 = vrot.slane %v5416_v18, %v4817_v39  ;;  %v1841_v47 = vrot.slane %v5416_v18, %v4826_v42  ;;  %v3384_v21 = vrot.slane %v5718_v55, %v4734_v3 }
 0x3b1   :  { %v5699_v16 = vpop.eup %4380  ;;  %4400 = vpow2.f32 %v3058_v38  ;;  %v3062_v26 = vmul.f32 1.442695, %v3031_v11  ;;  %v3363_v38 = vrot.slane %v6422_v32, %v4817_v39  ;;  %v3391_v12 = vrot.slane %v5718_v55, %v4769_v17 }
 0x3b2   :  { %3108 = vperm.xlu1 %4343, %v5699_v16   ;;  %v5706_v6 = vpop.eup %4382  ;;  %4402 = vpow2.f32 %v1531_v61  ;;  %v3335_v61 = vrot.slane %v6422_v32, %v4769_v17  ;;  %v1869_v18 = vrot.slane %v5475_v40, %v4787_v23  ;;  %v3398_v11 = vrot.slane %v5718_v55, %v4787_v23 }
 0x3b3   :  { %v5708_v45 = vpop.eup %4384 }
 0x3b4   :  { %1579 = vperm.xlu0 %4342, %v5697_v43   ;;  %v5720_v46 = vpop.eup %4386 }
 0x3b5   :  { %v5722_v60 = vpop.eup %4388 }
 0x3b6   :  { %1582 = vperm.xlu1 %4343, %v5706_v6   ;;  %6419 = vst [vmem:[#allocation51_spill] sm:$0xff] %v5722_v60  ;;  %v5731_v15 = vpop.eup %4390 }
 0x3b7   :  { %6420 = vst [vmem:[#allocation52_spill] sm:$0xff] %v5731_v15  ;;  %v5739_v51 = vpop.eup %4392 }
 0x3b8   :  { %3105 = vperm.xlu0 %4342, %v5708_v45   ;;  %6421 = vst [vmem:[#allocation53_spill] sm:$0xff] %v5739_v51  ;;  %v5747_v14 = vpop.eup %4394 }
 0x3b9   :  { %6424 = vst [vmem:[#allocation50_spill] sm:$0xff] %v5747_v14 }
 0x3ba   :  { %3111 = vperm.xlu1 %4343, %v5722_v60  }
 0x3bc   :  { %1597 = vperm.xlu0 %4342, %v5720_v46  }
 0x3be   :  { %1585 = vperm.xlu1 %4343, %v5731_v15  }
 0x3c0   :  { %3379 = vbcast.lane.b32.xlu0 %v3377_v59, 256  ;;  %v5755_v59 = vpop.eup %4396 }
 0x3c1   :  { %6426 = vst [vmem:[#allocation47_spill] sm:$0xff] %v5755_v59  ;;  %v5761_v4 = vpop.eup %4398 }
 0x3c2   :  { %3114 = vperm.xlu1 %4343, %v5739_v51   ;;  %6428 = vst [vmem:[#allocation48_spill] sm:$0xff] %v5761_v4  ;;  %v5766_v52 = vpop.eup %4400 }
 0x3c3   :  { %6429 = vst [vmem:[#allocation49_spill] sm:$0xff] %v5766_v52  ;;  %v5771_v53 = vpop.eup %4402 }
 0x3c4   :  { %1815 = vbcast.lane.b32.xlu0 %v1813_v34, 256  ;;  %v3060_v34 = vmul.f32 1.442695, %v3030_v19  ;;  %6430 = vst [vmem:[#allocation54_spill] sm:$0xff] %v5771_v53  ;;  %v3370_v19 = vrot.slane %v6422_v32, %v4826_v42 }
 0x3c6   :  { %1588 = vperm.xlu1 %4343, %v5747_v14   ;;  %4404 = vpow2.f32 %v3060_v34  ;;  %v3405_v34 = vrot.slane %v5718_v55, %v4801_v33 }
 0x3c7   :  { %4406 = vpow2.f32 %v3062_v26  ;;  %v1883_v26 = vrot.slane %v5475_v40, %v4810_v36 }
 0x3c8   :  { %3344 = vbcast.lane.b32.xlu0 %v3342_v57, 256  ;;  %v3356_v57 = vrot.slane %v6422_v32, %v4810_v36  ;;  %v1876_v32 = vrot.slane %v5475_v40, %v4801_v33 }
 0x3ca   :  { %3117 = vperm.xlu1 %4343, %v5755_v59  }
 0x3cc   :  { %1822 = vbcast.lane.b32.xlu0 %v1820_v20, 256 }
 0x3ce   :  { %1591 = vperm.xlu1 %4343, %v5761_v4  }
 0x3d0   :  { %3351 = vbcast.lane.b32.xlu0 %v3349_v54, 256  ;;  %v5776_v7 = vpop.eup %4404  ;;  %v1862_v54 = vrot.slane %v5475_v40, %v4769_v17 }
 0x3d1   :  { %6431 = vst [vmem:[#allocation55_spill] sm:$0xff] %v5776_v7  ;;  %v5781_v20 = vpop.eup %4406 }
 0x3d2   :  { %3120 = vperm.xlu1 %4343, %v5766_v52   ;;  %6432 = vst [vmem:[#allocation56_spill] sm:$0xff] %v5781_v20 }
 0x3d4   :  { %1829 = vbcast.lane.b32.xlu0 %v1827_v41, 256  ;;  %v5804_v41 = vpop.permute.xlu0 %1857 }
 0x3d6   :  { %1594 = vperm.xlu1 %4343, %v5771_v53  }
 0x3d8   :  { %3358 = vbcast.lane.b32.xlu0 %v3356_v57, 256 }
 0x3da   :  { %3123 = vperm.xlu1 %4343, %v5776_v7  }
 0x3dc   :  { %1836 = vbcast.lane.b32.xlu0 %v1834_v29, 256  ;;  %v3412_v29 = vrot.slane %v5718_v55, %v4810_v36 }
 0x3de   :  { %3126 = vperm.xlu1 %4343, %v5781_v20  }
 0x3e0   :  { %3365 = vbcast.lane.b32.xlu0 %v3363_v38, 256 }
 0x3e2   :  { %3337 = vbcast.lane.b32.xlu1 %v3335_v61, 256  ;;  %v1890_v61 = vrot.slane %v5475_v40, %v4817_v39 }
 0x3e4   :  { %1843 = vbcast.lane.b32.xlu0 %v1841_v47, 256 }
 0x3e6   :  { %3386 = vbcast.lane.b32.xlu1 %v3384_v21, 256  ;;  %v3419_v21 = vrot.slane %v5718_v55, %v4817_v39 }
 0x3e8   :  { %3372 = vbcast.lane.b32.xlu0 %v3370_v19, 256 }
 0x3ea   :  { %1864 = vbcast.lane.b32.xlu1 %v1862_v54, 256 }
 0x3ee   :  { %3393 = vbcast.lane.b32.xlu1 %v3391_v12, 256 }
 0x3f2   :  { %1871 = vbcast.lane.b32.xlu1 %v1869_v18, 256 }
 0x3f6   :  { %3400 = vbcast.lane.b32.xlu1 %v3398_v11, 256 }
 0x3fa   :  { %1878 = vbcast.lane.b32.xlu1 %v1876_v32, 256 }
 0x3fe   :  { %3407 = vbcast.lane.b32.xlu1 %v3405_v34, 256 }
 0x402   :  { %1885 = vbcast.lane.b32.xlu1 %v1883_v26, 256  ;;  %v1553_v54 = vpop.permute.xlu1 %1552 }
 0x403   :  { %v1556_v57 = vpop.permute.xlu0 %1555  ;;  %v1602_v7 = vrot.slane %v1553_v54, %v5481_v5 }
 0x406   :  { %3414 = vbcast.lane.b32.xlu1 %v3412_v29, 256  ;;  %v3082_v11 = vpop.permute.xlu1 %3081  ;;  %v1606_v29 = vrot.slane %v1556_v57, %v5481_v5 }
 0x407   :  { %v1559_v38 = vpop.permute.xlu0 %1558  ;;  %v3131_v15 = vrot.slane %v3082_v11, %v5481_v5 }
 0x408   :  { %v1663_v51 = vsel %vm1375_vm1, %v1606_v29, %v1602_v7 }
 0x40a   :  { %1892 = vbcast.lane.b32.xlu1 %v1890_v61, 256  ;;  %v3085_v34 = vpop.permute.xlu1 %3084  ;;  %v1610_v61 = vrot.slane %v1559_v38, %v5481_v5 }
 0x40b   :  { %v1562_v47 = vpop.permute.xlu0 %1561  ;;  %v3135_v4 = vrot.slane %v3085_v34, %v5481_v5 }
 0x40c   :  { %v1614_v52 = vrot.slane %v1562_v47, %v5481_v5  ;;  %v1664_v54 = vsel %vm1377_vm6, %v1610_v61, %v1663_v51 }
 0x40d   :  { %v3192_v47 = vsel %vm1375_vm1, %v3135_v4, %v3131_v15 }
 0x40e   :  { %3421 = vbcast.lane.b32.xlu1 %v3419_v21, 256  ;;  %v3088_v53 = vpop.permute.xlu1 %3087  ;;  %v1665_v38 = vsel %vm1379_vm7, %v1614_v52, %v1664_v54 }
 0x40f   :  { %v3091_v19 = vpop.permute.xlu0 %3090  ;;  %v3139_v21 = vrot.slane %v3088_v53, %v5481_v5 }
 0x410   :  { %v3143_v34 = vrot.slane %v3091_v19, %v5481_v5 }
 0x411   :  { %v3193_v53 = vsel %vm1377_vm6, %v3139_v21, %v3192_v47 }
 0x412   :  { %v3194_v15 = vsel %vm1379_vm7, %v3143_v34, %v3193_v53  ;;  %v3426_v53 = vrot.slane %v5718_v55, %v4826_v42 }
 0x413   :  { %v1565_v12 = vpop.permute.xlu0 %1564 }
 0x414   :  { %v1618_v59 = vrot.slane %v1565_v12, %v5481_v5 }
 0x416   :  { %v1666_v12 = vsel %vm1381_vm8, %v1618_v59, %v1665_v38 }
 0x417   :  { %v3094_v18 = vpop.permute.xlu0 %3093 }
 0x418   :  { %v3147_v7 = vrot.slane %v3094_v18, %v5481_v5 }
 0x41a   :  { %v3195_v19 = vsel %vm1381_vm8, %v3147_v7, %v3194_v15 }
 0x41b   :  { %v1568_v32 = vpop.permute.xlu0 %1567 }
 0x41c   :  { %v1622_v57 = vrot.slane %v1568_v32, %v5481_v5 }
 0x41e   :  { %v1667_v11 = vsel %vm1383_vm9, %v1622_v57, %v1666_v12 }
 0x41f   :  { %v3097_v26 = vpop.permute.xlu0 %3096 }
 0x420   :  { %v3151_v32 = vrot.slane %v3097_v26, %v5481_v5 }
 0x422   :  { %v3196_v21 = vsel %vm1383_vm9, %v3151_v32, %v3195_v19 }
 0x423   :  { %v1571_v20 = vpop.permute.xlu0 %1570 }
 0x424   :  { %v1626_v60 = vrot.slane %v1571_v20, %v5481_v5 }
 0x426   :  { %v1668_v52 = vsel %vm1385_vm10, %v1626_v60, %v1667_v11 }
 0x427   :  { %v3100_v14 = vpop.permute.xlu0 %3099 }
 0x428   :  { %v3155_v20 = vrot.slane %v3100_v14, %v5481_v5 }
 0x42a   :  { %v1577_v59 = vpop.permute.xlu1 %1576  ;;  %v3197_v57 = vsel %vm1385_vm10, %v3155_v20, %v3196_v21 }
 0x42b   :  { %v1574_v29 = vpop.permute.xlu0 %1573  ;;  %v1634_v15 = vrot.slane %v1577_v59, %v5481_v5 }
 0x42c   :  { %v1630_v51 = vrot.slane %v1574_v29, %v5481_v5 }
 0x42e   :  { %v1669_v4 = vsel %vm1387_vm11, %v1630_v51, %v1668_v52 }
 0x42f   :  { %v3103_v61 = vpop.permute.xlu0 %3102  ;;  %v1679_v18 = vsel %vm1398_vm12, %v1669_v4, 0.0 }
 0x430   :  { %v3159_v26 = vrot.slane %v3103_v61, %v5481_v5  ;;  %1680 = vadd.xlane.f32.xlu0 %v1679_v18 }
 0x431   :  { %v3109_v60 = vpop.permute.xlu1 %3108 }
 0x432   :  { %v3198_v14 = vsel %vm1387_vm11, %v3159_v26, %v3197_v57 }
 0x433   :  { %v3208_v54 = vsel %vm1398_vm12, %v3198_v14, 0.0  ;;  %v1580_v29 = vpop.permute.xlu0 %1579 }
 0x434   :  { %3209 = vadd.xlane.f32.xlu1 %v3208_v54  ;;  %v1638_v20 = vrot.slane %v1580_v29, %v5481_v5  ;;  %v3167_v29 = vrot.slane %v3109_v60, %v5481_v5 }
 0x435   :  { %v1583_v38 = vpop.permute.xlu1 %1582 }
 0x436   :  { %v1642_v52 = vrot.slane %v1583_v38, %v5481_v5  ;;  %v1670_v55 = vsel %vm1375_vm1, %v1638_v20, %v1634_v15 }
 0x437   :  { %v3106_v51 = vpop.permute.xlu0 %3105 }
 0x438   :  { %v1671_v21 = vsel %vm1377_vm6, %v1642_v52, %v1670_v55  ;;  %v3163_v54 = vrot.slane %v3106_v51, %v5481_v5 }
 0x439   :  { %v3112_v47 = vpop.permute.xlu1 %3111 }
 0x43b   :  { %v1598_v26 = vpop.permute.xlu0 %1597 }
 0x43d   :  { %v1586_v34 = vpop.permute.xlu1 %1585 }
 0x43e   :  { %v1646_v4 = vrot.slane %v1586_v34, %v5481_v5  ;;  %v3171_v34 = vrot.slane %v3112_v47, %v5481_v5 }
 0x440   :  { %v1672_v57 = vsel %vm1379_vm7, %v1646_v4, %v1671_v21  ;;  %v3199_v4 = vsel %vm1375_vm1, %v3167_v29, %v3163_v54  ;;  %v1897_v54 = vrot.slane %v5475_v40, %v4826_v42 }
 0x441   :  { %v3115_v12 = vpop.permute.xlu1 %3114  ;;  %v3200_v55 = vsel %vm1377_vm6, %v3171_v34, %v3199_v4 }
 0x445   :  { %3428 = vbcast.lane.b32.xlu1 %v3426_v53, 256  ;;  %v1589_v7 = vpop.permute.xlu1 %1588  ;;  %v1662_v53 = vrot.slane %v1598_v26, %v5481_v5 }
 0x446   :  { %v1650_v61 = vrot.slane %v1589_v7, %v5481_v5 }
 0x448   :  { %v1673_v38 = vsel %vm1381_vm8, %v1650_v61, %v1672_v57 }
 0x449   :  { %v3118_v11 = vpop.permute.xlu1 %3117 }
 0x44a   :  { %v3179_v52 = vrot.slane %v3118_v11, %v5481_v5 }
 0x44d   :  { %v1592_v32 = vpop.permute.xlu1 %1591 }
 0x44e   :  { %v1654_v18 = vrot.slane %v1592_v32, %v5481_v5  ;;  %v3175_v32 = vrot.slane %v3115_v12, %v5481_v5 }
 0x450   :  { %v1674_v7 = vsel %vm1383_vm9, %v1654_v18, %v1673_v38  ;;  %v3201_v60 = vsel %vm1379_vm7, %v3175_v32, %v3200_v55 }
 0x451   :  { %v3121_v19 = vpop.permute.xlu1 %3120  ;;  %v3202_v12 = vsel %vm1381_vm8, %v3179_v52, %v3201_v60 }
 0x452   :  { %v3183_v61 = vrot.slane %v3121_v19, %v5481_v5 }
 0x454   :  { %v3203_v11 = vsel %vm1383_vm9, %v3183_v61, %v3202_v12 }
 0x455   :  { %v1595_v14 = vpop.permute.xlu1 %1594 }
 0x456   :  { %v1658_v59 = vrot.slane %v1595_v14, %v5481_v5 }
 0x458   :  { %v1675_v20 = vsel %vm1385_vm10, %v1658_v59, %v1674_v7  ;;  %v5882_v59 = vpop.permute.xlu0 %3379 }
 0x459   :  { %v3124_v15 = vpop.permute.xlu1 %3123  ;;  %v1676_v51 = vsel %vm1387_vm11, %v1662_v53, %v1675_v20 }
 0x45a   :  { %v1682_v47 = vsel %vm1398_vm12, %v1676_v51, 0.0  ;;  %v3187_v18 = vrot.slane %v3124_v15, %v5481_v5 }
 0x45b   :  { %1683 = vadd.xlane.f32.xlu0 %v1682_v47 }
 0x45c   :  { %v3204_v57 = vsel %vm1385_vm10, %v3187_v18, %v3203_v11  ;;  %v1816_v53 = vpop.permute.xlu0 %1815 }
 0x45d   :  { %v3127_v21 = vpop.permute.xlu1 %3126 }
 0x45e   :  { %v3191_v26 = vrot.slane %v3127_v21, %v5481_v5 }
 0x460   :  { %v3205_v19 = vsel %vm1387_vm11, %v3191_v26, %v3204_v57  ;;  %v3345_v5 = vpop.permute.xlu0 %3344 }
 0x461   :  { %v3211_v14 = vsel %vm1398_vm12, %v3205_v19, 0.0  ;;  %v3338_v38 = vpop.permute.xlu1 %3337 }
 0x462   :  { %3212 = vadd.xlane.f32.xlu0 %v3211_v14 }
 0x464   :  { %v1823_v32 = vpop.permute.xlu0 %1822 }
 0x465   :  { %v5884_v34 = vpop.permute.xlu1 %3386 }
 0x468   :  { %v3352_v52 = vpop.permute.xlu0 %3351 }
 0x469   :  { %v5886_v7 = vpop.permute.xlu1 %1864 }
 0x46c   :  { %v1830_v51 = vpop.permute.xlu0 %1829 }
 0x46d   :  { %v5888_v29 = vpop.permute.xlu1 %3393 }
 0x470   :  { %v5896_v4 = vpop.permute.xlu0 %3358 }
 0x471   :  { %v5890_v20 = vpop.permute.xlu1 %1871 }
 0x472   :  { %6433 = vst [vmem:[#allocation57_spill] sm:$0xff] %v5890_v20 }
 0x474   :  { %v5900_v47 = vpop.permute.xlu0 %1836 }
 0x475   :  { %v5892_v15 = vpop.permute.xlu1 %3400 }
 0x476   :  { %6434 = vst [vmem:[#allocation58_spill] sm:$0xff] %v5892_v15 }
 0x478   :  { %1899 = vbcast.lane.b32.xlu0 %v1897_v54, 256  ;;  %v5904_v18 = vpop.permute.xlu0 %3365 }
 0x479   :  { %v5894_v40 = vpop.permute.xlu1 %1878 }
 0x47a   :  { %6435 = vst [vmem:[#allocation59_spill] sm:$0xff] %v5894_v40 }
 0x47c   :  { %v5908_v12 = vpop.permute.xlu0 %1843 }
 0x47d   :  { %v5898_v61 = vpop.permute.xlu1 %3407 }
 0x47e   :  { %6436 = vst [vmem:[#allocation60_spill] sm:$0xff] %v5898_v61 }
 0x480   :  { %v5912_v11 = vpop.permute.xlu0 %3372 }
 0x481   :  { %v5902_v55 = vpop.permute.xlu1 %1885 }
 0x482   :  { %6437 = vst [vmem:[#allocation61_spill] sm:$0xff] %v5902_v55 }
 0x485   :  { %v5906_v60 = vpop.permute.xlu1 %3414 }
 0x486   :  { %6438 = vst [vmem:[#allocation62_spill] sm:$0xff] %v5906_v60 }
 0x489   :  { %v5910_v21 = vpop.permute.xlu1 %1892 }
 0x48a   :  { %6439 = vst [vmem:[#allocation63_spill] sm:$0xff] %v5910_v21 }
 0x48d   :  { %v5914_v26 = vpop.permute.xlu1 %3421 }
 0x48e   :  { %6440 = vst [vmem:[#allocation64_spill] sm:$0xff] %v5914_v26 }
 0x4bd   :  { %v1681_v57 = vpop.xlane.xlu0 %1680 }
 0x4be   :  { %4408 = vrcp.f32 %v1681_v57 }
 0x4c1   :  { %v3210_v19 = vpop.xlane.xlu1 %3209 }
 0x4c2   :  { %4410 = vrcp.f32 %v3210_v19 }
 0x4c8   :  { %v5916_v14 = vpop.eup %4408 }
 0x4c9   :  { %v1696_v54 = vrot.slane %v5916_v14, %v4734_v3  ;;  %v1692_v60 = vrot.slane %v5916_v14, %v4731_v2  ;;  %v1700_v26 = vrot.slane %v5916_v14, %v4769_v17 }
 0x4cb   :  { %v1770_v55 = vmul.f32 %v5596_v25, %v1696_v54  ;;  %v1769_v21 = vmul.f32 %v5594_v9, %v1692_v60  ;;  %v1771_v54 = vmul.f32 %v5603_v58, %v1700_v26  ;;  %v1716_v26 = vrot.slane %v5916_v14, %v4817_v39 }
 0x4cc   :  { %v5924_v61 = vpop.eup %4410 }
 0x4cd   :  { %v1918_v57 = vmul.f32 %v5553_v44, %v1770_v55  ;;  %v1917_v19 = vmul.f32 %v5549_v37, %v1769_v21  ;;  %v3225_v40 = vrot.slane %v5924_v61, %v4734_v3  ;;  %v3221_v15 = vrot.slane %v5924_v61, %v4731_v2 }
 0x4ce   :  { %v3229_v25 = vrot.slane %v5924_v61, %v4769_v17  ;;  %v1704_v44 = vrot.slane %v5916_v14, %v4787_v23 }
 0x4cf   :  { %1940 = vperm.xlu1 %4343, %v1918_v57   ;;  %1935 = vperm.xlu0 %4342, %v1917_v19   ;;  %v3299_v9 = vmul.f32 %v5618_v63, %v3225_v40  ;;  %v3298_v60 = vmul.f32 %v5609_v22, %v3221_v15  ;;  %v1919_v57 = vmul.f32 %v5557_v35, %v1771_v54 }
 0x4d0   :  { %v3300_v21 = vmul.f32 %v5627_v1, %v3229_v25  ;;  %v1772_v63 = vmul.f32 %v5611_v56, %v1704_v44  ;;  %v3233_v22 = vrot.slane %v5924_v61, %v4787_v23  ;;  %v3237_v35 = vrot.slane %v5924_v61, %v4801_v33 }
 0x4d1   :  { %v3447_v37 = vmul.f32 %v5555_v28, %v3299_v9  ;;  %v3446_v55 = vmul.f32 %v5551_v10, %v3298_v60  ;;  %v1708_v10 = vrot.slane %v5916_v14, %v4801_v33  ;;  %v3241_v40 = vrot.slane %v5924_v61, %v4810_v36 }
 0x4d2   :  { %v3448_v20 = vmul.f32 %v3338_v38, %v3300_v21  ;;  %v1920_v15 = vmul.f32 %v1816_v53, %v1772_v63  ;;  %v3301_v28 = vmul.f32 %v5620_v48, %v3233_v22  ;;  %v3302_v38 = vmul.f32 %v5636_v13, %v3237_v35 }
 0x4d3   :  { %3469 = vperm.xlu1 %4343, %v3447_v37   ;;  %3464 = vperm.xlu0 %4342, %v3446_v55   ;;  %v1773_v1 = vmul.f32 %v5629_v49, %v1708_v10  ;;  %v3303_v49 = vmul.f32 %v5653_v50, %v3241_v40  ;;  %v1775_v19 = vmul.f32 %v5665_v31, %v1716_v26  ;;  %v6449_v26 = vld [vmem:[#allocation60_spill] sm:$0xff] }
 0x4d4   :  { %v3449_v58 = vmul.f32 %v3345_v5, %v3301_v28  ;;  %v3450_v53 = vmul.f32 %v3352_v52, %v3302_v38  ;;  %v1720_v50 = vrot.slane %v5916_v14, %v4826_v42 }
 0x4d5   :  { %v1921_v56 = vmul.f32 %v1823_v32, %v1773_v1  ;;  %v3451_v13 = vmul.f32 %v5896_v4, %v3303_v49  ;;  %v1923_v25 = vmul.f32 %v5900_v47, %v1775_v19 }
 0x4d6   :  { %v1776_v31 = vmul.f32 %v5684_v24, %v1720_v50  ;;  %v3249_v24 = vrot.slane %v5924_v61, %v4826_v42 }
 0x4d7   :  { %3474 = vperm.xlu1 %4343, %v3448_v20   ;;  %1945 = vperm.xlu0 %4342, %v1919_v57   ;;  %v1712_v20 = vrot.slane %v5916_v14, %v4810_v36 }
 0x4d8   :  { %v1924_v47 = vmul.f32 %v5908_v12, %v1776_v31  ;;  %v3305_v57 = vmul.f32 %v5691_v27, %v3249_v24 }
 0x4d9   :  { %v1774_v48 = vmul.f32 %v5646_v0, %v1712_v20  ;;  %v3245_v0 = vrot.slane %v5924_v61, %v4817_v39  ;;  %v6446_v20 = vld [vmem:[#allocation50_spill] sm:$0xff] }
 0x4da   :  { %v3453_v22 = vmul.f32 %v5912_v11, %v3305_v57  ;;  %v4416_v57 = vld [vmem:[#allocation5] sm:$0xff] }
 0x4db   :  { %1950 = vperm.xlu0 %4342, %v1920_v15   ;;  %v1922_v5 = vmul.f32 %v1830_v51, %v1774_v48  ;;  %v3304_v51 = vmul.f32 %v5675_v62, %v3245_v0  ;;  %v6441_v15 = vld [vmem:[#allocation51_spill] sm:$0xff] }
 0x4dc   :  { %v6447_v48 = vld [vmem:[#allocation59_spill] sm:$0xff] }
 0x4dd   :  { %v3452_v4 = vmul.f32 %v5904_v18, %v3304_v51  ;;  %v6452_v51 = vld [vmem:[#allocation49_spill] sm:$0xff] }
 0x4df   :  { %3479 = vperm.xlu0 %4342, %v3449_v58  }
 0x4e3   :  { %1955 = vperm.xlu0 %4342, %v1921_v56   ;;  %v6445_v56 = vld [vmem:[#allocation58_spill] sm:$0xff] }
 0x4e7   :  { %3484 = vperm.xlu0 %4342, %v3450_v53  }
 0x4e8   :  { %v1684_v32 = vpop.xlane.xlu0 %1683 }
 0x4e9   :  { %4412 = vrcp.f32 %v1684_v32 }
 0x4eb   :  { %1960 = vperm.xlu0 %4342, %v1922_v5  }
 0x4ef   :  { %3489 = vperm.xlu0 %4342, %v3451_v13   ;;  %v3213_v52 = vpop.xlane.xlu0 %3212  ;;  %v6450_v13 = vld [vmem:[#allocation48_spill] sm:$0xff] }
 0x4f0   :  { %4414 = vrcp.f32 %v3213_v52  ;;  %v6451_v52 = vld [vmem:[#allocation61_spill] sm:$0xff] }
 0x4f3   :  { %1965 = vperm.xlu0 %4342, %v1923_v25   ;;  %v5971_v9 = vpop.eup %4412 }
 0x4f4   :  { %v1724_v60 = vrot.slane %v5971_v9, %v4731_v2  ;;  %v1728_v44 = vrot.slane %v5971_v9, %v4734_v3  ;;  %v1752_v12 = vrot.slane %v5971_v9, %v4826_v42  ;;  %v1736_v27 = vrot.slane %v5971_v9, %v4787_v23 }
 0x4f5   :  { %v1740_v35 = vrot.slane %v5971_v9, %v4801_v33  ;;  %v1744_v49 = vrot.slane %v5971_v9, %v4810_v36  ;;  %v1748_v50 = vrot.slane %v5971_v9, %v4817_v39 }
 0x4f6   :  { %v1777_v62 = vmul.f32 %v5682_v30, %v1724_v60  ;;  %v1778_v14 = vmul.f32 %v5697_v43, %v1728_v44  ;;  %v1732_v30 = vrot.slane %v5971_v9, %v4769_v17  ;;  %v6454_v60 = vld [vmem:[#allocation54_spill] sm:$0xff]  ;;  %v3429_v9 = vpop.permute.xlu1 %3428 }
 0x4f7   :  { %3494 = vperm.xlu0 %4342, %v3452_v4   ;;  %v1781_v53 = vmul.f32 %v6446_v20, %v1740_v35  ;;  %v1782_v19 = vmul.f32 %v6450_v13, %v1744_v49  ;;  %v6453_v4 = vld [vmem:[#allocation62_spill] sm:$0xff]  ;;  %v1783_v44 = vmul.f32 %v6454_v60, %v1748_v50 }
 0x4f8   :  { %v1925_v37 = vmul.f32 %v5559_v8, %v1777_v62  ;;  %v1926_v18 = vmul.f32 %v5804_v41, %v1778_v14  ;;  %v6455_v14 = vld [vmem:[#allocation63_spill] sm:$0xff] }
 0x4f9   :  { %v1929_v40 = vmul.f32 %v6447_v48, %v1781_v53  ;;  %v1930_v25 = vmul.f32 %v6451_v52, %v1782_v19 }
 0x4fa   :  { %v4415_v55 = vpop.eup %4414  ;;  %1975 = vperm.xlu1 %4343, %v1925_v37   ;;  %v6456_v37 = vld [vmem:[#allocation55_spill] sm:$0xff] }
 0x4fb   :  { %1970 = vperm.xlu0 %4342, %v1924_v47   ;;  %v3257_v21 = vrot.slane %v4415_v55, %v4734_v3  ;;  %v3253_v54 = vrot.slane %v4415_v55, %v4731_v2  ;;  %v1779_v3 = vmul.f32 %v5706_v6, %v1732_v30  ;;  %v3261_v63 = vrot.slane %v4415_v55, %v4769_v17  ;;  %v6442_v17 = vld [vmem:[#allocation52_spill] sm:$0xff] }
 0x4fc   :  { %v1780_v10 = vmul.f32 %v6442_v17, %v1736_v27  ;;  %v3265_v58 = vrot.slane %v4415_v55, %v4787_v23  ;;  %v6448_v23 = vld [vmem:[#allocation47_spill] sm:$0xff]  ;;  %v3273_v0 = vrot.slane %v4415_v55, %v4810_v36  ;;  %v3277_v62 = vrot.slane %v4415_v55, %v4817_v39 }
 0x4fd   :  { %v3307_v43 = vmul.f32 %v5699_v16, %v3257_v21  ;;  %v3306_v8 = vmul.f32 %v5708_v45, %v3253_v54  ;;  %v1784_v16 = vmul.f32 %v5720_v46, %v1752_v12  ;;  %v1927_v45 = vmul.f32 %v5886_v7, %v1779_v3  ;;  %v6443_v46 = vld [vmem:[#allocation57_spill] sm:$0xff]  ;;  %v6458_v54 = vld [vmem:[#allocation64_spill] sm:$0xff]  ;;  %v6460_v3 = vld [vmem:[#allocation15_spill] sm:$0xff] }
 0x4fe   :  { %v3308_v28 = vmul.f32 %v6441_v15, %v3261_v63  ;;  %v1928_v11 = vmul.f32 %v6443_v46, %v1780_v10  ;;  %v6444_v7 = vld [vmem:[#allocation53_spill] sm:$0xff]  ;;  %v3281_v47 = vrot.slane %v4415_v55, %v4826_v42  ;;  %v1931_v36 = vmul.f32 %v6455_v14, %v1783_v44  ;;  %v4417_v42 = vld [vmem:[#allocation5 + $0x8] sm:$0xff]  ;;  %v4418_v17 = vld [vmem:[#allocation7] sm:$0xff] }
 0x4ff   :  { %1980 = vperm.xlu0 %4342, %v1926_v18   ;;  %v3455_v61 = vmul.f32 %v5884_v34, %v3307_v43  ;;  %v3454_v41 = vmul.f32 %v5882_v59, %v3306_v8  ;;  %v1900_v34 = vpop.permute.xlu0 %1899  ;;  %v3309_v1 = vmul.f32 %v6444_v7, %v3265_v58  ;;  %v3312_v24 = vmul.f32 %v6456_v37, %v3277_v62  ;;  %v6457_v18 = vld [vmem:[#allocation56_spill] sm:$0xff]  ;;  %v6461_v58 = vld [vmem:[#allocation18_spill] sm:$0xff] }
 0x500   :  { %v1932_v59 = vmul.f32 %v1900_v34, %v1784_v16  ;;  %v3456_v6 = vmul.f32 %v5888_v29, %v3308_v28  ;;  %v3269_v29 = vrot.slane %v4415_v55, %v4801_v33  ;;  %v3311_v33 = vmul.f32 %v6452_v51, %v3273_v0 }
 0x501   :  { %3509 = vperm.xlu1 %4343, %v3455_v61   ;;  %v3457_v38 = vmul.f32 %v6445_v56, %v3309_v1  ;;  %v3313_v21 = vmul.f32 %v6457_v18, %v3281_v47  ;;  %v3460_v30 = vmul.f32 %v6458_v54, %v3312_v24  ;;  %v6459_v61 = vld [vmem:[#allocation16_spill] sm:$0xff]  ;;  %v6462_v1 = vld [vmem:[#allocation17_spill] sm:$0xff] }
 0x502   :  { %v3310_v5 = vmul.f32 %v6448_v23, %v3269_v29  ;;  %v3459_v31 = vmul.f32 %v6453_v4, %v3311_v33 }
 0x503   :  { %3504 = vperm.xlu0 %4342, %v3454_v41   ;;  %v3461_v43 = vmul.f32 %v3429_v9, %v3313_v21  ;;  %v4420_v21 = vld [vmem:[#allocation5 + $0x10] sm:$0xff] }
 0x504   :  { %v3458_v32 = vmul.f32 %v6449_v26, %v3310_v5 }
 0x505   :  { %1985 = vperm.xlu1 %4343, %v1927_v45  }
 0x507   :  { %3499 = vperm.xlu0 %4342, %v3453_v22  }
 0x509   :  { %3514 = vperm.xlu1 %4343, %v3456_v6  }
 0x50b   :  { %2010 = vperm.xlu0 %4342, %v1932_v59  }
 0x50d   :  { %1990 = vperm.xlu1 %4343, %v1928_v11   ;;  %v4419_v11 = vld [vmem:[#allocation7 + $0x8] sm:$0xff] }
 0x511   :  { %3519 = vperm.xlu1 %4343, %v3457_v38  }
 0x515   :  { %1995 = vperm.xlu1 %4343, %v1929_v40  }
 0x519   :  { %3524 = vperm.xlu1 %4343, %v3458_v32  }
 0x51d   :  { %2000 = vperm.xlu1 %4343, %v1930_v25  }
 0x521   :  { %3529 = vperm.xlu1 %4343, %v3459_v31  }
 0x525   :  { %2005 = vperm.xlu1 %4343, %v1931_v36  }
 0x529   :  { %3534 = vperm.xlu1 %4343, %v3460_v30   ;;  %v6463_v30 = vld [vmem:[#allocation21_spill] sm:$0xff] }
 0x52d   :  { %3539 = vperm.xlu1 %4343, %v3461_v43   ;;  %v6464_v43 = vld [vmem:[#allocation22_spill] sm:$0xff] }
 0x54e   :  { %v1936_v8 = vpop.permute.xlu0 %1935  ;;  %v1941_v12 = vpop.permute.xlu1 %1940 }
 0x54f   :  { %v2013_v39 = vmul.f32 %v4416_v57, %v1936_v8  ;;  %v2141_v41 = vmul.f32 %v1936_v8, %v6459_v61  ;;  %v2014_v55 = vmul.f32 %v4417_v42, %v1941_v12  ;;  %v2142_v63 = vmul.f32 %v6460_v3, %v1941_v12  ;;  %v4421_v3 = vld [vmem:[#allocation7 + $0x10] sm:$0xff] }
 0x551   :  { %v2029_v22 = vsel %vm109_vm0, %v2013_v39, 0.0  ;;  %v2157_v16 = vsel %vm109_vm0, %v2141_v41, 0.0  ;;  %v2164_v45 = vsel %vm109_vm0, %v2142_v63, 0.0  ;;  %v2036_v27 = vsel %vm109_vm0, %v2014_v55, 0.0 }
 0x552   :  { %v2030_v15 = vrot.slane %v2029_v22, 4  ;;  %v2158_v28 = vrot.slane %v2157_v16, 4  ;;  %v2165_v34 = vrot.slane %v2164_v45, 4  ;;  %v3465_v59 = vpop.permute.xlu0 %3464  ;;  %v3470_v6 = vpop.permute.xlu1 %3469  ;;  %v2037_v40 = vrot.slane %v2036_v27, 4 }
 0x553   :  { %v3542_v10 = vmul.f32 %v4418_v17, %v3465_v59  ;;  %v3670_v46 = vmul.f32 %v3465_v59, %v6461_v58  ;;  %v3543_v7 = vmul.f32 %v4419_v11, %v3470_v6  ;;  %v3671_v35 = vmul.f32 %v6462_v1, %v3470_v6 }
 0x554   :  { %v2159_v56 = vadd.f32 %v2158_v28, %v2157_v16  ;;  %v2166_v38 = vadd.f32 %v2165_v34, %v2164_v45  ;;  %v2031_v49 = vadd.f32 %v2030_v15, %v2029_v22  ;;  %v2038_v31 = vadd.f32 %v2037_v40, %v2036_v27 }
 0x555   :  { %v3558_v20 = vsel %vm109_vm0, %v3542_v10, 0.0  ;;  %v3686_v53 = vsel %vm109_vm0, %v3670_v46, 0.0  ;;  %v3693_v29 = vsel %vm109_vm0, %v3671_v35, 0.0  ;;  %v3565_v32 = vsel %vm109_vm0, %v3543_v7, 0.0 }
 0x556   :  { %v2160_v48 = vrot.slane %v2159_v56, 2  ;;  %v2167_v23 = vrot.slane %v2166_v38, 2  ;;  %v1946_v5 = vpop.permute.xlu0 %1945  ;;  %v3687_v26 = vrot.slane %v3686_v53, 4  ;;  %v3694_v13 = vrot.slane %v3693_v29, 4  ;;  %v3475_v62 = vpop.permute.xlu1 %3474 }
 0x557   :  { %v3559_v19 = vrot.slane %v3558_v20, 4  ;;  %v3566_v33 = vrot.slane %v3565_v32, 4  ;;  %v2032_v4 = vrot.slane %v2031_v49, 2  ;;  %v2015_v54 = vmul.f32 %v4420_v21, %v1946_v5 }
 0x558   :  { %v2161_v0 = vadd.f32 %v2160_v48, %v2159_v56  ;;  %v2168_v52 = vadd.f32 %v2167_v23, %v2166_v38  ;;  %v3688_v25 = vadd.f32 %v3687_v26, %v3686_v53  ;;  %v3695_v51 = vadd.f32 %v3694_v13, %v3693_v29  ;;  %v4422_v26 = vld [vmem:[#allocation5 + $0x18] sm:$0xff] }
 0x559   :  { %v3560_v47 = vadd.f32 %v3559_v19, %v3558_v20  ;;  %v3567_v18 = vadd.f32 %v3566_v33, %v3565_v32  ;;  %v2143_v9 = vmul.f32 %v1946_v5, %v6463_v30  ;;  %v3672_v8 = vmul.f32 %v3475_v62, %v6464_v43  ;;  %v6465_v20 = vld [vmem:[#allocation19_spill] sm:$0xff]  ;;  %v6466_v19 = vld [vmem:[#allocation20_spill] sm:$0xff]  ;;  %v4423_v33 = vld [vmem:[#allocation7 + $0x18] sm:$0xff] }
 0x55a   :  { %v1951_v50 = vpop.permute.xlu0 %1950  ;;  %v3689_v60 = vrot.slane %v3688_v25, 2  ;;  %v3696_v44 = vrot.slane %v3695_v51, 2  ;;  %v2162_v14 = vrot.slane %v2161_v0, 1  ;;  %v2169_v36 = vrot.slane %v2168_v52, 1 }
 0x55b   :  { %v2033_v57 = vadd.f32 %v2032_v4, %v2031_v49  ;;  %v2039_v39 = vrot.slane %v2038_v31, 2  ;;  %v3561_v42 = vrot.slane %v3560_v47, 2  ;;  %v2171_v55 = vsel %vm109_vm0, %v2143_v9, 0.0 }
 0x55c   :  { %v3690_v37 = vadd.f32 %v3689_v60, %v3688_v25  ;;  %v3697_v24 = vadd.f32 %v3696_v44, %v3695_v51  ;;  %v3544_v63 = vmul.f32 %v4421_v3, %v3475_v62  ;;  %v3700_v22 = vsel %vm109_vm0, %v3672_v8, 0.0  ;;  %v6467_v3 = vld [vmem:[#allocation25_spill] sm:$0xff] }
 0x55d   :  { %v2163_v16 = vadd.f32 %v2162_v14, %v2161_v0  ;;  %v2170_v45 = vadd.f32 %v2169_v36, %v2168_v52  ;;  %v3568_v27 = vrot.slane %v3567_v18, 2  ;;  %v2043_v34 = vsel %vm109_vm0, %v2015_v54, 0.0 }
 0x55e   :  { %v3480_v12 = vpop.permute.xlu0 %3479  ;;  %v3691_v61 = vrot.slane %v3690_v37, 1  ;;  %v3698_v41 = vrot.slane %v3697_v24, 1  ;;  %v2172_v59 = vrot.slane %v2171_v55, 4  ;;  %v3701_v6 = vrot.slane %v3700_v22, 4 }
 0x55f   :  { %v2040_v46 = vadd.f32 %v2039_v39, %v2038_v31  ;;  %v3572_v7 = vsel %vm109_vm0, %v3544_v63, 0.0  ;;  %v3562_v35 = vadd.f32 %v3561_v42, %v3560_v47  ;;  %v2044_v38 = vrot.slane %v2043_v34, 4 }
 0x560   :  { %v3692_v15 = vadd.f32 %v3691_v61, %v3690_v37  ;;  %v3699_v28 = vadd.f32 %v3698_v41, %v3697_v24  ;;  %v2173_v11 = vadd.f32 %v2172_v59, %v2171_v55  ;;  %v3702_v1 = vadd.f32 %v3701_v6, %v3700_v22  ;;  %v4425_v59 = vld [vmem:[#allocation7 + $0x20] sm:$0xff] }
 0x561   :  { %v2144_v53 = vmul.f32 %v6465_v20, %v1951_v50  ;;  %v2034_v29 = vrot.slane %v2033_v57, 1  ;;  %v3569_v48 = vadd.f32 %v3568_v27, %v3567_v18  ;;  %v3573_v49 = vrot.slane %v3572_v7, 4 }
 0x562   :  { %v1956_v17 = vpop.permute.xlu0 %1955  ;;  %v3814_v10 = vadd.f32 %v3692_v15, %v2163_v16  ;;  %v3815_v58 = vadd.f32 %v3699_v28, %v2170_v45  ;;  %v2174_v40 = vrot.slane %v2173_v11, 2  ;;  %v3703_v23 = vrot.slane %v3702_v1, 2  ;;  %v4424_v28 = vld [vmem:[#allocation5 + $0x20] sm:$0xff] }
 0x563   :  { %v2016_v32 = vmul.f32 %v4422_v26, %v1951_v50  ;;  %v2178_v13 = vsel %vm109_vm0, %v2144_v53, 0.0  ;;  %v3673_v0 = vmul.f32 %v6466_v19, %v3480_v12  ;;  %v2041_v52 = vrot.slane %v2040_v46, 1 }
 0x564   :  { %v6053_v56 = vsel %vm1375_vm1, %v3815_v58, %v3814_v10  ;;  %v2175_v25 = vadd.f32 %v2174_v40, %v2173_v11  ;;  %v3704_v51 = vadd.f32 %v3703_v23, %v3702_v1  ;;  %v3545_v4 = vmul.f32 %v4423_v33, %v3480_v12  ;;  %v6468_v10 = vld [vmem:[#allocation26_spill] sm:$0xff] }
 0x565   :  { %v3563_v31 = vrot.slane %v3562_v35, 1  ;;  %v2045_v60 = vadd.f32 %v2044_v38, %v2043_v34  ;;  %v2179_v44 = vrot.slane %v2178_v13, 4  ;;  %v3707_v62 = vsel %vm109_vm0, %v3673_v0, 0.0  ;;  %v4426_v0 = vld [vmem:[#allocation5 + $0x28] sm:$0xff] }
 0x566   :  { %v3485_v5 = vpop.permute.xlu0 %3484  ;;  %v2035_v47 = vadd.f32 %v2034_v29, %v2033_v57  ;;  %v3570_v14 = vrot.slane %v3569_v48, 1  ;;  %v2176_v36 = vrot.slane %v2175_v25, 1  ;;  %v3705_v37 = vrot.slane %v3704_v51, 1 }
 0x567   :  { %v3574_v24 = vadd.f32 %v3573_v49, %v3572_v7  ;;  %v2050_v50 = vsel %vm109_vm0, %v2016_v32, 0.0  ;;  %v2180_v18 = vadd.f32 %v2179_v44, %v2178_v13  ;;  %v3708_v21 = vrot.slane %v3707_v62, 4 }
 0x568   :  { %v2042_v54 = vadd.f32 %v2041_v52, %v2040_v46  ;;  %v2177_v30 = vadd.f32 %v2176_v36, %v2175_v25  ;;  %v3706_v9 = vadd.f32 %v3705_v37, %v3704_v51  ;;  %v3579_v43 = vsel %vm109_vm0, %v3545_v4, 0.0  ;;  %v6469_v25 = vld [vmem:[#allocation24_spill] sm:$0xff] }
 0x569   :  { %v3564_v12 = vadd.f32 %v3563_v31, %v3562_v35  ;;  %v2046_v39 = vrot.slane %v2045_v60, 2  ;;  %v2181_v61 = vrot.slane %v2180_v18, 2  ;;  %v3709_v41 = vadd.f32 %v3708_v21, %v3707_v62 }
 0x56a   :  { %v1961_v8 = vpop.permute.xlu0 %1960  ;;  %v3571_v42 = vadd.f32 %v3570_v14, %v3569_v48  ;;  %v6061_v57 = vadd.f32 %v3706_v9, %v2177_v30  ;;  %v2051_v55 = vrot.slane %v2050_v50, 4  ;;  %v2145_v63 = vmul.f32 %v1956_v17, %v6467_v3  ;;  %v4427_v30 = vld [vmem:[#allocation7 + $0x28] sm:$0xff] }
 0x56b   :  { %v3575_v22 = vrot.slane %v3574_v24, 2  ;;  %v2182_v16 = vadd.f32 %v2181_v61, %v2180_v18  ;;  %v3580_v45 = vrot.slane %v3579_v43, 4  ;;  %v3710_v15 = vrot.slane %v3709_v41, 2 }
 0x56c   :  { %v2017_v27 = vmul.f32 %v4424_v28, %v1956_v17  ;;  %v2185_v34 = vsel %vm109_vm0, %v2145_v63, 0.0  ;;  %v3546_v6 = vmul.f32 %v4425_v59, %v3485_v5  ;;  %v3674_v58 = vmul.f32 %v3485_v5, %v6468_v10 }
 0x56d   :  { %v6066_v46 = vadd.f32 %v3564_v12, %v2035_v47  ;;  %v2047_v11 = vadd.f32 %v2046_v39, %v2045_v60  ;;  %v2183_v7 = vrot.slane %v2182_v16, 1  ;;  %v3711_v1 = vadd.f32 %v3710_v15, %v3709_v41 }
 0x56e   :  { %v2052_v35 = vadd.f32 %v2051_v55, %v2050_v50  ;;  %v2186_v38 = vrot.slane %v2185_v34, 4  ;;  %v3586_v20 = vsel %vm109_vm0, %v3546_v6, 0.0  ;;  %v3714_v53 = vsel %vm109_vm0, %v3674_v58, 0.0  ;;  %v3490_v29 = vpop.permute.xlu0 %3489  ;;  %v4428_v58 = vld [vmem:[#allocation5 + $0x30] sm:$0xff] }
 0x56f   :  { %v6070_v48 = vadd.f32 %v3571_v42, %v2042_v54  ;;  %v6072_v17 = vadd.f32 %v3575_v22, %v3574_v24  ;;  %v3581_v40 = vadd.f32 %v3580_v45, %v3579_v43  ;;  %v3712_v23 = vrot.slane %v3711_v1, 1  ;;  %v6470_v43 = vld [vmem:[#allocation23_spill] sm:$0xff] }
 0x570   :  { %v2057_v5 = vsel %vm109_vm0, %v2017_v27, 0.0  ;;  %v2187_v49 = vadd.f32 %v2186_v38, %v2185_v34  ;;  %v3587_v26 = vrot.slane %v3586_v20, 4  ;;  %v3715_v32 = vrot.slane %v3714_v53, 4 }
 0x571   :  { %v2184_v13 = vadd.f32 %v2183_v7, %v2182_v16  ;;  %v3713_v19 = vadd.f32 %v3712_v23, %v3711_v1  ;;  %v2018_v52 = vmul.f32 %v4426_v0, %v1961_v8  ;;  %v2146_v51 = vmul.f32 %v6469_v25, %v1961_v8  ;;  %v6471_v7 = vld [vmem:[#allocation30_spill] sm:$0xff]  ;;  %v4429_v25 = vld [vmem:[#allocation7 + $0x30] sm:$0xff] }
 0x572   :  { %v2048_v33 = vrot.slane %v2047_v11, 1  ;;  %v2053_v4 = vrot.slane %v2052_v35, 2  ;;  %v2188_v31 = vrot.slane %v2187_v49, 2  ;;  %v3716_v60 = vadd.f32 %v3715_v32, %v3714_v53  ;;  %v1966_v18 = vpop.permute.xlu0 %1965 }
 0x573   :  { %v6076_v44 = vadd.f32 %v3713_v19, %v2184_v13  ;;  %v2058_v62 = vrot.slane %v2057_v5, 4  ;;  %v2064_v47 = vsel %vm109_vm0, %v2018_v52, 0.0  ;;  %v2192_v14 = vsel %vm109_vm0, %v2146_v51, 0.0 }
 0x574   :  { %v3582_v36 = vrot.slane %v3581_v40, 2  ;;  %v2189_v37 = vadd.f32 %v2188_v31, %v2187_v49  ;;  %v3588_v24 = vadd.f32 %v3587_v26, %v3586_v20  ;;  %v3717_v50 = vrot.slane %v3716_v60, 2 }
 0x575   :  { %v2065_v21 = vrot.slane %v2064_v47, 4  ;;  %v2193_v54 = vrot.slane %v2192_v14, 4  ;;  %v3547_v9 = vmul.f32 %v4427_v30, %v3490_v29  ;;  %v3675_v8 = vmul.f32 %v6470_v43, %v3490_v29 }
 0x576   :  { %v6081_v12 = vadd.f32 %v2048_v33, %v2047_v11  ;;  %v3577_v39 = vrot.slane %v6072_v17, 1  ;;  %v2190_v61 = vrot.slane %v2189_v37, 1  ;;  %v3718_v41 = vadd.f32 %v3717_v50, %v3716_v60  ;;  %v3495_v38 = vpop.permute.xlu0 %3494  ;;  %v6472_v33 = vld [vmem:[#allocation29_spill] sm:$0xff] }
 0x577   :  { %v2059_v42 = vadd.f32 %v2058_v62, %v2057_v5  ;;  %v2194_v55 = vadd.f32 %v2193_v54, %v2192_v14  ;;  %v3593_v3 = vsel %vm109_vm0, %v3547_v9, 0.0  ;;  %v3721_v63 = vsel %vm109_vm0, %v3675_v8, 0.0 }
 0x578   :  { %v6086_v22 = vadd.f32 %v2053_v4, %v2052_v35  ;;  %v3583_v16 = vadd.f32 %v3582_v36, %v3581_v40  ;;  %v3589_v45 = vrot.slane %v3588_v24, 2  ;;  %v3719_v15 = vrot.slane %v3718_v41, 1 }
 0x579   :  { %v2066_v28 = vadd.f32 %v2065_v21, %v2064_v47  ;;  %v2195_v27 = vrot.slane %v2194_v55, 2  ;;  %v3594_v34 = vrot.slane %v3593_v3, 4  ;;  %v3722_v59 = vrot.slane %v3721_v63, 4 }
 0x57a   :  { %v2191_v6 = vadd.f32 %v2190_v61, %v2189_v37  ;;  %v3720_v10 = vadd.f32 %v3719_v15, %v3718_v41  ;;  %v2019_v11 = vmul.f32 %v4428_v58, %v1966_v18  ;;  %v2147_v1 = vmul.f32 %v1966_v18, %v6471_v7  ;;  %v1971_v50 = vpop.permute.xlu0 %1970  ;;  %v4430_v41 = vld [vmem:[#allocation5 + $0x38] sm:$0xff] }
 0x57b   :  { %v2060_v20 = vrot.slane %v2059_v42, 2  ;;  %v2196_v53 = vadd.f32 %v2195_v27, %v2194_v55  ;;  %v3595_v29 = vadd.f32 %v3594_v34, %v3593_v3  ;;  %v3723_v23 = vadd.f32 %v3722_v59, %v3721_v63  ;;  %v6473_v3 = vld [vmem:[#allocation28_spill] sm:$0xff]  ;;  %v1976_v59 = vpop.permute.xlu1 %1975 }
 0x57c   :  { %v3590_v35 = vadd.f32 %v3589_v45, %v3588_v24  ;;  %v6089_v5 = vadd.f32 %v3720_v10, %v2191_v6  ;;  %v2071_v40 = vsel %vm109_vm0, %v2019_v11, 0.0  ;;  %v2199_v49 = vsel %vm109_vm0, %v2147_v1, 0.0 }
 0x57d   :  { %v2067_v26 = vrot.slane %v2066_v28, 2  ;;  %v2197_v32 = vrot.slane %v2196_v53, 1  ;;  %v3596_v13 = vrot.slane %v3595_v29, 2  ;;  %v3724_v19 = vrot.slane %v3723_v23, 2 }
 0x57e   :  { %v2072_v0 = vrot.slane %v2071_v40, 4  ;;  %v2200_v52 = vrot.slane %v2199_v49, 4  ;;  %v3548_v51 = vmul.f32 %v4429_v25, %v3495_v38  ;;  %v3676_v4 = vmul.f32 %v3495_v38, %v6472_v33 }
 0x57f   :  { %v3578_v31 = vadd.f32 %v3577_v39, %v6072_v17  ;;  %v3584_v60 = vrot.slane %v3583_v16, 1  ;;  %v3597_v62 = vadd.f32 %v3596_v13, %v3595_v29  ;;  %v3725_v47 = vadd.f32 %v3724_v19, %v3723_v23 }
 0x580   :  { %v2073_v14 = vadd.f32 %v2072_v0, %v2071_v40  ;;  %v2201_v36 = vadd.f32 %v2200_v52, %v2199_v49  ;;  %v3600_v37 = vsel %vm109_vm0, %v3548_v51, 0.0  ;;  %v3728_v24 = vsel %vm109_vm0, %v3676_v4, 0.0  ;;  %v1981_v49 = vpop.permute.xlu0 %1980  ;;  %v4432_v4 = vld [vmem:[#allocation5 + $0x48] sm:$0xff] }
 0x581   :  { %v2061_v18 = vadd.f32 %v2060_v20, %v2059_v42  ;;  %v2068_v21 = vadd.f32 %v2067_v26, %v2066_v28  ;;  %v3726_v54 = vrot.slane %v3725_v47, 1  ;;  %v3601_v30 = vrot.slane %v3600_v37, 4 }
 0x582   :  { %v2055_v9 = vrot.slane %v6086_v22, 1  ;;  %v3591_v43 = vrot.slane %v3590_v35, 1  ;;  %v2198_v8 = vadd.f32 %v2197_v32, %v2196_v53  ;;  %v3729_v61 = vrot.slane %v3728_v24, 4  ;;  %v6474_v53 = vld [vmem:[#allocation34_spill] sm:$0xff]  ;;  %v4431_v32 = vld [vmem:[#allocation5 + $0x40] sm:$0xff] }
 0x583   :  { %v3727_v17 = vadd.f32 %v3726_v54, %v3725_v47  ;;  %v3602_v39 = vadd.f32 %v3601_v30, %v3600_v37  ;;  %v2020_v55 = vmul.f32 %v4430_v41, %v1971_v50  ;;  %v2148_v63 = vmul.f32 %v6473_v3, %v1971_v50  ;;  %v6476_v54 = vld [vmem:[#allocation31_spill] sm:$0xff] }
 0x584   :  { %v3585_v45 = vadd.f32 %v3584_v60, %v3583_v16  ;;  %v3598_v15 = vrot.slane %v3597_v62, 1  ;;  %v2074_v27 = vrot.slane %v2073_v14, 2  ;;  %v2202_v34 = vrot.slane %v2201_v36, 2  ;;  %v6475_v60 = vld [vmem:[#allocation32_spill] sm:$0xff]  ;;  %v3505_v3 = vpop.permute.xlu0 %3504 }
 0x585   :  { %v6102_v42 = vsel %vm1375_vm1, %v6070_v48, %v6066_v46  ;;  %v2062_v28 = vrot.slane %v2061_v18, 1  ;;  %v2069_v6 = vrot.slane %v2068_v21, 1  ;;  %v6104_v10 = vadd.f32 %v3727_v17, %v2198_v8 }
 0x586   :  { %v6107_v58 = vadd.f32 %v3578_v31, %v6081_v12  ;;  %v2056_v11 = vadd.f32 %v2055_v9, %v6086_v22  ;;  %v3592_v7 = vadd.f32 %v3591_v43, %v3590_v35  ;;  %v3730_v16 = vadd.f32 %v3729_v61, %v3728_v24  ;;  %v3510_v35 = vpop.permute.xlu1 %3509 }
 0x587   :  { %v3603_v1 = vrot.slane %v3602_v39, 2  ;;  %v2078_v38 = vsel %vm109_vm0, %v2020_v55, 0.0  ;;  %v2206_v20 = vsel %vm109_vm0, %v2148_v63, 0.0  ;;  %v2149_v29 = vmul.f32 %v1976_v59, %v6474_v53 }
 0x588   :  { %v6113_v46 = vadd.f32 %v3585_v45, %v2056_v11  ;;  %v3599_v48 = vadd.f32 %v3598_v15, %v3597_v62  ;;  %v2075_v23 = vadd.f32 %v2074_v27, %v2073_v14  ;;  %v2203_v40 = vadd.f32 %v2202_v34, %v2201_v36 }
 0x589   :  { %v2063_v26 = vadd.f32 %v2062_v28, %v2061_v18  ;;  %v2070_v12 = vadd.f32 %v2069_v6, %v2068_v21  ;;  %v2021_v13 = vmul.f32 %v4431_v32, %v1976_v59  ;;  %v2213_v22 = vsel %vm109_vm0, %v2149_v29, 0.0  ;;  %v4433_v18 = vld [vmem:[#allocation7 + $0x48] sm:$0xff] }
 0x58a   :  { %v3731_v19 = vrot.slane %v3730_v16, 2  ;;  %v2079_v0 = vrot.slane %v2078_v38, 4  ;;  %v2207_v52 = vrot.slane %v2206_v20, 4  ;;  %v2214_v25 = vrot.slane %v2213_v22, 4  ;;  %v1986_v63 = vpop.permute.xlu1 %1985 }
 0x58b   :  { %v6116_v51 = vadd.f32 %v3592_v7, %v2063_v26  ;;  %v3604_v33 = vadd.f32 %v3603_v1, %v3602_v39  ;;  %v2022_v31 = vmul.f32 %v4432_v4, %v1981_v49  ;;  %v2150_v62 = vmul.f32 %v6475_v60, %v1981_v49  ;;  %v4434_v1 = vld [vmem:[#allocation7 + $0x40] sm:$0xff]  ;;  %v4435_v4 = vld [vmem:[#allocation5 + $0x50] sm:$0xff] }
 0x58c   :  { %v6119_v47 = vadd.f32 %v3599_v48, %v2070_v12  ;;  %v2076_v14 = vrot.slane %v2075_v23, 1  ;;  %v2204_v36 = vrot.slane %v2203_v40, 1  ;;  %v2215_v37 = vadd.f32 %v2214_v25, %v2213_v22 }
 0x58d   :  { %v2085_v24 = vsel %vm109_vm0, %v2021_v13, 0.0  ;;  %v2220_v50 = vsel %vm109_vm0, %v2150_v62, 0.0  ;;  %v3551_v21 = vmul.f32 %v4433_v18, %v3510_v35  ;;  %v3679_v30 = vmul.f32 %v6476_v54, %v3510_v35  ;;  %v3500_v54 = vpop.permute.xlu0 %3499 }
 0x58e   :  { %v3732_v9 = vadd.f32 %v3731_v19, %v3730_v16  ;;  %v2080_v43 = vadd.f32 %v2079_v0, %v2078_v38  ;;  %v2208_v8 = vadd.f32 %v2207_v52, %v2206_v20  ;;  %v2092_v61 = vsel %vm109_vm0, %v2022_v31, 0.0  ;;  %v6477_v20 = vld [vmem:[#allocation33_spill] sm:$0xff]  ;;  %v3515_v0 = vpop.permute.xlu1 %3514 }
 0x58f   :  { %v3605_v17 = vrot.slane %v3604_v33, 1  ;;  %v2221_v39 = vrot.slane %v2220_v50, 4  ;;  %v3621_v41 = vsel %vm109_vm0, %v3551_v21, 0.0  ;;  %v3749_v55 = vsel %vm109_vm0, %v3679_v30, 0.0 }
 0x590   :  { %v6127_v45 = vadd.f32 %v2076_v14, %v2075_v23  ;;  %v6129_v15 = vadd.f32 %v2204_v36, %v2203_v40  ;;  %v2086_v27 = vrot.slane %v2085_v24, 4  ;;  %v2216_v34 = vrot.slane %v2215_v37, 2 }
 0x591   :  { %v2093_v59 = vrot.slane %v2092_v61, 4  ;;  %v2222_v28 = vadd.f32 %v2221_v39, %v2220_v50  ;;  %v3622_v6 = vrot.slane %v3621_v41, 4  ;;  %v3750_v11 = vrot.slane %v3749_v55, 4 }
 0x592   :  { %v3733_v7 = vrot.slane %v3732_v9, 1  ;;  %v2081_v16 = vrot.slane %v2080_v43, 2  ;;  %v3550_v38 = vmul.f32 %v4434_v1, %v3505_v3  ;;  %v3678_v53 = vmul.f32 %v3505_v3, %v6477_v20 }
 0x593   :  { %v6132_v29 = vadd.f32 %v3605_v17, %v3604_v33  ;;  %v2209_v48 = vrot.slane %v2208_v8, 2  ;;  %v2223_v49 = vrot.slane %v2222_v28, 2  ;;  %v3751_v23 = vadd.f32 %v3750_v11, %v3749_v55  ;;  %v6478_v33 = vld [vmem:[#allocation38_spill] sm:$0xff] }
 0x594   :  { %v2087_v26 = vadd.f32 %v2086_v27, %v2085_v24  ;;  %v3623_v40 = vadd.f32 %v3622_v6, %v3621_v41  ;;  %v3614_v12 = vsel %vm109_vm0, %v3550_v38, 0.0  ;;  %v3742_v32 = vsel %vm109_vm0, %v3678_v53, 0.0  ;;  %v4436_v27 = vld [vmem:[#allocation7 + $0x38] sm:$0xff]  ;;  %v1991_v6 = vpop.permute.xlu1 %1990 }
 0x595   :  { %v2217_v13 = vadd.f32 %v2216_v34, %v2215_v37  ;;  %v2094_v22 = vadd.f32 %v2093_v59, %v2092_v61  ;;  %v2224_v35 = vadd.f32 %v2223_v49, %v2222_v28  ;;  %v3752_v19 = vrot.slane %v3751_v23, 2  ;;  %v6479_v59 = vld [vmem:[#allocation27_spill] sm:$0xff] }
 0x596   :  { %v3615_v52 = vrot.slane %v3614_v12, 4  ;;  %v3743_v25 = vrot.slane %v3742_v32, 4  ;;  %v2023_v31 = vmul.f32 %v4435_v4, %v1986_v63  ;;  %v2151_v60 = vmul.f32 %v1986_v63, %v6478_v33 }
 0x597   :  { %v6137_v62 = vadd.f32 %v3733_v7, %v3732_v9  ;;  %v6139_v14 = vadd.f32 %v2081_v16, %v2080_v43  ;;  %v2225_v36 = vrot.slane %v2224_v35, 1  ;;  %v3753_v24 = vadd.f32 %v3752_v19, %v3751_v23  ;;  %v4437_v19 = vld [vmem:[#allocation7 + $0x50] sm:$0xff] }
 0x598   :  { %v3624_v50 = vrot.slane %v3623_v40, 2  ;;  %v3616_v18 = vadd.f32 %v3615_v52, %v3614_v12  ;;  %v3744_v21 = vadd.f32 %v3743_v25, %v3742_v32  ;;  %v2227_v37 = vsel %vm109_vm0, %v2151_v60, 0.0  ;;  %v6480_v25 = vld [vmem:[#allocation37_spill] sm:$0xff] }
 0x599   :  { %v6142_v30 = vadd.f32 %v2209_v48, %v2208_v8  ;;  %v2088_v61 = vrot.slane %v2087_v26, 2  ;;  %v2218_v17 = vrot.slane %v2217_v13, 1  ;;  %v3754_v39 = vrot.slane %v3753_v24, 1 }
 0x59a   :  { %v2095_v41 = vrot.slane %v2094_v22, 2  ;;  %v3745_v55 = vrot.slane %v3744_v21, 2  ;;  %v2099_v9 = vsel %vm109_vm0, %v2023_v31, 0.0  ;;  %v2228_v3 = vrot.slane %v2227_v37, 4 }
 0x59b   :  { %v2226_v43 = vadd.f32 %v2225_v36, %v2224_v35  ;;  %v3755_v63 = vadd.f32 %v3754_v39, %v3753_v24  ;;  %v3549_v34 = vmul.f32 %v4436_v27, %v3500_v54  ;;  %v3677_v28 = vmul.f32 %v6479_v59, %v3500_v54  ;;  %v4438_v59 = vld [vmem:[#allocation5 + $0x78] sm:$0xff] }
 0x59c   :  { %v3625_v11 = vadd.f32 %v3624_v50, %v3623_v40  ;;  %v3617_v7 = vrot.slane %v3616_v18, 2  ;;  %v3746_v16 = vadd.f32 %v3745_v55, %v3744_v21  ;;  %v2229_v8 = vadd.f32 %v2228_v3, %v2227_v37 }
 0x59d   :  { %v3823_v1 = vadd.f32 %v3755_v63, %v2226_v43  ;;  %v2100_v38 = vrot.slane %v2099_v9, 4  ;;  %v3607_v20 = vsel %vm109_vm0, %v3549_v34, 0.0  ;;  %v3735_v53 = vsel %vm109_vm0, %v3677_v28, 0.0 }
 0x59e   :  { %v2089_v48 = vadd.f32 %v2088_v61, %v2087_v26  ;;  %v2219_v49 = vadd.f32 %v2218_v17, %v2217_v13  ;;  %v2096_v23 = vadd.f32 %v2095_v41, %v2094_v22  ;;  %v3747_v12 = vrot.slane %v3746_v16, 1  ;;  %v3520_v26 = vpop.permute.xlu1 %3519 }
 0x59f   :  { %v2230_v32 = vrot.slane %v2229_v8, 2  ;;  %v3736_v35 = vrot.slane %v3735_v53, 4  ;;  %v3552_v52 = vmul.f32 %v4437_v19, %v3515_v0  ;;  %v3680_v4 = vmul.f32 %v3515_v0, %v6480_v25 }
 0x5a0   :  { %v3626_v40 = vrot.slane %v3625_v11, 1  ;;  %v3618_v31 = vadd.f32 %v3617_v7, %v3616_v18  ;;  %v3748_v33 = vadd.f32 %v3747_v12, %v3746_v16  ;;  %v3608_v60 = vrot.slane %v3607_v20, 4  ;;  %v2011_v18 = vpop.permute.xlu0 %2010  ;;  %v6481_v7 = vld [vmem:[#allocation44_spill] sm:$0xff] }
 0x5a1   :  { %v2101_v36 = vadd.f32 %v2100_v38, %v2099_v9  ;;  %v3737_v24 = vadd.f32 %v3736_v35, %v3735_v53  ;;  %v3628_v50 = vsel %vm109_vm0, %v3552_v52, 0.0  ;;  %v3756_v21 = vsel %vm109_vm0, %v3680_v4, 0.0  ;;  %v4439_v38 = vld [vmem:[#allocation5 + $0x58] sm:$0xff] }
 0x5a2   :  { %v2083_v13 = vrot.slane %v6139_v14, 1  ;;  %v2211_v22 = vrot.slane %v6142_v30, 1  ;;  %v2090_v37 = vrot.slane %v2089_v48, 1  ;;  %v3822_v54 = vadd.f32 %v3748_v33, %v2219_v49  ;;  %v6482_v49 = vld [vmem:[#allocation36_spill] sm:$0xff]  ;;  %v1996_v19 = vpop.permute.xlu1 %1995 }
 0x5a3   :  { %v2097_v61 = vrot.slane %v2096_v23, 1  ;;  %v2231_v17 = vadd.f32 %v2230_v32, %v2229_v8  ;;  %v3629_v0 = vrot.slane %v3628_v50, 4  ;;  %v3757_v39 = vrot.slane %v3756_v21, 4 }
 0x5a4   :  { %v3627_v41 = vadd.f32 %v3626_v40, %v3625_v11  ;;  %v3619_v55 = vrot.slane %v3618_v31, 1  ;;  %v3861_v9 = vsel %vm1375_vm1, %v3823_v1, %v3822_v54  ;;  %v3609_v3 = vadd.f32 %v3608_v60, %v3607_v20  ;;  %v4440_v54 = vld [vmem:[#allocation7 + $0x58] sm:$0xff] }
 0x5a5   :  { %v2102_v43 = vrot.slane %v2101_v36, 2  ;;  %v3738_v63 = vrot.slane %v3737_v24, 2  ;;  %v3630_v27 = vadd.f32 %v3629_v0, %v3628_v50  ;;  %v3758_v34 = vadd.f32 %v3757_v39, %v3756_v21  ;;  %v6483_v0 = vld [vmem:[#allocation35_spill] sm:$0xff] }
 0x5a6   :  { %v2028_v28 = vmul.f32 %v4438_v59, %v2011_v18  ;;  %v2156_v16 = vmul.f32 %v6481_v7, %v2011_v18  ;;  %v2024_v53 = vmul.f32 %v4439_v38, %v1991_v6  ;;  %v2152_v8 = vmul.f32 %v6482_v49, %v1991_v6 }
 0x5a7   :  { %v2091_v12 = vadd.f32 %v2090_v37, %v2089_v48  ;;  %v2098_v32 = vadd.f32 %v2097_v61, %v2096_v23  ;;  %v2232_v35 = vrot.slane %v2231_v17, 1  ;;  %v3759_v11 = vrot.slane %v3758_v34, 2 }
 0x5a8   :  { %v3610_v52 = vrot.slane %v3609_v3, 2  ;;  %v3631_v1 = vrot.slane %v3630_v27, 2  ;;  %v2106_v20 = vsel %vm109_vm0, %v2024_v53, 0.0  ;;  %v2234_v25 = vsel %vm109_vm0, %v2152_v8, 0.0 }
 0x5a9   :  { %v3807_v4 = vadd.f32 %v3627_v41, %v2098_v32  ;;  %v3620_v40 = vadd.f32 %v3619_v55, %v3618_v31  ;;  %v2103_v33 = vadd.f32 %v2102_v43, %v2101_v36  ;;  %v3760_v60 = vadd.f32 %v3759_v11, %v3758_v34  ;;  %v6163_v55 = vpop.permute.xlu1 %3524 }
 0x5aa   :  { %v3739_v50 = vadd.f32 %v3738_v63, %v3737_v24  ;;  %v2134_v21 = vsel %vm109_vm0, %v2028_v28, 0.0  ;;  %v2262_v6 = vsel %vm109_vm0, %v2156_v16, 0.0  ;;  %v2235_v48 = vrot.slane %v2234_v25, 4 }
 0x5ab   :  { %v3761_v23 = vrot.slane %v3760_v60, 1  ;;  %v2107_v37 = vrot.slane %v2106_v20, 4  ;;  %v3553_v61 = vmul.f32 %v4440_v54, %v3520_v26  ;;  %v3681_v39 = vmul.f32 %v6483_v0, %v3520_v26  ;;  %v4441_v54 = vld [vmem:[#allocation5 + $0x60] sm:$0xff] }
 0x5ac   :  { %v2233_v18 = vadd.f32 %v2232_v35, %v2231_v17  ;;  %v3611_v59 = vadd.f32 %v3610_v52, %v3609_v3  ;;  %v3632_v7 = vadd.f32 %v3631_v1, %v3630_v27  ;;  %v2236_v38 = vadd.f32 %v2235_v48, %v2234_v25 }
 0x5ad   :  { %v3762_v41 = vadd.f32 %v3761_v23, %v3760_v60  ;;  %v2135_v31 = vrot.slane %v2134_v21, 4  ;;  %v3635_v36 = vsel %vm109_vm0, %v3553_v61, 0.0  ;;  %v3763_v24 = vsel %vm109_vm0, %v3681_v39, 0.0  ;;  %v6484_v60 = vld [vmem:[#allocation42_spill] sm:$0xff]  ;;  %v2001_v23 = vpop.permute.xlu1 %2000 }
 0x5ae   :  { %v3806_v43 = vadd.f32 %v3620_v40, %v2091_v12  ;;  %v3740_v63 = vrot.slane %v3739_v50, 1  ;;  %v2263_v34 = vrot.slane %v2262_v6, 4  ;;  %v2237_v28 = vrot.slane %v2236_v38, 2 }
 0x5af   :  { %v3824_v16 = vadd.f32 %v3762_v41, %v2233_v18  ;;  %v2108_v53 = vadd.f32 %v2107_v37, %v2106_v20  ;;  %v3636_v49 = vrot.slane %v3635_v36, 4  ;;  %v3764_v26 = vrot.slane %v3763_v24, 4 }
 0x5b0   :  { %v2084_v17 = vadd.f32 %v2083_v13, %v6139_v14  ;;  %v2104_v3 = vrot.slane %v2103_v33, 1  ;;  %v3612_v27 = vrot.slane %v3611_v59, 1  ;;  %v2238_v8 = vadd.f32 %v2237_v28, %v2236_v38 }
 0x5b1   :  { %v3633_v32 = vrot.slane %v3632_v7, 1  ;;  %v3862_v35 = vsel %vm1377_vm6, %v3824_v16, %v3861_v9  ;;  %v2136_v11 = vadd.f32 %v2135_v31, %v2134_v21  ;;  %v3765_v52 = vadd.f32 %v3764_v26, %v3763_v24 }
 0x5b2   :  { %v2212_v12 = vadd.f32 %v2211_v22, %v6142_v30  ;;  %v6171_v1 = vsel %vm1375_vm1, %v3807_v4, %v3806_v43  ;;  %v3741_v20 = vadd.f32 %v3740_v63, %v3739_v50  ;;  %v3637_v25 = vadd.f32 %v3636_v49, %v3635_v36  ;;  %v3530_v63 = vpop.permute.xlu1 %3529 }
 0x5b3   :  { %v6173_v40 = vadd.f32 %v2263_v34, %v2262_v6  ;;  %v2109_v14 = vrot.slane %v2108_v53, 2  ;;  %v3766_v13 = vrot.slane %v3765_v52, 2  ;;  %v2153_v48 = vmul.f32 %v1996_v19, %v6484_v60 }
 0x5b4   :  { %v2105_v37 = vadd.f32 %v2104_v3, %v2103_v33  ;;  %v3613_v9 = vadd.f32 %v3612_v27, %v3611_v59  ;;  %v2239_v21 = vrot.slane %v2238_v8, 1  ;;  %v2025_v61 = vmul.f32 %v4441_v54, %v1996_v19 }
 0x5b5   :  { %v3634_v0 = vadd.f32 %v3633_v32, %v3632_v7  ;;  %v2137_v39 = vrot.slane %v2136_v11, 2  ;;  %v3767_v30 = vadd.f32 %v3766_v13, %v3765_v52  ;;  %v2241_v22 = vsel %vm109_vm0, %v2153_v48, 0.0  ;;  %v6485_v32 = vld [vmem:[#allocation41_spill] sm:$0xff]  ;;  %v3831_v52 = vld [vmem:[%s6332_s11 + $0x8] sm:$0xff] }
 0x5b6   :  { %v3638_v4 = vrot.slane %v3637_v25, 2  ;;  %v2242_v50 = vrot.slane %v2241_v22, 4  ;;  %v3820_v6 = vadd.f32 %v6137_v62, %v6129_v15  ;;  %v3821_v18 = vadd.f32 %v3741_v20, %v2212_v12  ;;  %v4443_v20 = vld [vmem:[#allocation5 + $0x68] sm:$0xff]  ;;  %v2006_v48 = vpop.permute.xlu1 %2005 }
 0x5b7   :  { %v2265_v38 = vrot.slane %v6173_v40, 2  ;;  %v6180_v41 = vadd.f32 %v2109_v14, %v2108_v53  ;;  %v3768_v33 = vrot.slane %v3767_v30, 1  ;;  %v3855_v19 = vsel %vm1377_vm6, %v6061_v57, %v6053_v56  ;;  %v6486_v14 = vld [vmem:[#allocation40_spill] sm:$0xff] }
 0x5b8   :  { %v2240_v59 = vadd.f32 %v2239_v21, %v2238_v8  ;;  %v2113_v7 = vsel %vm109_vm0, %v2025_v61, 0.0  ;;  %v2243_v31 = vadd.f32 %v2242_v50, %v2241_v22  ;;  %v3856_v36 = vsel %vm1379_vm7, %v6076_v44, %v3855_v19  ;;  %v4444_v50 = vld [vmem:[#allocation7 + $0x68] sm:$0xff]  ;;  %v4445_v19 = vld [vmem:[#allocation5 + $0x70] sm:$0xff] }
 0x5b9   :  { %v3769_v24 = vadd.f32 %v3768_v33, %v3767_v30  ;;  %v3857_v15 = vsel %vm1381_vm8, %v6089_v5, %v3856_v36  ;;  %v3804_v62 = vadd.f32 %v6132_v29, %v6127_v45  ;;  %v3964_v43 = vsel %vm1377_vm6, %v6107_v58, %v6102_v42 }
 0x5ba   :  { %v6195_v56 = vadd.f32 %v3638_v4, %v3637_v25  ;;  %v3858_v57 = vsel %vm1383_vm9, %v6104_v10, %v3857_v15  ;;  %v3805_v34 = vadd.f32 %v3613_v9, %v2084_v17  ;;  %v3965_v44 = vsel %vm1379_vm7, %v6113_v46, %v3964_v43  ;;  %v3834_v10 = vld [vmem:[%s6333_s12] sm:$0xff]  ;;  %v3835_v46 = vld [vmem:[%s6333_s12 + $0x8] sm:$0xff]  ;;  %v4442_v17 = vld [vmem:[#allocation7 + $0x60] sm:$0xff] }
 0x5bb   :  { %v6201_v28 = vadd.f32 %v3634_v0, %v2105_v37  ;;  %v3825_v5 = vadd.f32 %v3769_v24, %v2240_v59  ;;  %v3859_v16 = vsel %vm1385_vm10, %v3820_v6, %v3858_v57  ;;  %v3966_v45 = vsel %vm1381_vm8, %v6116_v51, %v3965_v44 }
 0x5bc   :  { %v2114_v29 = vrot.slane %v2113_v7, 4  ;;  %v2244_v42 = vrot.slane %v2243_v31, 2  ;;  %v3860_v58 = vsel %vm1387_vm11, %v3821_v18, %v3859_v16  ;;  %v3967_v53 = vsel %vm1383_vm9, %v6119_v47, %v3966_v45  ;;  %v6487_v18 = vld [vmem:[#allocation39_spill] sm:$0xff] }
 0x5bd   :  { %v6215_v49 = vadd.f32 %v2137_v39, %v2136_v11  ;;  %v6218_v26 = vsel %vm1379_vm7, %v3825_v5, %v3862_v35  ;;  %4276 = vmatprep.mubr.msk.f32.mxu1 %vm109_vm0, %v3860_v58  ;;  %v3968_v51 = vsel %vm1385_vm10, %v3804_v62, %v3967_v53  ;;  %v3554_v47 = vmul.f32 %v4442_v17, %v6163_v55  ;;  %v3830_v35 = vld [vmem:[%s6332_s11] sm:$0xff]  ;;  %v3535_v5 = vpop.permute.xlu1 %3534 }
 0x5be   :  { %v2111_v3 = vrot.slane %v6180_v41, 1  ;;  %v3640_v27 = vrot.slane %v6195_v56, 1  ;;  %v3969_v8 = vsel %vm1387_vm11, %v3805_v34, %v3968_v51  ;;  %v3682_v11 = vmul.f32 %v6163_v55, %v6485_v32 }
 0x5bf   :  { %4287 = vmatprep.mubr.msk.f32.mxu0 %vm109_vm0, %v3969_v8  ;;  %v3642_v12 = vsel %vm109_vm0, %v3554_v47, 0.0  ;;  %v2026_v25 = vmul.f32 %v4443_v20, %v2001_v23  ;;  %v2154_v13 = vmul.f32 %v6486_v14, %v2001_v23  ;;  %v4314_v60 = vpack.c.bf16 %v3835_v46, %v3834_v10 }
 0x5c0   :  { %v2115_v37 = vadd.f32 %v2114_v29, %v2113_v7  ;;  %v2245_v55 = vadd.f32 %v2244_v42, %v2243_v31  ;;  %v3643_v9 = vrot.slane %v3642_v12, 4  ;;  %v3770_v21 = vsel %vm109_vm0, %v3682_v11, 0.0  ;;  %v6488_v7 = vld [vmem:[#allocation46_spill] sm:$0xff] }
 0x5c1   :  { %v3771_v54 = vrot.slane %v3770_v21, 4  ;;  %v2120_v61 = vsel %vm109_vm0, %v2026_v25, 0.0  ;;  %v2248_v0 = vsel %vm109_vm0, %v2154_v13, 0.0  ;;  %4315 = vmatprep.subr.bf16.mxu1 %v4314_v60  ;;  %v4322_v39 = vpack.c.bf16 %v3831_v52, %v3830_v35 }
 0x5c2   :  { %v3644_v30 = vadd.f32 %v3643_v9, %v3642_v12  ;;  %v2121_v22 = vrot.slane %v2120_v61, 4  ;;  %v2249_v4 = vrot.slane %v2248_v0, 4  ;;  %4317 = vmatpush3.bf16.msra.mxu1 %v4314_v60  ;;  %v3555_v23 = vmul.f32 %v4444_v50, %v3530_v63 }
 0x5c3   :  { %v3772_v6 = vadd.f32 %v3771_v54, %v3770_v21  ;;  %4323 = vmatprep.subr.bf16.mxu0 %v4322_v39  ;;  %v3683_v33 = vmul.f32 %v6487_v18, %v3530_v63  ;;  %v2027_v59 = vmul.f32 %v4445_v19, %v2006_v48  ;;  %v2155_v31 = vmul.f32 %v2006_v48, %v6488_v7 }
 0x5c4   :  { %v2116_v36 = vrot.slane %v2115_v37, 2  ;;  %v2122_v24 = vadd.f32 %v2121_v22, %v2120_v61  ;;  %v2250_v15 = vadd.f32 %v2249_v4, %v2248_v0  ;;  %4325 = vmatpush3.bf16.msra.mxu0 %v4322_v39  ;;  %v3649_v62 = vsel %vm109_vm0, %v3555_v23, 0.0  ;;  %v6489_v4 = vld [vmem:[#allocation45_spill] sm:$0xff]  ;;  %v4447_v23 = vld [vmem:[#allocation7 + $0x78] sm:$0xff] }
 0x5c5   :  { %v3773_v43 = vrot.slane %v3772_v6, 2  ;;  %v3650_v57 = vrot.slane %v3649_v62, 4  ;;  %v3777_v34 = vsel %vm109_vm0, %v3683_v33, 0.0  ;;  %v2127_v44 = vsel %vm109_vm0, %v2027_v59, 0.0  ;;  %v6490_v33 = vld [vmem:[#allocation43_spill] sm:$0xff] }
 0x5c6   :  { %v2246_v16 = vrot.slane %v2245_v55, 1  ;;  %v3645_v45 = vrot.slane %v3644_v30, 2  ;;  %v2251_v63 = vrot.slane %v2250_v15, 2  ;;  %v3778_v29 = vrot.slane %v3777_v34, 4 }
 0x5c7   :  { %v3774_v42 = vadd.f32 %v3773_v43, %v3772_v6  ;;  %v3651_v58 = vadd.f32 %v3650_v57, %v3649_v62  ;;  %v2128_v53 = vrot.slane %v2127_v44, 4  ;;  %v2255_v10 = vsel %vm109_vm0, %v2155_v31, 0.0  ;;  %v3836_v31 = vld [vmem:[%s6333_s12 + $0x10] sm:$0xff] }
 0x5c8   :  { %v6246_v46 = vadd.f32 %v2116_v36, %v2115_v37  ;;  %v2123_v51 = vrot.slane %v2122_v24, 2  ;;  %v2252_v17 = vadd.f32 %v2251_v63, %v2250_v15  ;;  %v3779_v47 = vadd.f32 %v3778_v29, %v3777_v34  ;;  %v3540_v37 = vpop.permute.xlu1 %3539  ;;  %v3837_v36 = vld [vmem:[%s6333_s12 + $0x18] sm:$0xff]  ;;  %v3832_v57 = vld [vmem:[%s6332_s11 + $0x10] sm:$0xff] }
 0x5c9   :  { %v3775_v8 = vrot.slane %v3774_v42, 1  ;;  %v3652_v32 = vrot.slane %v3651_v58, 2  ;;  %v2129_v11 = vadd.f32 %v2128_v53, %v2127_v44  ;;  %v2256_v35 = vrot.slane %v2255_v10, 4  ;;  %v3833_v34 = vld [vmem:[%s6332_s11 + $0x18] sm:$0xff] }
 0x5ca   :  { %v2139_v52 = vrot.slane %v6215_v49, 1  ;;  %v6252_v12 = vadd.f32 %v2265_v38, %v6173_v40  ;;  %v2247_v20 = vadd.f32 %v2246_v16, %v2245_v55  ;;  %v3780_v25 = vrot.slane %v3779_v47, 2 }
 0x5cb   :  { %v3646_v14 = vadd.f32 %v3645_v45, %v3644_v30  ;;  %v3776_v13 = vadd.f32 %v3775_v8, %v3774_v42  ;;  %v2253_v60 = vrot.slane %v2252_v17, 1  ;;  %v2257_v48 = vadd.f32 %v2256_v35, %v2255_v10  ;;  %v4446_v30 = vld [vmem:[#allocation7 + $0x70] sm:$0xff] }
 0x5cc   :  { %v2112_v9 = vadd.f32 %v2111_v3, %v6180_v41  ;;  %v3641_v21 = vadd.f32 %v3640_v27, %v6195_v56  ;;  %v2118_v54 = vrot.slane %v6246_v46, 1  ;;  %v3781_v61 = vadd.f32 %v3780_v25, %v3779_v47 }
 0x5cd   :  { %v3826_v40 = vadd.f32 %v3776_v13, %v2247_v20  ;;  %v2124_v38 = vadd.f32 %v2123_v51, %v2122_v24  ;;  %v3653_v55 = vadd.f32 %v3652_v32, %v3651_v58  ;;  %v2130_v0 = vrot.slane %v2129_v11, 2 }
 0x5ce   :  { %v3782_v39 = vrot.slane %v3781_v61, 1  ;;  %v3556_v22 = vmul.f32 %v4446_v30, %v3535_v5  ;;  %v3684_v50 = vmul.f32 %v3535_v5, %v6489_v4  ;;  %v3557_v6 = vmul.f32 %v4447_v23, %v3540_v37 }
 0x5cf   :  { %v3647_v18 = vrot.slane %v3646_v14, 1  ;;  %v2254_v41 = vadd.f32 %v2253_v60, %v2252_v17  ;;  %v2258_v3 = vrot.slane %v2257_v48, 2  ;;  %v3685_v19 = vmul.f32 %v6490_v33, %v3540_v37 }
 0x5d0   :  { %v3783_v56 = vadd.f32 %v3782_v39, %v3781_v61  ;;  %v3656_v27 = vsel %vm109_vm0, %v3556_v22, 0.0  ;;  %v3784_v59 = vsel %vm109_vm0, %v3684_v50, 0.0  ;;  %v3663_v7 = vsel %vm109_vm0, %v3557_v6, 0.0 }
 0x5d1   :  { %v2125_v24 = vrot.slane %v2124_v38, 1  ;;  %v3654_v15 = vrot.slane %v3653_v55, 1  ;;  %v2131_v62 = vadd.f32 %v2130_v0, %v2129_v11  ;;  %v3657_v43 = vrot.slane %v3656_v27, 4 }
 0x5d2   :  { %v3827_v44 = vadd.f32 %v3783_v56, %v2254_v41  ;;  %v3785_v5 = vrot.slane %v3784_v59, 4  ;;  %v3664_v16 = vrot.slane %v3663_v7, 4  ;;  %v3791_v45 = vsel %vm109_vm0, %v3685_v19, 0.0 }
 0x5d3   :  { %v2259_v63 = vadd.f32 %v2258_v3, %v2257_v48  ;;  %v3658_v29 = vadd.f32 %v3657_v43, %v3656_v27  ;;  %v3792_v42 = vrot.slane %v3791_v45, 4  ;;  %v4318_v58 = vpack.c.bf16 %v3837_v36, %v3836_v31 }
 0x5d4   :  { %v3786_v53 = vadd.f32 %v3785_v5, %v3784_v59  ;;  %v3665_v10 = vadd.f32 %v3664_v16, %v3663_v7  ;;  %v4326_v51 = vpack.c.bf16 %v3833_v34, %v3832_v57  ;;  %v3864_v17 = vsel %vm1381_vm8, %v3826_v40, %v6218_v26 }
 0x5d5   :  { %v3648_v47 = vadd.f32 %v3647_v18, %v3646_v14  ;;  %v3659_v8 = vrot.slane %v3658_v29, 2  ;;  %v3793_v32 = vadd.f32 %v3792_v42, %v3791_v45  ;;  %4319 = vmatprep.subr.bf16.mxu1 %v4318_v58  ;;  %v3865_v11 = vsel %vm1383_vm9, %v3827_v44, %v3864_v17  ;;  %v4449_v42 = vld [vmem:[#allocation2] sm:$0xff] }
 0x5d6   :  { %v3809_v35 = vadd.f32 %v3641_v21, %v2112_v9  ;;  %v3655_v20 = vadd.f32 %v3654_v15, %v3653_v55  ;;  %v3787_v25 = vrot.slane %v3786_v53, 2  ;;  %v3666_v13 = vrot.slane %v3665_v10, 2  ;;  %4327 = vmatprep.subr.bf16.mxu0 %v4326_v51  ;;  %4321 = vmatpush3.bf16.msra.mxu1 %v4318_v58 }
 0x5d7   :  { %v2119_v60 = vadd.f32 %v2118_v54, %v6246_v46  ;;  %v2132_v48 = vrot.slane %v2131_v62, 1  ;;  %v3660_v37 = vadd.f32 %v3659_v8, %v3658_v29  ;;  %v3794_v61 = vrot.slane %v3793_v32, 2  ;;  %4329 = vmatpush3.bf16.msra.mxu0 %v4326_v51 }
 0x5d8   :  { %v2126_v0 = vadd.f32 %v2125_v24, %v2124_v38  ;;  %v2260_v26 = vrot.slane %v2259_v63, 1  ;;  %v3788_v14 = vadd.f32 %v3787_v25, %v3786_v53  ;;  %v3667_v40 = vadd.f32 %v3666_v13, %v3665_v10 }
 0x5d9   :  { %v2267_v39 = vrot.slane %v6252_v12, 1  ;;  %v3810_v30 = vadd.f32 %v3648_v47, %v2119_v60  ;;  %v3661_v22 = vrot.slane %v3660_v37, 1  ;;  %v3795_v9 = vadd.f32 %v3794_v61, %v3793_v32 }
 0x5da   :  { %v3971_v21 = vsel %vm1377_vm6, %v6201_v28, %v6171_v1  ;;  %v3811_v55 = vadd.f32 %v3655_v20, %v2126_v0  ;;  %v3789_v4 = vrot.slane %v3788_v14, 1  ;;  %v3668_v46 = vrot.slane %v3667_v40, 1 }
 0x5db   :  { %v2140_v54 = vadd.f32 %v2139_v52, %v6215_v49  ;;  %v2133_v38 = vadd.f32 %v2132_v48, %v2131_v62  ;;  %v3662_v50 = vadd.f32 %v3661_v22, %v3660_v37  ;;  %v3796_v23 = vrot.slane %v3795_v9, 1 }
 0x5dc   :  { %v3972_v6 = vsel %vm1379_vm7, %v3809_v35, %v3971_v21  ;;  %v2261_v18 = vadd.f32 %v2260_v26, %v2259_v63  ;;  %v3790_v41 = vadd.f32 %v3789_v4, %v3788_v14  ;;  %v3669_v3 = vadd.f32 %v3668_v46, %v3667_v40  ;;  %v4448_v63 = vld [vmem:[#allocation2 + $0x8] sm:$0xff] }
 0x5dd   :  { %v2268_v33 = vadd.f32 %v2267_v39, %v6252_v12  ;;  %v3812_v19 = vadd.f32 %v3662_v50, %v2133_v38  ;;  %v3797_v56 = vadd.f32 %v3796_v23, %v3795_v9  ;;  %v3973_v1 = vsel %vm1381_vm8, %v3810_v30, %v3972_v6  ;;  %v4056_v12 = vld [vmem:[%s6334_s13] sm:$0x1]  ;;  %s4538_s13 = scalar_lea.vmem %s4076_s10, 256 }
 0x5de   :  { %v3828_v28 = vadd.f32 %v3790_v41, %v2261_v18  ;;  %v3813_v27 = vadd.f32 %v3669_v3, %v2140_v54  ;;  %v3974_v59 = vsel %vm1383_vm9, %v3811_v55, %v3973_v1  ;;  %v4057_v24 = vmul.f32 2.0, %v4056_v12  ;;  %p4539_p4 = scmp.ne.s32.totalorder %s4076_s10, %s4538_s13  ;;  %p4544_p6 = scmp.lt.s32.totalorder %s4538_s13, %s4538_s13 }
 0x5df   :  { %v3829_v7 = vadd.f32 %v3797_v56, %v2268_v33  ;;  %v3975_v49 = vsel %vm1385_vm10, %v3812_v19, %v3974_v59 }
 0x5e0   :  { %v3866_v52 = vsel %vm1385_vm10, %v3828_v28, %v3865_v11  ;;  %v3976_v31 = vsel %vm1387_vm11, %v3813_v27, %v3975_v49  ;;  %v4062_v62 = vrot.slane %v4057_v24, %v4731_v2  ;;  %p4545_p7 = por %p4544_p6, %p4543_p5 }
 0x5e1   :  { %v3867_v36 = vsel %vm1387_vm11, %v3829_v7, %v3866_v52  ;;  %4288 = vmatmul.mubr.msk.f32.vlgmr.msra.gmra.mrb[18].mxu0 %vm109_vm0, %v3976_v31 }
 0x5e2   :  { %4277 = vmatmul.mubr.msk.f32.vlgmr.msra.gmra.mrb[18].mxu1 %vm109_vm0, %v3867_v36  ;;  %p4546_p8 = pnand %p4545_p7, %p4539_p4 }
 0x6b4   :  { %v4289_v15 = vpop.f32.mrb[18].mxu0 }
 0x6b5   :  { %v4278_v43 = vpop.f32.mrb[18].mxu1  ;;  %v4047_v57 = vpop.f32.mrb[19].mxu0 }
 0x6b6   :  { %v4053_v34 = vadd.f32 %v4289_v15, %v4278_v43  ;;  %v3938_v44 = vpop.f32.mrb[19].mxu1 }
 0x6b7   :  { %v4048_v5 = vadd.f32 %v4047_v57, %v3938_v44 }
 0x6b8   :  { %v4065_v16 = vadd.f32 %v4062_v62, %v4053_v34 }
 0x6b9   :  { %v4064_v45 = vadd.f32 %v4062_v62, %v4048_v5 }
 0x6ba   :  { %v4067_v29 = vadd.f32 %v4448_v63, %v4065_v16 }
 0x6bb   :  { %v4066_v58 = vadd.f32 %v4449_v42, %v4064_v45 }
 0x6bc   :  { %4069 = vst.msk [vmem:[#allocation10 + $0x8] sm:$0xff] %vm109_vm0, %v4067_v29 }
 0x6bd   :  { %4068 = vst.msk [vmem:[#allocation10] sm:$0xff] %vm109_vm0, %v4066_v58 }
 0x6be   :  { %4549 = shalt.err (!%p4546_p8)
}
 0x6bf   :  { %s4550_s16 = scalar_lea.hbm %s6335_s14, 256 }
 0x6c0   :  { %p4551_p9 = scmp.ne.s32.totalorder %s6335_s14, %s4550_s16  ;;  %p4554_p10 = scmp.lt.u32.totalorder %s4550_s16, %s6335_s14 }
 0x6c2   :  { %p4556_p11 = pnand %p4554_p10, %p4551_p9 }
 0x6c4   :  { %4559 = shalt.err (!%p4556_p11)
}
 0x6c5   :  { %4081 = dma.vmem_to_hbm [thread:$0]  %s4076_s10, 256, %s6335_s14, [#allocation4], %s4570_s25, %s4570_s25, %s4571_s26  }
 0x6c6   :  { %4566 = dma.done.wait [#allocation4], 256  }
 0x6c7   :  { %4567 = vsyncadd [#allocation4], 4294967040 }
 0x6c8   :  { %4085 = vsyncpa [#allocation3], 1 }
 0x6c9   :  { %4086 = vsyncpa [#allocation6], 1 }
 0x6ca   :  { %4087 = vsyncpa [#allocation9], 1 }
 0x6cb   :  { %4088 = vsyncpa [#allocation4], 1 }

</bundles_post_ra>
